<compile_context>
chip_gen: v7x
topology: tpu7x:2x2x1
jax: 0.10.0
libtpu: 0.0.40
codegen_flags: <defaults>
</compile_context>

<pallas_src>
import math

import jax
import jax.numpy as jnp
from jax.experimental import pallas as pl
from jax.experimental.pallas import tpu as pltpu

LANE = 128


def _ceil_to(x, m):
    return ((x + m - 1) // m) * m


# ----------------------------------------------------------------------------
# Packing helpers: column slabs (lane-aligned segments) + one flat bias slab
# ----------------------------------------------------------------------------
class _Slab:
    """Column-concatenation of same-row-count matrices, 128-lane aligned."""

    def __init__(self, rows):
        self.rows = int(rows)
        self.cols = 0
        self.items = []

    def add(self, w):
        assert w.shape[0] == self.rows, (w.shape, self.rows)
        off = self.cols
        self.items.append((off, w))
        self.cols = off + _ceil_to(int(w.shape[1]), LANE)
        return off

    def build(self, dtype):
        out = jnp.zeros((self.rows, max(self.cols, LANE)), dtype)
        for off, w in self.items:
            out = out.at[:, off:off + w.shape[1]].set(w.astype(dtype))
        return out


class _BiasPack:
    """All (1, n) biases concatenated into one f32 row, 128-lane aligned."""

    def __init__(self):
        self.cols = 0
        self.items = []

    def add(self, b):
        off = self.cols
        self.items.append((off, b))
        self.cols = off + _ceil_to(int(b.shape[1]), LANE)
        return off

    def build(self):
        out = jnp.zeros((1, max(self.cols, LANE)), jnp.float32)
        for off, b in self.items:
            out = out.at[:, off:off + b.shape[1]].set(b.astype(jnp.float32))
        return out


# ----------------------------------------------------------------------------
# Fused kernel (built per block size; static metadata closed over)
# ----------------------------------------------------------------------------
def _make_kernel(cfg, block):
    meta = cfg["meta"]
    order = cfg["slab_order"]
    nslab = len(order)
    H, Wf = cfg["H"], cfg["Wf"]

    def kernel(*refs):
        str_ref, pos_ref = refs[0], refs[1]
        slabs = dict(zip(order, refs[2:2 + nslab]))
        bias_ref = refs[2 + nslab]
        o_ref = refs[3 + nslab]

        def lin(x, name, act=True):
            m = meta[name]
            w = slabs[m["slab"]][:, m["off"]:m["off"] + m["n"]]   # static, lane-aligned
            y = jnp.dot(x.astype(w.dtype), w, preferred_element_type=jnp.float32)
            y = y + bias_ref[:, m["boff"]:m["boff"] + m["n"]]
            return jnp.maximum(y, 0.0) if act else y

        # ---- str branch: residual MLP (bn1/bn2/bn3 folded into w3/w5/w7/w8/w9) ----
        x0 = str_ref[...]
        r0 = lin(x0, "w1")
        x = r0 + lin(r0, "w2")
        rr1 = x
        r1 = lin(x, "w3")
        x = r1 + lin(r1, "w4")
        r2 = lin(x, "w5")
        x = r2 + lin(r2, "w6")
        r3 = lin(x, "w7")
        x = r3 + lin(r3, "w4")                                 # w4 reused
        x = rr1 + lin(x, "w8")
        r4 = x
        x = r4 + lin(x, "w2")                                  # w2 reused
        r5 = lin(x, "w9")
        str_x = r5 + lin(r5, "w10")                            # (block, 50)

        # ---- conv branch: 4x (1,3) valid conv as block-Toeplitz matmuls ----
        # rows are h-major within the block: r = h*block + b  (block % 8 == 0)
        a = pos_ref[...]                                       # (H*block, W)
        a = lin(a, "c1")
        a = lin(a, "c2")
        a = lin(a, "c3")                                       # BatchNorm2d(20) folded
        a = lin(a, "c4")                                       # BatchNorm2d(25) folded

        # ---- pos head: fcp1 contraction accumulated over h (aligned slices) ----
        wa_ref = slabs["wa"]
        mf = meta["fcp1"]
        K = Wf * 50
        acc = jnp.zeros((block, mf["n"]), jnp.float32)
        for hh in range(H):                                    # unrolled, H is small
            acc = acc + jnp.dot(
                a[hh * block:(hh + 1) * block, :].astype(wa_ref.dtype),
                wa_ref[hh * K:(hh + 1) * K, 0:mf["n"]],
                preferred_element_type=jnp.float32)
        px = jnp.maximum(acc + bias_ref[:, mf["boff"]:mf["boff"] + mf["n"]], 0.0)
        px = lin(px, "fcp2")
        px = lin(px, "w11")                                    # BatchNorm1d(50) folded

        # ---- concat (as split matmul) + forward_ff head + out + sigmoid ----
        m1, m2 = meta["f1s"], meta["f1p"]
        w1s = slabs[m1["slab"]][:, m1["off"]:m1["off"] + m1["n"]]
        w1p = slabs[m2["slab"]][:, m2["off"]:m2["off"] + m2["n"]]
        xx = jnp.maximum(
            jnp.dot(str_x.astype(w1s.dtype), w1s, preferred_element_type=jnp.float32)
            + jnp.dot(px.astype(w1p.dtype), w1p, preferred_element_type=jnp.float32)
            + bias_ref[:, m1["boff"]:m1["boff"] + m1["n"]], 0.0)
        xx = lin(xx, "ff2")
        xx = lin(xx, "ff3")                                    # BatchNorm1d(30) folded
        xx = lin(xx, "ff4")
        y = lin(xx, "out", act=False)                          # BatchNorm1d(20) folded
        z = jnp.exp(-jnp.abs(y))                               # stable sigmoid
        o_ref[...] = jnp.where(y >= 0.0, 1.0 / (1.0 + z), z / (1.0 + z))

    return kernel


# ----------------------------------------------------------------------------
# Wrapper: row-block grid, constant-index weight BlockSpecs, parallel axis
# ----------------------------------------------------------------------------
def _estimate_cost(cfg, param_arrays, rows):
    meta, H = cfg["meta"], cfg["H"]
    flops = 0
    for name, m in meta.items():
        mult = H if name in ("c1", "c2", "c3", "c4") else 1
        if name in ("w2", "w4"):
            mult *= 2
        flops += 2 * rows * mult * m["k"] * m["n"]
    w_bytes = sum(int(a.size) * a.dtype.itemsize for a in param_arrays)
    io_bytes = rows * (cfg["str_dim"] + H * cfg["W"] + 1) * 4
    return int(flops), int(w_bytes + io_bytes)


def dizco_cnn_forward(param_arrays, str_values, pos_values, cfg, *, block_rows=128):
    H, W = cfg["H"], cfg["W"]
    B, S = str_values.shape
    assert pos_values.shape == (B, H, W)

    block = max(8, min(block_rows, _ceil_to(B, 8)))
    block = _ceil_to(block, 8)
    n_blocks = -(-B // block)
    Bp = n_blocks * block

    strp = jnp.zeros((Bp, S), jnp.float32).at[:B].set(str_values.astype(jnp.float32))
    posp = jnp.zeros((Bp, H, W), jnp.float32).at[:B].set(pos_values.astype(jnp.float32))
    # Per-block h-major row layout: within block i, row = h*block + b_local.
    pos_rows = (posp.reshape(n_blocks, block, H, W)
                    .transpose(0, 2, 1, 3)
                    .reshape(n_blocks * H * block, W))

    kernel = _make_kernel(cfg, block)

    in_specs = [
        pl.BlockSpec((block, S), lambda i: (i, 0)),
        pl.BlockSpec((H * block, W), lambda i: (i, 0)),
    ]
    # Weights: constant block index -> DMA'd once, VMEM-resident across blocks.
    for a in param_arrays:
        in_specs.append(pl.BlockSpec(a.shape, lambda i, nd=a.ndim: (0,) * nd))
    out_specs = pl.BlockSpec((block, 1), lambda i: (i, 0))

    flops, bytes_acc = _estimate_cost(cfg, param_arrays, Bp)
    out = pl.pallas_call(
        kernel,
        grid=(n_blocks,),
        in_specs=in_specs,
        out_specs=out_specs,
        out_shape=jax.ShapeDtypeStruct((Bp, 1), jnp.float32),
        compiler_params=pltpu.CompilerParams(
            dimension_semantics=("parallel",)),
        cost_estimate=pl.CostEstimate(flops=flops, transcendentals=Bp,
                                      bytes_accessed=bytes_acc),
    )(strp, pos_rows, *param_arrays)
    return out[:B]


# ----------------------------------------------------------------------------
# Parameter construction (PyTorch-equivalent shapes) + one-time packing
# ----------------------------------------------------------------------------
def init_params(key, str_dim, H, W):
    Wf = W - 8
    kit = iter(jax.random.split(key, 64))

    def lin(din, dout):
        bound = 1.0 / math.sqrt(din)
        w = jax.random.uniform(next(kit), (din, dout), jnp.float32, -bound, bound)
        b = jax.random.uniform(next(kit), (1, dout), jnp.float32, -bound, bound)
        return (w, b)

    def conv(cin, cout):
        bound = 1.0 / math.sqrt(cin * 1 * 3)
        w = jax.random.uniform(next(kit), (3, cin, cout), jnp.float32, -bound, bound)
        b = jax.random.uniform(next(kit), (1, cout), jnp.float32, -bound, bound)
        return (w, b)

    def bn(c):
        return dict(gamma=jnp.ones((1, c), jnp.float32),
                    beta=jnp.zeros((1, c), jnp.float32),
                    mean=jnp.zeros((1, c), jnp.float32),
                    var=jnp.ones((1, c), jnp.float32))

    p = {}
    p["w1"] = lin(str_dim, 100); p["w2"] = lin(100, 100); p["w3"] = lin(100, 125)
    p["w4"] = lin(125, 125);     p["w5"] = lin(125, 175); p["w6"] = lin(175, 175)
    p["w7"] = lin(175, 125);     p["w8"] = lin(125, 100); p["w9"] = lin(100, 50)
    p["w10"] = lin(50, 50);      p["w11"] = lin(50, 30)
    p["bn1"] = bn(100); p["bn2"] = bn(125); p["bn3"] = bn(175); p["bn4"] = bn(50)
    p["c1"] = conv(1, 10); p["c2"] = conv(10, 20)
    p["c3"] = conv(20, 25); p["c4"] = conv(25, 50)
    p["bn2d20"] = bn(20); p["bn2d25"] = bn(25)
    p["fcp1"] = lin(50 * H * Wf, 20); p["fcp2"] = lin(20, 50)
    p["ff1"] = lin(80, 25); p["ff2"] = lin(25, 30)
    p["ff3"] = lin(30, 30); p["ff4"] = lin(30, 20)
    p["bn30"] = bn(30); p["bn20"] = bn(20)
    p["out"] = lin(20, 1)
    return p


def _conv1x3_to_matrix(w, wi):
    """Valid (1,3) conv weight (3, Ci, Co) -> dense (wi*Ci, wo*Co) block-Toeplitz."""
    k, ci, co = w.shape
    wo = wi - k + 1
    d = jnp.arange(wi)[:, None] - jnp.arange(wo)[None, :]
    valid = (d >= 0) & (d < k)
    gathered = w[jnp.clip(d, 0, k - 1)]                            # (wi, wo, ci, co)
    t = jnp.where(valid[:, :, None, None], gathered, 0.0)
    return t.transpose(0, 2, 1, 3).reshape(wi * ci, wo * co)       # rows (w,c_in), cols (w,c_out)


def pack_params(p, H, W, mm_dtype=jnp.bfloat16):
    """Fold BNs into adjacent weights, build lane-aligned slabs + one bias slab.

    mm_dtype: dtype of matmul weight operands (bf16 on v6e/v7x; use jnp.float32
    on v5e if the per-dot activation casts measure as a regression).
    """
    Wf = W - 8
    str_dim = int(p["w1"][0].shape[0])
    eps = 1e-5
    meta = {}
    biases = _BiasPack()

    def fold(bn, w, b):  # eval-mode BN folded into the NEXT linear layer
        s = bn["gamma"] / jnp.sqrt(bn["var"] + eps)
        h = bn["beta"] - bn["mean"] * s
        return s.T * w, h @ w + b

    def fold_tiled(bn, width, w, b):  # per-channel BN tiled over width, lanes = (w, c)
        s = bn["gamma"] / jnp.sqrt(bn["var"] + eps)
        h = bn["beta"] - bn["mean"] * s
        st, ht = jnp.tile(s, (1, width)), jnp.tile(h, (1, width))
        return st.T * w, ht @ w + b

    slabs = {
        "w1": _Slab(str_dim), "s100": _Slab(100), "s125": _Slab(125),
        "s175": _Slab(175), "s50": _Slab(50),
        "t1": _Slab(W), "t2": _Slab((W - 2) * 10), "t3": _Slab((W - 4) * 20),
        "t4": _Slab((W - 6) * 25),
        "wa": _Slab(H * Wf * 50), "s20": _Slab(20), "s30": _Slab(30), "ff2": _Slab(25),
    }

    def reg(name, slab, w, b=None):
        off = slabs[slab].add(w)
        boff = biases.add(b) if b is not None else None
        meta[name] = dict(slab=slab, off=off, n=int(w.shape[1]),
                          k=int(w.shape[0]), boff=boff)

    # str branch (bn1 -> w3/w9, bn2 -> w5/w8, bn3 -> w7; w2/w4 are reused raw)
    reg("w1", "w1", *p["w1"])
    reg("w2", "s100", *p["w2"])
    reg("w3", "s100", *fold(p["bn1"], *p["w3"]))
    reg("w9", "s100", *fold(p["bn1"], *p["w9"]))
    reg("w4", "s125", *p["w4"])
    reg("w5", "s125", *fold(p["bn2"], *p["w5"]))
    reg("w8", "s125", *fold(p["bn2"], *p["w8"]))
    reg("w6", "s175", *p["w6"])
    reg("w7", "s175", *fold(p["bn3"], *p["w7"]))
    reg("w10", "s50", *p["w10"])
    reg("w11", "s50", *fold(p["bn4"], *p["w11"]))           # bn4 -> w11

    # conv branch: block-Toeplitz; bn2d20 -> conv3, bn2d25 -> conv4
    t1 = _conv1x3_to_matrix(p["c1"][0], W);     tb1 = jnp.tile(p["c1"][1], (1, W - 2))
    t2 = _conv1x3_to_matrix(p["c2"][0], W - 2); tb2 = jnp.tile(p["c2"][1], (1, W - 4))
    t3 = _conv1x3_to_matrix(p["c3"][0], W - 4); tb3 = jnp.tile(p["c3"][1], (1, W - 6))
    t4 = _conv1x3_to_matrix(p["c4"][0], W - 6); tb4 = jnp.tile(p["c4"][1], (1, Wf))
    reg("c1", "t1", t1, tb1)
    reg("c2", "t2", t2, tb2)
    reg("c3", "t3", *fold_tiled(p["bn2d20"], W - 4, t3, tb3))
    reg("c4", "t4", *fold_tiled(p["bn2d25"], W - 6, t4, tb4))

    # fcp1 rows: PyTorch NCHW flatten index c*H*Wf + h*Wf + w -> kernel (h, w, c).
    hh, ww, cc = jnp.meshgrid(jnp.arange(H), jnp.arange(Wf), jnp.arange(50),
                              indexing="ij")
    pt_rows = (cc * (H * Wf) + hh * Wf + ww).reshape(-1)
    reg("fcp1", "wa", p["fcp1"][0][pt_rows, :], p["fcp1"][1])
    reg("fcp2", "s20", *p["fcp2"])

    # ff head: split ff1 rows (str 0:50, pos 50:80); bn30 -> ff3, bn20 -> out
    reg("f1s", "s50", p["ff1"][0][:50, :], p["ff1"][1])
    reg("f1p", "s30", p["ff1"][0][50:, :])                  # bias already on f1s
    reg("ff2", "ff2", *p["ff2"])
    reg("ff3", "s30", *fold(p["bn30"], *p["ff3"]))
    reg("ff4", "s30", *p["ff4"])
    reg("out", "s20", *fold(p["bn20"], *p["out"]))

    order = ("w1", "s100", "s125", "s175", "s50",
             "t1", "t2", "t3", "t4", "wa", "s20", "s30", "ff2")
    arrays = tuple(slabs[k].build(mm_dtype) for k in order) + (biases.build(),)
    cfg = dict(meta=meta, slab_order=order, H=H, W=W, Wf=Wf, str_dim=str_dim)
    return arrays, cfg


if __name__ == "__main__":
    B, STR_DIM, H, W = 32, 32, 8, 16          # (1,3) valid conv x4 -> Wf = W - 8 = 8
    key = jax.random.PRNGKey(0)
    kp, ks, kpos = jax.random.split(key, 3)
    params = init_params(kp, STR_DIM, H, W)
    packed, cfg = pack_params(params, H, W)   # one-time BN folding + slab packing

    str_values = jax.random.normal(ks, (B, STR_DIM), jnp.float32)
    pos_values = jax.random.normal(kpos, (B, H, W), jnp.float32)

    # 16-row blocks -> grid=(2,): demonstrates the pipelined / parallel row axis.
    fwd = jax.jit(lambda a, s, p: dizco_cnn_forward(a, s, p, cfg, block_rows=16))
    prob = jax.block_until_ready(fwd(packed, str_values, pos_values))
    assert prob.shape == (B, 1), prob.shape
    assert bool(jnp.all(jnp.isfinite(prob)))
    assert bool(jnp.all((prob >= 0.0) & (prob <= 1.0)))
    print("KERNEL_OK")
</pallas_src>

<mosaic_0001>
module attributes {stable_mosaic.version = 11 : i64} {
  func.func @kernel(%arg0: i32, %arg1: memref<16x32xf32, #tpu.memory_space<vmem>>, %arg2: memref<128x16xf32, #tpu.memory_space<vmem>>, %arg3: memref<32x128xbf16, #tpu.memory_space<vmem>>, %arg4: memref<100x384xbf16, #tpu.memory_space<vmem>>, %arg5: memref<125x512xbf16, #tpu.memory_space<vmem>>, %arg6: memref<175x384xbf16, #tpu.memory_space<vmem>>, %arg7: memref<50x384xbf16, #tpu.memory_space<vmem>>, %arg8: memref<16x256xbf16, #tpu.memory_space<vmem>>, %arg9: memref<140x256xbf16, #tpu.memory_space<vmem>>, %arg10: memref<240x256xbf16, #tpu.memory_space<vmem>>, %arg11: memref<250x512xbf16, #tpu.memory_space<vmem>>, %arg12: memref<3200x128xbf16, #tpu.memory_space<vmem>>, %arg13: memref<20x256xbf16, #tpu.memory_space<vmem>>, %arg14: memref<30x384xbf16, #tpu.memory_space<vmem>>, %arg15: memref<25x128xbf16, #tpu.memory_space<vmem>>, %arg16: memref<1x3840xf32, #tpu.memory_space<vmem>>, %arg17: memref<16x1xf32, #tpu.memory_space<vmem>>) attributes {dimension_semantics = [#tpu.dimension_semantics<parallel>], iteration_bounds = array<i64: 2>, scalar_prefetch = 0 : i64, scratch_operands = 0 : i64, tpu.core_type = #tpu.core_type<tc>, window_params = [{transform_indices = @transform_0, window_bounds = array<i64: 16, 32>}, {transform_indices = @transform_1, window_bounds = array<i64: 128, 16>}, {pipeline_mode = #tpu.pipeline_mode<synchronous>, transform_indices = @transform_2, window_bounds = array<i64: 32, 128>}, {pipeline_mode = #tpu.pipeline_mode<synchronous>, transform_indices = @transform_3, window_bounds = array<i64: 100, 384>}, {pipeline_mode = #tpu.pipeline_mode<synchronous>, transform_indices = @transform_4, window_bounds = array<i64: 125, 512>}, {pipeline_mode = #tpu.pipeline_mode<synchronous>, transform_indices = @transform_5, window_bounds = array<i64: 175, 384>}, {pipeline_mode = #tpu.pipeline_mode<synchronous>, transform_indices = @transform_6, window_bounds = array<i64: 50, 384>}, {pipeline_mode = #tpu.pipeline_mode<synchronous>, transform_indices = @transform_7, window_bounds = array<i64: 16, 256>}, {pipeline_mode = #tpu.pipeline_mode<synchronous>, transform_indices = @transform_8, window_bounds = array<i64: 140, 256>}, {pipeline_mode = #tpu.pipeline_mode<synchronous>, transform_indices = @transform_9, window_bounds = array<i64: 240, 256>}, {pipeline_mode = #tpu.pipeline_mode<synchronous>, transform_indices = @transform_10, window_bounds = array<i64: 250, 512>}, {pipeline_mode = #tpu.pipeline_mode<synchronous>, transform_indices = @transform_11, window_bounds = array<i64: 3200, 128>}, {pipeline_mode = #tpu.pipeline_mode<synchronous>, transform_indices = @transform_12, window_bounds = array<i64: 20, 256>}, {pipeline_mode = #tpu.pipeline_mode<synchronous>, transform_indices = @transform_13, window_bounds = array<i64: 30, 384>}, {pipeline_mode = #tpu.pipeline_mode<synchronous>, transform_indices = @transform_14, window_bounds = array<i64: 25, 128>}, {pipeline_mode = #tpu.pipeline_mode<synchronous>, transform_indices = @transform_15, window_bounds = array<i64: 1, 3840>}, {transform_indices = @transform_16, window_bounds = array<i64: 16, 1>}]} {
    %c0 = arith.constant 0 : index
    %c0_0 = arith.constant 0 : index
    %0 = vector.load %arg1[%c0, %c0_0] : memref<16x32xf32, #tpu.memory_space<vmem>>, vector<16x32xf32>
    %c0_1 = arith.constant 0 : index
    %c0_2 = arith.constant 0 : index
    %1 = vector.load %arg3[%c0_1, %c0_2] : memref<32x128xbf16, #tpu.memory_space<vmem>>, vector<32x100xbf16>
    %2 = arith.truncf %0 : vector<16x32xf32> to vector<16x32xbf16>
    %cst = arith.constant dense<0.000000e+00> : vector<16x100xf32>
    %3 = tpu.matmul %2, %1, %cst {dimension_numbers = #tpu.dot_dimension_numbers<[1], [0], [0], [1], [0, 0, 1, 1], [], []>} : vector<16x32xbf16>, vector<32x100xbf16>, vector<16x100xf32> -> vector<16x100xf32>
    %c0_3 = arith.constant 0 : index
    %c0_4 = arith.constant 0 : index
    %4 = vector.load %arg16[%c0_3, %c0_4] : memref<1x3840xf32, #tpu.memory_space<vmem>>, vector<1x100xf32>
    %5 = vector.broadcast %4 : vector<1x100xf32> to vector<16x100xf32>
    %6 = arith.addf %3, %5 : vector<16x100xf32>
    %cst_5 = arith.constant 0.000000e+00 : f32
    %7 = vector.broadcast %cst_5 : f32 to vector<16x100xf32>
    %8 = arith.maximumf %6, %7 : vector<16x100xf32>
    %c0_6 = arith.constant 0 : index
    %c0_7 = arith.constant 0 : index
    %9 = vector.load %arg4[%c0_6, %c0_7] : memref<100x384xbf16, #tpu.memory_space<vmem>>, vector<100x100xbf16>
    %10 = arith.truncf %8 : vector<16x100xf32> to vector<16x100xbf16>
    %cst_8 = arith.constant dense<0.000000e+00> : vector<16x100xf32>
    %11 = tpu.matmul %10, %9, %cst_8 {dimension_numbers = #tpu.dot_dimension_numbers<[1], [0], [0], [1], [0, 0, 1, 1], [], []>} : vector<16x100xbf16>, vector<100x100xbf16>, vector<16x100xf32> -> vector<16x100xf32>
    %c0_9 = arith.constant 0 : index
    %c128 = arith.constant 128 : index
    %12 = vector.load %arg16[%c0_9, %c128] : memref<1x3840xf32, #tpu.memory_space<vmem>>, vector<1x100xf32>
    %13 = vector.broadcast %12 : vector<1x100xf32> to vector<16x100xf32>
    %14 = arith.addf %11, %13 : vector<16x100xf32>
    %cst_10 = arith.constant 0.000000e+00 : f32
    %15 = vector.broadcast %cst_10 : f32 to vector<16x100xf32>
    %16 = arith.maximumf %14, %15 : vector<16x100xf32>
    %17 = arith.addf %8, %16 : vector<16x100xf32>
    %c0_11 = arith.constant 0 : index
    %c128_12 = arith.constant 128 : index
    %18 = vector.load %arg4[%c0_11, %c128_12] : memref<100x384xbf16, #tpu.memory_space<vmem>>, vector<100x125xbf16>
    %19 = arith.truncf %17 : vector<16x100xf32> to vector<16x100xbf16>
    %cst_13 = arith.constant dense<0.000000e+00> : vector<16x125xf32>
    %20 = tpu.matmul %19, %18, %cst_13 {dimension_numbers = #tpu.dot_dimension_numbers<[1], [0], [0], [1], [0, 0, 1, 1], [], []>} : vector<16x100xbf16>, vector<100x125xbf16>, vector<16x125xf32> -> vector<16x125xf32>
    %c0_14 = arith.constant 0 : index
    %c256 = arith.constant 256 : index
    %21 = vector.load %arg16[%c0_14, %c256] : memref<1x3840xf32, #tpu.memory_space<vmem>>, vector<1x125xf32>
    %22 = vector.broadcast %21 : vector<1x125xf32> to vector<16x125xf32>
    %23 = arith.addf %20, %22 : vector<16x125xf32>
    %cst_15 = arith.constant 0.000000e+00 : f32
    %24 = vector.broadcast %cst_15 : f32 to vector<16x125xf32>
    %25 = arith.maximumf %23, %24 : vector<16x125xf32>
    %c0_16 = arith.constant 0 : index
    %c0_17 = arith.constant 0 : index
    %26 = vector.load %arg5[%c0_16, %c0_17] : memref<125x512xbf16, #tpu.memory_space<vmem>>, vector<125x125xbf16>
    %27 = arith.truncf %25 : vector<16x125xf32> to vector<16x125xbf16>
    %cst_18 = arith.constant dense<0.000000e+00> : vector<16x125xf32>
    %28 = tpu.matmul %27, %26, %cst_18 {dimension_numbers = #tpu.dot_dimension_numbers<[1], [0], [0], [1], [0, 0, 1, 1], [], []>} : vector<16x125xbf16>, vector<125x125xbf16>, vector<16x125xf32> -> vector<16x125xf32>
    %c0_19 = arith.constant 0 : index
    %c512 = arith.constant 512 : index
    %29 = vector.load %arg16[%c0_19, %c512] : memref<1x3840xf32, #tpu.memory_space<vmem>>, vector<1x125xf32>
    %30 = vector.broadcast %29 : vector<1x125xf32> to vector<16x125xf32>
    %31 = arith.addf %28, %30 : vector<16x125xf32>
    %cst_20 = arith.constant 0.000000e+00 : f32
    %32 = vector.broadcast %cst_20 : f32 to vector<16x125xf32>
    %33 = arith.maximumf %31, %32 : vector<16x125xf32>
    %34 = arith.addf %25, %33 : vector<16x125xf32>
    %c0_21 = arith.constant 0 : index
    %c128_22 = arith.constant 128 : index
    %35 = vector.load %arg5[%c0_21, %c128_22] : memref<125x512xbf16, #tpu.memory_space<vmem>>, vector<125x175xbf16>
    %36 = arith.truncf %34 : vector<16x125xf32> to vector<16x125xbf16>
    %cst_23 = arith.constant dense<0.000000e+00> : vector<16x175xf32>
    %37 = tpu.matmul %36, %35, %cst_23 {dimension_numbers = #tpu.dot_dimension_numbers<[1], [0], [0], [1], [0, 0, 1, 1], [], []>} : vector<16x125xbf16>, vector<125x175xbf16>, vector<16x175xf32> -> vector<16x175xf32>
    %c0_24 = arith.constant 0 : index
    %c640 = arith.constant 640 : index
    %38 = vector.load %arg16[%c0_24, %c640] : memref<1x3840xf32, #tpu.memory_space<vmem>>, vector<1x175xf32>
    %39 = vector.broadcast %38 : vector<1x175xf32> to vector<16x175xf32>
    %40 = arith.addf %37, %39 : vector<16x175xf32>
    %cst_25 = arith.constant 0.000000e+00 : f32
    %41 = vector.broadcast %cst_25 : f32 to vector<16x175xf32>
    %42 = arith.maximumf %40, %41 : vector<16x175xf32>
    %c0_26 = arith.constant 0 : index
    %c0_27 = arith.constant 0 : index
    %43 = vector.load %arg6[%c0_26, %c0_27] : memref<175x384xbf16, #tpu.memory_space<vmem>>, vector<175x175xbf16>
    %44 = arith.truncf %42 : vector<16x175xf32> to vector<16x175xbf16>
    %cst_28 = arith.constant dense<0.000000e+00> : vector<16x175xf32>
    %45 = tpu.matmul %44, %43, %cst_28 {dimension_numbers = #tpu.dot_dimension_numbers<[1], [0], [0], [1], [0, 0, 1, 1], [], []>} : vector<16x175xbf16>, vector<175x175xbf16>, vector<16x175xf32> -> vector<16x175xf32>
    %c0_29 = arith.constant 0 : index
    %c1024 = arith.constant 1024 : index
    %46 = vector.load %arg16[%c0_29, %c1024] : memref<1x3840xf32, #tpu.memory_space<vmem>>, vector<1x175xf32>
    %47 = vector.broadcast %46 : vector<1x175xf32> to vector<16x175xf32>
    %48 = arith.addf %45, %47 : vector<16x175xf32>
    %cst_30 = arith.constant 0.000000e+00 : f32
    %49 = vector.broadcast %cst_30 : f32 to vector<16x175xf32>
    %50 = arith.maximumf %48, %49 : vector<16x175xf32>
    %51 = arith.addf %42, %50 : vector<16x175xf32>
    %c0_31 = arith.constant 0 : index
    %c256_32 = arith.constant 256 : index
    %52 = vector.load %arg6[%c0_31, %c256_32] : memref<175x384xbf16, #tpu.memory_space<vmem>>, vector<175x125xbf16>
    %53 = arith.truncf %51 : vector<16x175xf32> to vector<16x175xbf16>
    %cst_33 = arith.constant dense<0.000000e+00> : vector<16x125xf32>
    %54 = tpu.matmul %53, %52, %cst_33 {dimension_numbers = #tpu.dot_dimension_numbers<[1], [0], [0], [1], [0, 0, 1, 1], [], []>} : vector<16x175xbf16>, vector<175x125xbf16>, vector<16x125xf32> -> vector<16x125xf32>
    %c0_34 = arith.constant 0 : index
    %c1280 = arith.constant 1280 : index
    %55 = vector.load %arg16[%c0_34, %c1280] : memref<1x3840xf32, #tpu.memory_space<vmem>>, vector<1x125xf32>
    %56 = vector.broadcast %55 : vector<1x125xf32> to vector<16x125xf32>
    %57 = arith.addf %54, %56 : vector<16x125xf32>
    %cst_35 = arith.constant 0.000000e+00 : f32
    %58 = vector.broadcast %cst_35 : f32 to vector<16x125xf32>
    %59 = arith.maximumf %57, %58 : vector<16x125xf32>
    %c0_36 = arith.constant 0 : index
    %c0_37 = arith.constant 0 : index
    %60 = vector.load %arg5[%c0_36, %c0_37] : memref<125x512xbf16, #tpu.memory_space<vmem>>, vector<125x125xbf16>
    %61 = arith.truncf %59 : vector<16x125xf32> to vector<16x125xbf16>
    %cst_38 = arith.constant dense<0.000000e+00> : vector<16x125xf32>
    %62 = tpu.matmul %61, %60, %cst_38 {dimension_numbers = #tpu.dot_dimension_numbers<[1], [0], [0], [1], [0, 0, 1, 1], [], []>} : vector<16x125xbf16>, vector<125x125xbf16>, vector<16x125xf32> -> vector<16x125xf32>
    %c0_39 = arith.constant 0 : index
    %c512_40 = arith.constant 512 : index
    %63 = vector.load %arg16[%c0_39, %c512_40] : memref<1x3840xf32, #tpu.memory_space<vmem>>, vector<1x125xf32>
    %64 = vector.broadcast %63 : vector<1x125xf32> to vector<16x125xf32>
    %65 = arith.addf %62, %64 : vector<16x125xf32>
    %cst_41 = arith.constant 0.000000e+00 : f32
    %66 = vector.broadcast %cst_41 : f32 to vector<16x125xf32>
    %67 = arith.maximumf %65, %66 : vector<16x125xf32>
    %68 = arith.addf %59, %67 : vector<16x125xf32>
    %c0_42 = arith.constant 0 : index
    %c384 = arith.constant 384 : index
    %69 = vector.load %arg5[%c0_42, %c384] : memref<125x512xbf16, #tpu.memory_space<vmem>>, vector<125x100xbf16>
    %70 = arith.truncf %68 : vector<16x125xf32> to vector<16x125xbf16>
    %cst_43 = arith.constant dense<0.000000e+00> : vector<16x100xf32>
    %71 = tpu.matmul %70, %69, %cst_43 {dimension_numbers = #tpu.dot_dimension_numbers<[1], [0], [0], [1], [0, 0, 1, 1], [], []>} : vector<16x125xbf16>, vector<125x100xbf16>, vector<16x100xf32> -> vector<16x100xf32>
    %c0_44 = arith.constant 0 : index
    %c896 = arith.constant 896 : index
    %72 = vector.load %arg16[%c0_44, %c896] : memref<1x3840xf32, #tpu.memory_space<vmem>>, vector<1x100xf32>
    %73 = vector.broadcast %72 : vector<1x100xf32> to vector<16x100xf32>
    %74 = arith.addf %71, %73 : vector<16x100xf32>
    %cst_45 = arith.constant 0.000000e+00 : f32
    %75 = vector.broadcast %cst_45 : f32 to vector<16x100xf32>
    %76 = arith.maximumf %74, %75 : vector<16x100xf32>
    %77 = arith.addf %17, %76 : vector<16x100xf32>
    %c0_46 = arith.constant 0 : index
    %c0_47 = arith.constant 0 : index
    %78 = vector.load %arg4[%c0_46, %c0_47] : memref<100x384xbf16, #tpu.memory_space<vmem>>, vector<100x100xbf16>
    %79 = arith.truncf %77 : vector<16x100xf32> to vector<16x100xbf16>
    %cst_48 = arith.constant dense<0.000000e+00> : vector<16x100xf32>
    %80 = tpu.matmul %79, %78, %cst_48 {dimension_numbers = #tpu.dot_dimension_numbers<[1], [0], [0], [1], [0, 0, 1, 1], [], []>} : vector<16x100xbf16>, vector<100x100xbf16>, vector<16x100xf32> -> vector<16x100xf32>
    %c0_49 = arith.constant 0 : index
    %c128_50 = arith.constant 128 : index
    %81 = vector.load %arg16[%c0_49, %c128_50] : memref<1x3840xf32, #tpu.memory_space<vmem>>, vector<1x100xf32>
    %82 = vector.broadcast %81 : vector<1x100xf32> to vector<16x100xf32>
    %83 = arith.addf %80, %82 : vector<16x100xf32>
    %cst_51 = arith.constant 0.000000e+00 : f32
    %84 = vector.broadcast %cst_51 : f32 to vector<16x100xf32>
    %85 = arith.maximumf %83, %84 : vector<16x100xf32>
    %86 = arith.addf %77, %85 : vector<16x100xf32>
    %c0_52 = arith.constant 0 : index
    %c256_53 = arith.constant 256 : index
    %87 = vector.load %arg4[%c0_52, %c256_53] : memref<100x384xbf16, #tpu.memory_space<vmem>>, vector<100x50xbf16>
    %88 = arith.truncf %86 : vector<16x100xf32> to vector<16x100xbf16>
    %cst_54 = arith.constant dense<0.000000e+00> : vector<16x50xf32>
    %89 = tpu.matmul %88, %87, %cst_54 {dimension_numbers = #tpu.dot_dimension_numbers<[1], [0], [0], [1], [0, 0, 1, 1], [], []>} : vector<16x100xbf16>, vector<100x50xbf16>, vector<16x50xf32> -> vector<16x50xf32>
    %c0_55 = arith.constant 0 : index
    %c384_56 = arith.constant 384 : index
    %90 = vector.load %arg16[%c0_55, %c384_56] : memref<1x3840xf32, #tpu.memory_space<vmem>>, vector<1x50xf32>
    %91 = vector.broadcast %90 : vector<1x50xf32> to vector<16x50xf32>
    %92 = arith.addf %89, %91 : vector<16x50xf32>
    %cst_57 = arith.constant 0.000000e+00 : f32
    %93 = vector.broadcast %cst_57 : f32 to vector<16x50xf32>
    %94 = arith.maximumf %92, %93 : vector<16x50xf32>
    %c0_58 = arith.constant 0 : index
    %c0_59 = arith.constant 0 : index
    %95 = vector.load %arg7[%c0_58, %c0_59] : memref<50x384xbf16, #tpu.memory_space<vmem>>, vector<50x50xbf16>
    %96 = arith.truncf %94 : vector<16x50xf32> to vector<16x50xbf16>
    %cst_60 = arith.constant dense<0.000000e+00> : vector<16x50xf32>
    %97 = tpu.matmul %96, %95, %cst_60 {dimension_numbers = #tpu.dot_dimension_numbers<[1], [0], [0], [1], [0, 0, 1, 1], [], []>} : vector<16x50xbf16>, vector<50x50xbf16>, vector<16x50xf32> -> vector<16x50xf32>
    %c0_61 = arith.constant 0 : index
    %c1408 = arith.constant 1408 : index
    %98 = vector.load %arg16[%c0_61, %c1408] : memref<1x3840xf32, #tpu.memory_space<vmem>>, vector<1x50xf32>
    %99 = vector.broadcast %98 : vector<1x50xf32> to vector<16x50xf32>
    %100 = arith.addf %97, %99 : vector<16x50xf32>
    %cst_62 = arith.constant 0.000000e+00 : f32
    %101 = vector.broadcast %cst_62 : f32 to vector<16x50xf32>
    %102 = arith.maximumf %100, %101 : vector<16x50xf32>
    %103 = arith.addf %94, %102 : vector<16x50xf32>
    %c0_63 = arith.constant 0 : index
    %c0_64 = arith.constant 0 : index
    %104 = vector.load %arg2[%c0_63, %c0_64] : memref<128x16xf32, #tpu.memory_space<vmem>>, vector<128x16xf32>
    %c0_65 = arith.constant 0 : index
    %c0_66 = arith.constant 0 : index
    %105 = vector.load %arg8[%c0_65, %c0_66] : memref<16x256xbf16, #tpu.memory_space<vmem>>, vector<16x140xbf16>
    %106 = arith.truncf %104 : vector<128x16xf32> to vector<128x16xbf16>
    %cst_67 = arith.constant dense<0.000000e+00> : vector<128x140xf32>
    %107 = tpu.matmul %106, %105, %cst_67 {dimension_numbers = #tpu.dot_dimension_numbers<[1], [0], [0], [1], [0, 0, 1, 1], [], []>} : vector<128x16xbf16>, vector<16x140xbf16>, vector<128x140xf32> -> vector<128x140xf32>
    %c0_68 = arith.constant 0 : index
    %c1664 = arith.constant 1664 : index
    %108 = vector.load %arg16[%c0_68, %c1664] : memref<1x3840xf32, #tpu.memory_space<vmem>>, vector<1x140xf32>
    %109 = vector.broadcast %108 : vector<1x140xf32> to vector<128x140xf32>
    %110 = arith.addf %107, %109 : vector<128x140xf32>
    %cst_69 = arith.constant 0.000000e+00 : f32
    %111 = vector.broadcast %cst_69 : f32 to vector<128x140xf32>
    %112 = arith.maximumf %110, %111 : vector<128x140xf32>
    %c0_70 = arith.constant 0 : index
    %c0_71 = arith.constant 0 : index
    %113 = vector.load %arg9[%c0_70, %c0_71] : memref<140x256xbf16, #tpu.memory_space<vmem>>, vector<140x240xbf16>
    %114 = arith.truncf %112 : vector<128x140xf32> to vector<128x140xbf16>
    %cst_72 = arith.constant dense<0.000000e+00> : vector<128x240xf32>
    %115 = tpu.matmul %114, %113, %cst_72 {dimension_numbers = #tpu.dot_dimension_numbers<[1], [0], [0], [1], [0, 0, 1, 1], [], []>} : vector<128x140xbf16>, vector<140x240xbf16>, vector<128x240xf32> -> vector<128x240xf32>
    %c0_73 = arith.constant 0 : index
    %c1920 = arith.constant 1920 : index
    %116 = vector.load %arg16[%c0_73, %c1920] : memref<1x3840xf32, #tpu.memory_space<vmem>>, vector<1x240xf32>
    %117 = vector.broadcast %116 : vector<1x240xf32> to vector<128x240xf32>
    %118 = arith.addf %115, %117 : vector<128x240xf32>
    %cst_74 = arith.constant 0.000000e+00 : f32
    %119 = vector.broadcast %cst_74 : f32 to vector<128x240xf32>
    %120 = arith.maximumf %118, %119 : vector<128x240xf32>
    %c0_75 = arith.constant 0 : index
    %c0_76 = arith.constant 0 : index
    %121 = vector.load %arg10[%c0_75, %c0_76] : memref<240x256xbf16, #tpu.memory_space<vmem>>, vector<240x250xbf16>
    %122 = arith.truncf %120 : vector<128x240xf32> to vector<128x240xbf16>
    %cst_77 = arith.constant dense<0.000000e+00> : vector<128x250xf32>
    %123 = tpu.matmul %122, %121, %cst_77 {dimension_numbers = #tpu.dot_dimension_numbers<[1], [0], [0], [1], [0, 0, 1, 1], [], []>} : vector<128x240xbf16>, vector<240x250xbf16>, vector<128x250xf32> -> vector<128x250xf32>
    %c0_78 = arith.constant 0 : index
    %c2176 = arith.constant 2176 : index
    %124 = vector.load %arg16[%c0_78, %c2176] : memref<1x3840xf32, #tpu.memory_space<vmem>>, vector<1x250xf32>
    %125 = vector.broadcast %124 : vector<1x250xf32> to vector<128x250xf32>
    %126 = arith.addf %123, %125 : vector<128x250xf32>
    %cst_79 = arith.constant 0.000000e+00 : f32
    %127 = vector.broadcast %cst_79 : f32 to vector<128x250xf32>
    %128 = arith.maximumf %126, %127 : vector<128x250xf32>
    %c0_80 = arith.constant 0 : index
    %c0_81 = arith.constant 0 : index
    %129 = vector.load %arg11[%c0_80, %c0_81] : memref<250x512xbf16, #tpu.memory_space<vmem>>, vector<250x400xbf16>
    %130 = arith.truncf %128 : vector<128x250xf32> to vector<128x250xbf16>
    %cst_82 = arith.constant dense<0.000000e+00> : vector<128x400xf32>
    %131 = tpu.matmul %130, %129, %cst_82 {dimension_numbers = #tpu.dot_dimension_numbers<[1], [0], [0], [1], [0, 0, 1, 1], [], []>} : vector<128x250xbf16>, vector<250x400xbf16>, vector<128x400xf32> -> vector<128x400xf32>
    %c0_83 = arith.constant 0 : index
    %c2432 = arith.constant 2432 : index
    %132 = vector.load %arg16[%c0_83, %c2432] : memref<1x3840xf32, #tpu.memory_space<vmem>>, vector<1x400xf32>
    %133 = vector.broadcast %132 : vector<1x400xf32> to vector<128x400xf32>
    %134 = arith.addf %131, %133 : vector<128x400xf32>
    %cst_84 = arith.constant 0.000000e+00 : f32
    %135 = vector.broadcast %cst_84 : f32 to vector<128x400xf32>
    %136 = arith.maximumf %134, %135 : vector<128x400xf32>
    %cst_85 = arith.constant 0.000000e+00 : f32
    %137 = vector.broadcast %cst_85 : f32 to vector<16x20xf32>
    %138 = vector.extract_strided_slice %136 {offsets = [0, 0], sizes = [16, 400], strides = [1, 1]} : vector<128x400xf32> to vector<16x400xf32>
    %139 = arith.truncf %138 : vector<16x400xf32> to vector<16x400xbf16>
    %c0_86 = arith.constant 0 : index
    %c0_87 = arith.constant 0 : index
    %140 = vector.load %arg12[%c0_86, %c0_87] : memref<3200x128xbf16, #tpu.memory_space<vmem>>, vector<400x20xbf16>
    %cst_88 = arith.constant dense<0.000000e+00> : vector<16x20xf32>
    %141 = tpu.matmul %139, %140, %cst_88 {dimension_numbers = #tpu.dot_dimension_numbers<[1], [0], [0], [1], [0, 0, 1, 1], [], []>} : vector<16x400xbf16>, vector<400x20xbf16>, vector<16x20xf32> -> vector<16x20xf32>
    %142 = arith.addf %137, %141 : vector<16x20xf32>
    %143 = vector.extract_strided_slice %136 {offsets = [16, 0], sizes = [16, 400], strides = [1, 1]} : vector<128x400xf32> to vector<16x400xf32>
    %144 = arith.truncf %143 : vector<16x400xf32> to vector<16x400xbf16>
    %c400 = arith.constant 400 : index
    %c0_89 = arith.constant 0 : index
    %145 = vector.load %arg12[%c400, %c0_89] : memref<3200x128xbf16, #tpu.memory_space<vmem>>, vector<400x20xbf16>
    %cst_90 = arith.constant dense<0.000000e+00> : vector<16x20xf32>
    %146 = tpu.matmul %144, %145, %cst_90 {dimension_numbers = #tpu.dot_dimension_numbers<[1], [0], [0], [1], [0, 0, 1, 1], [], []>} : vector<16x400xbf16>, vector<400x20xbf16>, vector<16x20xf32> -> vector<16x20xf32>
    %147 = arith.addf %142, %146 : vector<16x20xf32>
    %148 = vector.extract_strided_slice %136 {offsets = [32, 0], sizes = [16, 400], strides = [1, 1]} : vector<128x400xf32> to vector<16x400xf32>
    %149 = arith.truncf %148 : vector<16x400xf32> to vector<16x400xbf16>
    %c800 = arith.constant 800 : index
    %c0_91 = arith.constant 0 : index
    %150 = vector.load %arg12[%c800, %c0_91] : memref<3200x128xbf16, #tpu.memory_space<vmem>>, vector<400x20xbf16>
    %cst_92 = arith.constant dense<0.000000e+00> : vector<16x20xf32>
    %151 = tpu.matmul %149, %150, %cst_92 {dimension_numbers = #tpu.dot_dimension_numbers<[1], [0], [0], [1], [0, 0, 1, 1], [], []>} : vector<16x400xbf16>, vector<400x20xbf16>, vector<16x20xf32> -> vector<16x20xf32>
    %152 = arith.addf %147, %151 : vector<16x20xf32>
    %153 = vector.extract_strided_slice %136 {offsets = [48, 0], sizes = [16, 400], strides = [1, 1]} : vector<128x400xf32> to vector<16x400xf32>
    %154 = arith.truncf %153 : vector<16x400xf32> to vector<16x400xbf16>
    %c1200 = arith.constant 1200 : index
    %c0_93 = arith.constant 0 : index
    %155 = vector.load %arg12[%c1200, %c0_93] : memref<3200x128xbf16, #tpu.memory_space<vmem>>, vector<400x20xbf16>
    %cst_94 = arith.constant dense<0.000000e+00> : vector<16x20xf32>
    %156 = tpu.matmul %154, %155, %cst_94 {dimension_numbers = #tpu.dot_dimension_numbers<[1], [0], [0], [1], [0, 0, 1, 1], [], []>} : vector<16x400xbf16>, vector<400x20xbf16>, vector<16x20xf32> -> vector<16x20xf32>
    %157 = arith.addf %152, %156 : vector<16x20xf32>
    %158 = vector.extract_strided_slice %136 {offsets = [64, 0], sizes = [16, 400], strides = [1, 1]} : vector<128x400xf32> to vector<16x400xf32>
    %159 = arith.truncf %158 : vector<16x400xf32> to vector<16x400xbf16>
    %c1600 = arith.constant 1600 : index
    %c0_95 = arith.constant 0 : index
    %160 = vector.load %arg12[%c1600, %c0_95] : memref<3200x128xbf16, #tpu.memory_space<vmem>>, vector<400x20xbf16>
    %cst_96 = arith.constant dense<0.000000e+00> : vector<16x20xf32>
    %161 = tpu.matmul %159, %160, %cst_96 {dimension_numbers = #tpu.dot_dimension_numbers<[1], [0], [0], [1], [0, 0, 1, 1], [], []>} : vector<16x400xbf16>, vector<400x20xbf16>, vector<16x20xf32> -> vector<16x20xf32>
    %162 = arith.addf %157, %161 : vector<16x20xf32>
    %163 = vector.extract_strided_slice %136 {offsets = [80, 0], sizes = [16, 400], strides = [1, 1]} : vector<128x400xf32> to vector<16x400xf32>
    %164 = arith.truncf %163 : vector<16x400xf32> to vector<16x400xbf16>
    %c2000 = arith.constant 2000 : index
    %c0_97 = arith.constant 0 : index
    %165 = vector.load %arg12[%c2000, %c0_97] : memref<3200x128xbf16, #tpu.memory_space<vmem>>, vector<400x20xbf16>
    %cst_98 = arith.constant dense<0.000000e+00> : vector<16x20xf32>
    %166 = tpu.matmul %164, %165, %cst_98 {dimension_numbers = #tpu.dot_dimension_numbers<[1], [0], [0], [1], [0, 0, 1, 1], [], []>} : vector<16x400xbf16>, vector<400x20xbf16>, vector<16x20xf32> -> vector<16x20xf32>
    %167 = arith.addf %162, %166 : vector<16x20xf32>
    %168 = vector.extract_strided_slice %136 {offsets = [96, 0], sizes = [16, 400], strides = [1, 1]} : vector<128x400xf32> to vector<16x400xf32>
    %169 = arith.truncf %168 : vector<16x400xf32> to vector<16x400xbf16>
    %c2400 = arith.constant 2400 : index
    %c0_99 = arith.constant 0 : index
    %170 = vector.load %arg12[%c2400, %c0_99] : memref<3200x128xbf16, #tpu.memory_space<vmem>>, vector<400x20xbf16>
    %cst_100 = arith.constant dense<0.000000e+00> : vector<16x20xf32>
    %171 = tpu.matmul %169, %170, %cst_100 {dimension_numbers = #tpu.dot_dimension_numbers<[1], [0], [0], [1], [0, 0, 1, 1], [], []>} : vector<16x400xbf16>, vector<400x20xbf16>, vector<16x20xf32> -> vector<16x20xf32>
    %172 = arith.addf %167, %171 : vector<16x20xf32>
    %173 = vector.extract_strided_slice %136 {offsets = [112, 0], sizes = [16, 400], strides = [1, 1]} : vector<128x400xf32> to vector<16x400xf32>
    %174 = arith.truncf %173 : vector<16x400xf32> to vector<16x400xbf16>
    %c2800 = arith.constant 2800 : index
    %c0_101 = arith.constant 0 : index
    %175 = vector.load %arg12[%c2800, %c0_101] : memref<3200x128xbf16, #tpu.memory_space<vmem>>, vector<400x20xbf16>
    %cst_102 = arith.constant dense<0.000000e+00> : vector<16x20xf32>
    %176 = tpu.matmul %174, %175, %cst_102 {dimension_numbers = #tpu.dot_dimension_numbers<[1], [0], [0], [1], [0, 0, 1, 1], [], []>} : vector<16x400xbf16>, vector<400x20xbf16>, vector<16x20xf32> -> vector<16x20xf32>
    %177 = arith.addf %172, %176 : vector<16x20xf32>
    %c0_103 = arith.constant 0 : index
    %c2944 = arith.constant 2944 : index
    %178 = vector.load %arg16[%c0_103, %c2944] : memref<1x3840xf32, #tpu.memory_space<vmem>>, vector<1x20xf32>
    %179 = vector.broadcast %178 : vector<1x20xf32> to vector<16x20xf32>
    %180 = arith.addf %177, %179 : vector<16x20xf32>
    %cst_104 = arith.constant 0.000000e+00 : f32
    %181 = vector.broadcast %cst_104 : f32 to vector<16x20xf32>
    %182 = arith.maximumf %180, %181 : vector<16x20xf32>
    %c0_105 = arith.constant 0 : index
    %c0_106 = arith.constant 0 : index
    %183 = vector.load %arg13[%c0_105, %c0_106] : memref<20x256xbf16, #tpu.memory_space<vmem>>, vector<20x50xbf16>
    %184 = arith.truncf %182 : vector<16x20xf32> to vector<16x20xbf16>
    %cst_107 = arith.constant dense<0.000000e+00> : vector<16x50xf32>
    %185 = tpu.matmul %184, %183, %cst_107 {dimension_numbers = #tpu.dot_dimension_numbers<[1], [0], [0], [1], [0, 0, 1, 1], [], []>} : vector<16x20xbf16>, vector<20x50xbf16>, vector<16x50xf32> -> vector<16x50xf32>
    %c0_108 = arith.constant 0 : index
    %c3072 = arith.constant 3072 : index
    %186 = vector.load %arg16[%c0_108, %c3072] : memref<1x3840xf32, #tpu.memory_space<vmem>>, vector<1x50xf32>
    %187 = vector.broadcast %186 : vector<1x50xf32> to vector<16x50xf32>
    %188 = arith.addf %185, %187 : vector<16x50xf32>
    %cst_109 = arith.constant 0.000000e+00 : f32
    %189 = vector.broadcast %cst_109 : f32 to vector<16x50xf32>
    %190 = arith.maximumf %188, %189 : vector<16x50xf32>
    %c0_110 = arith.constant 0 : index
    %c128_111 = arith.constant 128 : index
    %191 = vector.load %arg7[%c0_110, %c128_111] : memref<50x384xbf16, #tpu.memory_space<vmem>>, vector<50x30xbf16>
    %192 = arith.truncf %190 : vector<16x50xf32> to vector<16x50xbf16>
    %cst_112 = arith.constant dense<0.000000e+00> : vector<16x30xf32>
    %193 = tpu.matmul %192, %191, %cst_112 {dimension_numbers = #tpu.dot_dimension_numbers<[1], [0], [0], [1], [0, 0, 1, 1], [], []>} : vector<16x50xbf16>, vector<50x30xbf16>, vector<16x30xf32> -> vector<16x30xf32>
    %c0_113 = arith.constant 0 : index
    %c1536 = arith.constant 1536 : index
    %194 = vector.load %arg16[%c0_113, %c1536] : memref<1x3840xf32, #tpu.memory_space<vmem>>, vector<1x30xf32>
    %195 = vector.broadcast %194 : vector<1x30xf32> to vector<16x30xf32>
    %196 = arith.addf %193, %195 : vector<16x30xf32>
    %cst_114 = arith.constant 0.000000e+00 : f32
    %197 = vector.broadcast %cst_114 : f32 to vector<16x30xf32>
    %198 = arith.maximumf %196, %197 : vector<16x30xf32>
    %c0_115 = arith.constant 0 : index
    %c256_116 = arith.constant 256 : index
    %199 = vector.load %arg7[%c0_115, %c256_116] : memref<50x384xbf16, #tpu.memory_space<vmem>>, vector<50x25xbf16>
    %c0_117 = arith.constant 0 : index
    %c0_118 = arith.constant 0 : index
    %200 = vector.load %arg14[%c0_117, %c0_118] : memref<30x384xbf16, #tpu.memory_space<vmem>>, vector<30x25xbf16>
    %201 = arith.truncf %103 : vector<16x50xf32> to vector<16x50xbf16>
    %cst_119 = arith.constant dense<0.000000e+00> : vector<16x25xf32>
    %202 = tpu.matmul %201, %199, %cst_119 {dimension_numbers = #tpu.dot_dimension_numbers<[1], [0], [0], [1], [0, 0, 1, 1], [], []>} : vector<16x50xbf16>, vector<50x25xbf16>, vector<16x25xf32> -> vector<16x25xf32>
    %203 = arith.truncf %198 : vector<16x30xf32> to vector<16x30xbf16>
    %cst_120 = arith.constant dense<0.000000e+00> : vector<16x25xf32>
    %204 = tpu.matmul %203, %200, %cst_120 {dimension_numbers = #tpu.dot_dimension_numbers<[1], [0], [0], [1], [0, 0, 1, 1], [], []>} : vector<16x30xbf16>, vector<30x25xbf16>, vector<16x25xf32> -> vector<16x25xf32>
    %205 = arith.addf %202, %204 : vector<16x25xf32>
    %c0_121 = arith.constant 0 : index
    %c3200 = arith.constant 3200 : index
    %206 = vector.load %arg16[%c0_121, %c3200] : memref<1x3840xf32, #tpu.memory_space<vmem>>, vector<1x25xf32>
    %207 = vector.broadcast %206 : vector<1x25xf32> to vector<16x25xf32>
    %208 = arith.addf %205, %207 : vector<16x25xf32>
    %cst_122 = arith.constant 0.000000e+00 : f32
    %209 = vector.broadcast %cst_122 : f32 to vector<16x25xf32>
    %210 = arith.maximumf %208, %209 : vector<16x25xf32>
    %c0_123 = arith.constant 0 : index
    %c0_124 = arith.constant 0 : index
    %211 = vector.load %arg15[%c0_123, %c0_124] : memref<25x128xbf16, #tpu.memory_space<vmem>>, vector<25x30xbf16>
    %212 = arith.truncf %210 : vector<16x25xf32> to vector<16x25xbf16>
    %cst_125 = arith.constant dense<0.000000e+00> : vector<16x30xf32>
    %213 = tpu.matmul %212, %211, %cst_125 {dimension_numbers = #tpu.dot_dimension_numbers<[1], [0], [0], [1], [0, 0, 1, 1], [], []>} : vector<16x25xbf16>, vector<25x30xbf16>, vector<16x30xf32> -> vector<16x30xf32>
    %c0_126 = arith.constant 0 : index
    %c3328 = arith.constant 3328 : index
    %214 = vector.load %arg16[%c0_126, %c3328] : memref<1x3840xf32, #tpu.memory_space<vmem>>, vector<1x30xf32>
    %215 = vector.broadcast %214 : vector<1x30xf32> to vector<16x30xf32>
    %216 = arith.addf %213, %215 : vector<16x30xf32>
    %cst_127 = arith.constant 0.000000e+00 : f32
    %217 = vector.broadcast %cst_127 : f32 to vector<16x30xf32>
    %218 = arith.maximumf %216, %217 : vector<16x30xf32>
    %c0_128 = arith.constant 0 : index
    %c128_129 = arith.constant 128 : index
    %219 = vector.load %arg14[%c0_128, %c128_129] : memref<30x384xbf16, #tpu.memory_space<vmem>>, vector<30x30xbf16>
    %220 = arith.truncf %218 : vector<16x30xf32> to vector<16x30xbf16>
    %cst_130 = arith.constant dense<0.000000e+00> : vector<16x30xf32>
    %221 = tpu.matmul %220, %219, %cst_130 {dimension_numbers = #tpu.dot_dimension_numbers<[1], [0], [0], [1], [0, 0, 1, 1], [], []>} : vector<16x30xbf16>, vector<30x30xbf16>, vector<16x30xf32> -> vector<16x30xf32>
    %c0_131 = arith.constant 0 : index
    %c3456 = arith.constant 3456 : index
    %222 = vector.load %arg16[%c0_131, %c3456] : memref<1x3840xf32, #tpu.memory_space<vmem>>, vector<1x30xf32>
    %223 = vector.broadcast %222 : vector<1x30xf32> to vector<16x30xf32>
    %224 = arith.addf %221, %223 : vector<16x30xf32>
    %cst_132 = arith.constant 0.000000e+00 : f32
    %225 = vector.broadcast %cst_132 : f32 to vector<16x30xf32>
    %226 = arith.maximumf %224, %225 : vector<16x30xf32>
    %c0_133 = arith.constant 0 : index
    %c256_134 = arith.constant 256 : index
    %227 = vector.load %arg14[%c0_133, %c256_134] : memref<30x384xbf16, #tpu.memory_space<vmem>>, vector<30x20xbf16>
    %228 = arith.truncf %226 : vector<16x30xf32> to vector<16x30xbf16>
    %cst_135 = arith.constant dense<0.000000e+00> : vector<16x20xf32>
    %229 = tpu.matmul %228, %227, %cst_135 {dimension_numbers = #tpu.dot_dimension_numbers<[1], [0], [0], [1], [0, 0, 1, 1], [], []>} : vector<16x30xbf16>, vector<30x20xbf16>, vector<16x20xf32> -> vector<16x20xf32>
    %c0_136 = arith.constant 0 : index
    %c3584 = arith.constant 3584 : index
    %230 = vector.load %arg16[%c0_136, %c3584] : memref<1x3840xf32, #tpu.memory_space<vmem>>, vector<1x20xf32>
    %231 = vector.broadcast %230 : vector<1x20xf32> to vector<16x20xf32>
    %232 = arith.addf %229, %231 : vector<16x20xf32>
    %cst_137 = arith.constant 0.000000e+00 : f32
    %233 = vector.broadcast %cst_137 : f32 to vector<16x20xf32>
    %234 = arith.maximumf %232, %233 : vector<16x20xf32>
    %c0_138 = arith.constant 0 : index
    %c128_139 = arith.constant 128 : index
    %235 = vector.load %arg13[%c0_138, %c128_139] : memref<20x256xbf16, #tpu.memory_space<vmem>>, vector<20x1xbf16>
    %236 = arith.truncf %234 : vector<16x20xf32> to vector<16x20xbf16>
    %cst_140 = arith.constant dense<0.000000e+00> : vector<16x1xf32>
    %237 = tpu.matmul %236, %235, %cst_140 {dimension_numbers = #tpu.dot_dimension_numbers<[1], [0], [0], [1], [0, 0, 1, 1], [], []>} : vector<16x20xbf16>, vector<20x1xbf16>, vector<16x1xf32> -> vector<16x1xf32>
    %c0_141 = arith.constant 0 : index
    %c3712 = arith.constant 3712 : index
    %238 = vector.load %arg16[%c0_141, %c3712] : memref<1x3840xf32, #tpu.memory_space<vmem>>, vector<1x1xf32>
    %239 = vector.broadcast %238 : vector<1x1xf32> to vector<16x1xf32>
    %240 = arith.addf %237, %239 : vector<16x1xf32>
    %241 = math.absf %240 : vector<16x1xf32>
    %cst_142 = arith.constant 0.000000e+00 : f32
    %242 = vector.broadcast %cst_142 : f32 to vector<16x1xf32>
    %243 = arith.subf %242, %241 : vector<16x1xf32>
    %244 = math.exp %243 : vector<16x1xf32>
    %cst_143 = arith.constant 0.000000e+00 : f32
    %245 = vector.broadcast %cst_143 : f32 to vector<16x1xf32>
    %246 = arith.cmpf oge, %240, %245 : vector<16x1xf32>
    %cst_144 = arith.constant 1.000000e+00 : f32
    %247 = vector.broadcast %cst_144 : f32 to vector<16x1xf32>
    %248 = arith.addf %247, %244 : vector<16x1xf32>
    %cst_145 = arith.constant 1.000000e+00 : f32
    %249 = vector.broadcast %cst_145 : f32 to vector<16x1xf32>
    %250 = arith.divf %249, %248 : vector<16x1xf32>
    %cst_146 = arith.constant 1.000000e+00 : f32
    %251 = vector.broadcast %cst_146 : f32 to vector<16x1xf32>
    %252 = arith.addf %251, %244 : vector<16x1xf32>
    %253 = arith.divf %244, %252 : vector<16x1xf32>
    %254 = arith.select %246, %250, %253 : vector<16x1xi1>, vector<16x1xf32>
    %c0_147 = arith.constant 0 : index
    %c0_148 = arith.constant 0 : index
    %255 = vector.load %arg17[%c0_147, %c0_148] : memref<16x1xf32, #tpu.memory_space<vmem>>, vector<16x1xf32>
    tpu.vector_store %arg17[%c0_147, %c0_148], %254 {strides = array<i32>} : memref<16x1xf32, #tpu.memory_space<vmem>>, vector<16x1xf32>,
    return
  }
  func.func @transform_0(%arg0: i32) -> (i32, i32) {
    %c0_i32 = arith.constant 0 : i32
    %c0_i32_0 = arith.constant 0 : i32
    return %arg0, %c0_i32 : i32, i32
  }
  func.func @transform_1(%arg0: i32) -> (i32, i32) {
    %c0_i32 = arith.constant 0 : i32
    %c0_i32_0 = arith.constant 0 : i32
    return %arg0, %c0_i32 : i32, i32
  }
  func.func @transform_2(%arg0: i32) -> (i32, i32) {
    %c0_i32 = arith.constant 0 : i32
    %c0_i32_0 = arith.constant 0 : i32
    %c0_i32_1 = arith.constant 0 : i32
    return %c0_i32, %c0_i32_0 : i32, i32
  }
  func.func @transform_3(%arg0: i32) -> (i32, i32) {
    %c0_i32 = arith.constant 0 : i32
    %c0_i32_0 = arith.constant 0 : i32
    %c0_i32_1 = arith.constant 0 : i32
    return %c0_i32, %c0_i32_0 : i32, i32
  }
  func.func @transform_4(%arg0: i32) -> (i32, i32) {
    %c0_i32 = arith.constant 0 : i32
    %c0_i32_0 = arith.constant 0 : i32
    %c0_i32_1 = arith.constant 0 : i32
    return %c0_i32, %c0_i32_0 : i32, i32
  }
  func.func @transform_5(%arg0: i32) -> (i32, i32) {
    %c0_i32 = arith.constant 0 : i32
    %c0_i32_0 = arith.constant 0 : i32
    %c0_i32_1 = arith.constant 0 : i32
    return %c0_i32, %c0_i32_0 : i32, i32
  }
  func.func @transform_6(%arg0: i32) -> (i32, i32) {
    %c0_i32 = arith.constant 0 : i32
    %c0_i32_0 = arith.constant 0 : i32
    %c0_i32_1 = arith.constant 0 : i32
    return %c0_i32, %c0_i32_0 : i32, i32
  }
  func.func @transform_7(%arg0: i32) -> (i32, i32) {
    %c0_i32 = arith.constant 0 : i32
    %c0_i32_0 = arith.constant 0 : i32
    %c0_i32_1 = arith.constant 0 : i32
    return %c0_i32, %c0_i32_0 : i32, i32
  }
  func.func @transform_8(%arg0: i32) -> (i32, i32) {
    %c0_i32 = arith.constant 0 : i32
    %c0_i32_0 = arith.constant 0 : i32
    %c0_i32_1 = arith.constant 0 : i32
    return %c0_i32, %c0_i32_0 : i32, i32
  }
  func.func @transform_9(%arg0: i32) -> (i32, i32) {
    %c0_i32 = arith.constant 0 : i32
    %c0_i32_0 = arith.constant 0 : i32
    %c0_i32_1 = arith.constant 0 : i32
    return %c0_i32, %c0_i32_0 : i32, i32
  }
  func.func @transform_10(%arg0: i32) -> (i32, i32) {
    %c0_i32 = arith.constant 0 : i32
    %c0_i32_0 = arith.constant 0 : i32
    %c0_i32_1 = arith.constant 0 : i32
    return %c0_i32, %c0_i32_0 : i32, i32
  }
  func.func @transform_11(%arg0: i32) -> (i32, i32) {
    %c0_i32 = arith.constant 0 : i32
    %c0_i32_0 = arith.constant 0 : i32
    %c0_i32_1 = arith.constant 0 : i32
    return %c0_i32, %c0_i32_0 : i32, i32
  }
  func.func @transform_12(%arg0: i32) -> (i32, i32) {
    %c0_i32 = arith.constant 0 : i32
    %c0_i32_0 = arith.constant 0 : i32
    %c0_i32_1 = arith.constant 0 : i32
    return %c0_i32, %c0_i32_0 : i32, i32
  }
  func.func @transform_13(%arg0: i32) -> (i32, i32) {
    %c0_i32 = arith.constant 0 : i32
    %c0_i32_0 = arith.constant 0 : i32
    %c0_i32_1 = arith.constant 0 : i32
    return %c0_i32, %c0_i32_0 : i32, i32
  }
  func.func @transform_14(%arg0: i32) -> (i32, i32) {
    %c0_i32 = arith.constant 0 : i32
    %c0_i32_0 = arith.constant 0 : i32
    %c0_i32_1 = arith.constant 0 : i32
    return %c0_i32, %c0_i32_0 : i32, i32
  }
  func.func @transform_15(%arg0: i32) -> (i32, i32) {
    %c0_i32 = arith.constant 0 : i32
    %c0_i32_0 = arith.constant 0 : i32
    %c0_i32_1 = arith.constant 0 : i32
    return %c0_i32, %c0_i32_0 : i32, i32
  }
  func.func @transform_16(%arg0: i32) -> (i32, i32) {
    %c0_i32 = arith.constant 0 : i32
    %c0_i32_0 = arith.constant 0 : i32
    return %arg0, %c0_i32 : i32, i32
  }
}

</mosaic_0001>

<bundles_post_ra>
// kernel: _lambda_.1
= control target key start
LH: loop header
LB: loop body
LE: loop exit
PB: predicated region body
PF: predicated region fallthrough
CT: control target
= control target key end

     0   :  { %s10481_s0 = inlined_call_operand.hbm [shape: f32[32,32], index: 0, kind: input, shape index: {}]   ;;  %s10482_s1 = inlined_call_operand.vmem [shape: f32[256,16], index: 1, kind: input, shape index: {}]   ;;  %s10483_s2 = inlined_call_operand.hbm [shape: bf16[32,128], index: 2, kind: input, shape index: {}]   ;;  %s10484_s3 = inlined_call_operand.hbm [shape: bf16[100,384], index: 3, kind: input, shape index: {}]   ;;  %s10485_s4 = inlined_call_operand.hbm [shape: bf16[125,512], index: 4, kind: input, shape index: {}]   ;;  %s10486_s5 = inlined_call_operand.vmem [shape: bf16[175,384], index: 5, kind: input, shape index: {}]   ;;  %s10487_s6 = inlined_call_operand.hbm [shape: bf16[50,384], index: 6, kind: input, shape index: {}]   ;;  %s10488_s7 = inlined_call_operand.hbm [shape: bf16[16,256], index: 7, kind: input, shape index: {}]   ;;  %s10489_s8 = inlined_call_operand.vmem [shape: bf16[140,256], index: 8, kind: input, shape index: {}]   ;;  %s10490_s9 = inlined_call_operand.hbm [shape: bf16[240,256], index: 9, kind: input, shape index: {}]   ;;  %s10491_s10 = inlined_call_operand.vmem [shape: bf16[250,512], index: 10, kind: input, shape index: {}]   ;;  %s10492_s11 = inlined_call_operand.hbm [shape: bf16[3200,128], index: 11, kind: input, shape index: {}]   ;;  %s10493_s12 = inlined_call_operand.hbm [shape: bf16[20,256], index: 12, kind: input, shape index: {}]   ;;  %s10494_s13 = inlined_call_operand.hbm [shape: bf16[30,384], index: 13, kind: input, shape index: {}]   ;;  %s10495_s14 = inlined_call_operand.vmem [shape: bf16[25,128], index: 14, kind: input, shape index: {}]   ;;  %s10496_s15 = inlined_call_operand.hbm [shape: f32[1,3840], index: 15, kind: input, shape index: {}]   ;;  %s10497_s16 = inlined_call_operand.vmem [shape: f32[32,1], index: 16, kind: output, shape index: {}]  }
   0x1   :  { %10512 = sst [smem:[#allocation26_spill]] %s10481_s0 }
   0x2   :  { %10513 = sst [smem:[#allocation27_spill]] %s10482_s1 }
   0x3   :  { %10514 = sst [smem:[#allocation28_spill]] %s10486_s5 }
   0x4   :  { %10515 = sst [smem:[#allocation29_spill]] %s10489_s8 }
   0x5   :  { %10516 = sst [smem:[#allocation30_spill]] %s10491_s10 }
   0x6   :  { %10517 = sst [smem:[#allocation31_spill]] %s10495_s14 }
   0x7   :  { %10518 = sst [smem:[#allocation32_spill]] %s10497_s16 }
   0x8   :  { %21 = vsyncpa [#allocation3], 0 }
   0x9   :  { %23 = vsyncpa [#allocation3 + $0x1], 0 }
   0xa   :  { %24 = vsyncpa [#allocation5], 0 }
   0xb   :  { %25 = vsyncpa [#allocation8], 0 }
   0xc   :  { %26 = vsyncpa [#allocation11], 0 }
   0xd   :  { %27 = vsyncpa [#allocation14], 0 }
   0xe   :  { %28 = vsyncpa [#allocation17], 0  ;;  %s9029_s21 = smov 0   ;;  %s9031_s22 = smov 0  }
   0xf   :  { %s9033_s23 = smov 0   ;;  %s9035_s24 = smov 0  }
  0x10 LB: > { %s8921_s25 = smov [#allocation4]   ;;  %s9050_s27 = sadd.s32 4294967295, %s8919_s24   ;;  %s8919_s24 = sphi %s9035_s24, %s10552_s24   ;;  %s8915_s23 = sphi %s9033_s23, %s10551_s23   ;;  %s8911_s22 = sphi %s9031_s22, %s10550_s22   ;;  %s8907_s21 = sphi %s9029_s21, %s10549_s21  }
  0x11   : > { %s423_s26 = sshll.u32 %s8921_s25, 4  ;;  %p6845_p0 = scmp.ge.s32.totalorder %s8919_s24, 1  ;;  %s9055_s26 = int_to_ptr.vmem [resolvable:$true] %s423_s26 }
  0x12   : > { %p10505_p1 = scmp.eq.s32.totalorder %s9050_s27, 0  ;;  %p411_p2 = scmp.lt.s32.totalorder %s8919_s24, 3 }
  0x13   : > { %s8922_s29 = smov [#allocation7]   ;;  %s8923_s17 = smov [#allocation10]  }
  0x14   : > { %p9057_p3 = pnand %p6845_p0, %p411_p2  ;;  %s449_s30 = sshll.u32 %s8922_s29, 4  ;;  %s9069_s30 = int_to_ptr.vmem [resolvable:$true] %s449_s30 }
  0x15   : > { %s9071_s18 = sshll.u32 %s8923_s17, 4  ;;  %s8555_s25 = scalar_lea.hbm %s10483_s2, 256  ;;  %s479_s18 = int_to_ptr.vmem [resolvable:$true] %s9071_s18 }
  0x16   : > { %s10519_s28 = scalar_select %p9057_p3, 1, 0 }
  0x17   : > { %p7929_p4 = pneg %p9057_p3  ;;  %p8556_p6 = scmp.ne.s32.totalorder %s10483_s2, %s8555_s25 }
  0x18   : > { %10520 = sst [smem:[#allocation25_spill]] %s10519_s28  ;;  %p8562_p10 = scmp.lt.u32.totalorder %s8555_s25, %s10483_s2 }
  0x19   : > { %p9065_p5 = pnand %p7929_p4, %p10505_p1 }
  0x1b   : > { %p9081_p7 = pneg %p9065_p5 }
  0x1d   : > { %p8558_p8 = pnand %p9081_p7, %p8556_p6 }
  0x1f   : > { %p8559_p9 = pneg %p8558_p8 }
  0x21   : > { %p8564_p11 = pnand %p8562_p10, %p8559_p9 }
  0x23   : > { %8567 = shalt.err (!%p8564_p11)
}
  0x24   : > { %s8568_s14 = scalar_lea.vmem %s9055_s26, 256  ;;  %p8576_p2 = scmp.lt.s32.totalorder %s9055_s26, %s9055_s26 }
  0x25   : > { %p8569_p12 = scmp.ne.s32.totalorder %s9055_s26, %s8568_s14  ;;  %p8577_p4 = scmp.lt.s32.totalorder %s8568_s14, %s8568_s14 }
  0x27   : > { %p8571_p13 = pnand %p8569_p12, %p9081_p7  ;;  %p8578_p6 = por %p8577_p4, %p8576_p2 }
  0x29   : > { %p8572_p0 = pneg %p8571_p13 }
  0x2b   : > { %p8579_p8 = pnand %p8578_p6, %p8572_p0 }
  0x2d   : > { %8582 = shalt.err (!%p8579_p8)
}
  0x2e   : > { %s10504_s16 = smov 64   ;;  %s10507_s10 = smov 4  }
  0x2f   : > { %7932 = dma.hbm_to_vmem [thread:$0]  (!%p9065_p5), %s10483_s2, 256, %s9055_s26, [#allocation5], %s10504_s16, %s10504_s16, %s10507_s10  }
  0x30   : > { %s8583_s14 = scalar_lea.hbm %s10485_s4, 4096 }
  0x31   : > { %p8584_p9 = scmp.ne.s32.totalorder %s10485_s4, %s8583_s14  ;;  %p8590_p12 = scmp.lt.u32.totalorder %s8583_s14, %s10485_s4 }
  0x33   : > { %p8586_p10 = pnand %p8584_p9, %p9081_p7 }
  0x35   : > { %p8587_p11 = pneg %p8586_p10 }
  0x37   : > { %p8592_p13 = pnand %p8590_p12, %p8587_p11 }
  0x39   : > { %8595 = shalt.err (!%p8592_p13)
}
  0x3a   : > { %s8596_s26 = scalar_lea.vmem %s9069_s30, 4096  ;;  %p8604_p6 = scmp.lt.s32.totalorder %s9069_s30, %s9069_s30 }
  0x3b   : > { %p8597_p0 = scmp.ne.s32.totalorder %s9069_s30, %s8596_s26  ;;  %p8605_p8 = scmp.lt.s32.totalorder %s8596_s26, %s8596_s26 }
  0x3d   : > { %p8599_p2 = pnand %p8597_p0, %p9081_p7  ;;  %p8606_p9 = por %p8605_p8, %p8604_p6 }
  0x3f   : > { %p8600_p4 = pneg %p8599_p2 }
  0x41   : > { %p8607_p10 = pnand %p8606_p9, %p8600_p4 }
  0x43   : > { %8610 = shalt.err (!%p8607_p10)
}
  0x44   : > { %s8926_s1 = smov 256   ;;  %s8927_s5 = smov 16  }
  0x45   : > { %7938 = dma.hbm_to_vmem [thread:$0]  (!%p9065_p5), %s10485_s4, 4096, %s9069_s30, [#allocation8], %s8926_s1, %s8926_s1, %s8927_s5  }
  0x46   : > { %s8611_s25 = scalar_lea.hbm %s10488_s7, 256 }
  0x47   : > { %p8612_p11 = scmp.ne.s32.totalorder %s10488_s7, %s8611_s25  ;;  %p8618_p0 = scmp.lt.u32.totalorder %s8611_s25, %s10488_s7 }
  0x49   : > { %p8614_p12 = pnand %p8612_p11, %p9081_p7 }
  0x4b   : > { %p8615_p13 = pneg %p8614_p12 }
  0x4d   : > { %p8620_p2 = pnand %p8618_p0, %p8615_p13 }
  0x4f   : > { %8623 = shalt.err (!%p8620_p2)
}
  0x50   : > { %s8624_s8 = scalar_lea.vmem %s479_s18, 256  ;;  %p8632_p9 = scmp.lt.s32.totalorder %s479_s18, %s479_s18 }
  0x51   : > { %p8625_p4 = scmp.ne.s32.totalorder %s479_s18, %s8624_s8  ;;  %p8633_p10 = scmp.lt.s32.totalorder %s8624_s8, %s8624_s8 }
  0x53   : > { %p8627_p6 = pnand %p8625_p4, %p9081_p7  ;;  %p8634_p1 = por %p8633_p10, %p8632_p9 }
  0x55   : > { %p8628_p8 = pneg %p8627_p6 }
  0x57   : > { %p8635_p3 = pnand %p8634_p1, %p8628_p8 }
  0x59   : > { %8638 = shalt.err (!%p8635_p3)
}
  0x5a   : > { %s10508_s30 = smov 128   ;;  %s10510_s1 = smov 8  }
  0x5b   : > { %7944 = dma.hbm_to_vmem [thread:$0]  (!%p9065_p5), %s10488_s7, 256, %s479_s18, [#allocation11], %s10508_s30, %s10508_s30, %s10510_s1  }
  0x5c   : > { %s8930_s28 = smov [#allocation13]   ;;  %s8639_s17 = scalar_lea.hbm %s10492_s11, 25600 }
  0x5d   : > { %s510_s19 = sshll.u32 %s8930_s28, 4  ;;  %p8640_p1 = scmp.ne.s32.totalorder %s10492_s11, %s8639_s17  ;;  %s511_s19 = int_to_ptr.vmem [resolvable:$true] %s510_s19 }
  0x5e   : > { %p8646_p12 = scmp.lt.u32.totalorder %s8639_s17, %s10492_s11 }
  0x5f   : > { %p8642_p3 = pnand %p8640_p1, %p9081_p7 }
  0x61   : > { %p8643_p11 = pneg %p8642_p3 }
  0x63   : > { %p8648_p13 = pnand %p8646_p12, %p8643_p11 }
  0x65   : > { %8651 = shalt.err (!%p8648_p13)
}
  0x66   : > { %s8652_s18 = scalar_lea.vmem %s511_s19, 25600  ;;  %p8660_p6 = scmp.lt.s32.totalorder %s511_s19, %s511_s19 }
  0x67   : > { %p8653_p0 = scmp.ne.s32.totalorder %s511_s19, %s8652_s18  ;;  %p8661_p8 = scmp.lt.s32.totalorder %s8652_s18, %s8652_s18 }
  0x69   : > { %p8655_p2 = pnand %p8653_p0, %p9081_p7  ;;  %p8662_p9 = por %p8661_p8, %p8660_p6 }
  0x6b   : > { %p8656_p4 = pneg %p8655_p2 }
  0x6d   : > { %p8663_p10 = pnand %p8662_p9, %p8656_p4 }
  0x6f   : > { %8666 = shalt.err (!%p8663_p10)
}
  0x70   : > { %s10523_s16 = smov 4   ;;  %s10524_s5 = smov 64  }
  0x71   : > { %7950 = dma.hbm_to_vmem [thread:$0]  (!%p9065_p5), %s10492_s11, 25600, %s511_s19, [#allocation14], %s10524_s5, %s10524_s5, %s10523_s16  }
  0x72   : > { %s8931_s20 = smov [#allocation16]   ;;  %s8932_s17 = smov [#allocation6]  }
  0x73   : > { %s536_s25 = sshll.u32 %s8931_s20, 4  ;;  %s436_s14 = sshll.u32 %s8932_s17, 4  ;;  %s537_s25 = int_to_ptr.vmem [resolvable:$true] %s536_s25  ;;  %s9171_s14 = int_to_ptr.vmem [resolvable:$true] %s436_s14 }
  0x74   : > { %s8667_s18 = scalar_lea.hbm %s10494_s13, 768 }
  0x75   : > { %p8668_p1 = scmp.ne.s32.totalorder %s10494_s13, %s8667_s18  ;;  %p8674_p12 = scmp.lt.u32.totalorder %s8667_s18, %s10494_s13 }
  0x77   : > { %p8670_p3 = pnand %p8668_p1, %p9081_p7 }
  0x79   : > { %p8671_p11 = pneg %p8670_p3 }
  0x7b   : > { %p8676_p13 = pnand %p8674_p12, %p8671_p11 }
  0x7d   : > { %8679 = shalt.err (!%p8676_p13)
}
  0x7e   : > { %s8680_s16 = scalar_lea.vmem %s537_s25, 768  ;;  %p8688_p6 = scmp.lt.s32.totalorder %s537_s25, %s537_s25 }
  0x7f   : > { %p8681_p0 = scmp.ne.s32.totalorder %s537_s25, %s8680_s16  ;;  %p8689_p8 = scmp.lt.s32.totalorder %s8680_s16, %s8680_s16 }
  0x81   : > { %p8683_p2 = pnand %p8681_p0, %p9081_p7  ;;  %p8690_p9 = por %p8689_p8, %p8688_p6 }
  0x83   : > { %p8684_p4 = pneg %p8683_p2 }
  0x85   : > { %p8691_p10 = pnand %p8690_p9, %p8684_p4 }
  0x87   : > { %8694 = shalt.err (!%p8691_p10)
}
  0x88   : > { %s8933_s30 = smov 192   ;;  %s8934_s1 = smov 12  }
  0x89   : > { %7956 = dma.hbm_to_vmem [thread:$0]  (!%p9065_p5), %s10494_s13, 768, %s537_s25, [#allocation17], %s8933_s30, %s8933_s30, %s8934_s1  }
  0x8a   : > { %s8695_s26 = scalar_lea.hbm %s10484_s3, 2496 }
  0x8b   : > { %p8696_p1 = scmp.ne.s32.totalorder %s10484_s3, %s8695_s26  ;;  %p8702_p12 = scmp.lt.u32.totalorder %s8695_s26, %s10484_s3 }
  0x8d   : > { %p8698_p3 = pnand %p8696_p1, %p9081_p7 }
  0x8f   : > { %p8699_p11 = pneg %p8698_p3 }
  0x91   : > { %p8704_p13 = pnand %p8702_p12, %p8699_p11 }
  0x93   : > { %8707 = shalt.err (!%p8704_p13)
}
  0x94   : > { %s8708_s25 = scalar_lea.vmem %s9171_s14, 2496  ;;  %p8716_p6 = scmp.lt.s32.totalorder %s9171_s14, %s9171_s14 }
  0x95   : > { %p8709_p0 = scmp.ne.s32.totalorder %s9171_s14, %s8708_s25  ;;  %p8717_p8 = scmp.lt.s32.totalorder %s8708_s25, %s8708_s25 }
  0x97   : > { %p8711_p2 = pnand %p8709_p0, %p9081_p7  ;;  %p8718_p9 = por %p8717_p8, %p8716_p6 }
  0x99   : > { %p8712_p4 = pneg %p8711_p2 }
  0x9b   : > { %p8719_p10 = pnand %p8718_p9, %p8712_p4 }
  0x9d   : > { %8722 = shalt.err (!%p8719_p10)
}
  0x9e   : > { %7935 = dma.hbm_to_vmem [thread:$0]  (!%p9065_p5), %s10484_s3, 2496, %s9171_s14, [#allocation5], %s8933_s30, %s8933_s30, %s8934_s1  }
  0x9f   : > { %s8935_s28 = smov [#allocation9]   ;;  %s8936_s17 = smov [#allocation12]  }
  0xa0   : > { %s465_s20 = sshll.u32 %s8935_s28, 4  ;;  %s494_s26 = sshll.u32 %s8936_s17, 4  ;;  %s466_s20 = int_to_ptr.vmem [resolvable:$true] %s465_s20  ;;  %s9220_s26 = int_to_ptr.vmem [resolvable:$true] %s494_s26 }
  0xa1   : > { %s8723_s10 = scalar_lea.hbm %s10487_s6, 1344 }
  0xa2   : > { %p8724_p1 = scmp.ne.s32.totalorder %s10487_s6, %s8723_s10  ;;  %p8730_p12 = scmp.lt.u32.totalorder %s8723_s10, %s10487_s6 }
  0xa4   : > { %p8726_p3 = pnand %p8724_p1, %p9081_p7 }
  0xa6   : > { %p8727_p11 = pneg %p8726_p3 }
  0xa8   : > { %p8732_p13 = pnand %p8730_p12, %p8727_p11 }
  0xaa   : > { %8735 = shalt.err (!%p8732_p13)
}
  0xab   : > { %s8736_s5 = scalar_lea.vmem %s466_s20, 1344  ;;  %p8744_p6 = scmp.lt.s32.totalorder %s466_s20, %s466_s20 }
  0xac   : > { %p8737_p0 = scmp.ne.s32.totalorder %s466_s20, %s8736_s5  ;;  %p8745_p8 = scmp.lt.s32.totalorder %s8736_s5, %s8736_s5 }
  0xae   : > { %p8739_p2 = pnand %p8737_p0, %p9081_p7  ;;  %p8746_p9 = por %p8745_p8, %p8744_p6 }
  0xb0   : > { %p8740_p4 = pneg %p8739_p2 }
  0xb2   : > { %p8747_p10 = pnand %p8746_p9, %p8740_p4 }
  0xb4   : > { %8750 = shalt.err (!%p8747_p10)
}
  0xb5   : > { %7941 = dma.hbm_to_vmem [thread:$0]  (!%p9065_p5), %s10487_s6, 1344, %s466_s20, [#allocation8], %s8933_s30, %s8933_s30, %s8934_s1  }
  0xb6   : > { %s8751_s10 = scalar_lea.hbm %s10490_s9, 3840 }
  0xb7   : > { %p8752_p1 = scmp.ne.s32.totalorder %s10490_s9, %s8751_s10  ;;  %p8758_p12 = scmp.lt.u32.totalorder %s8751_s10, %s10490_s9 }
  0xb9   : > { %p8754_p3 = pnand %p8752_p1, %p9081_p7 }
  0xbb   : > { %p8755_p11 = pneg %p8754_p3 }
  0xbd   : > { %p8760_p13 = pnand %p8758_p12, %p8755_p11 }
  0xbf   : > { %8763 = shalt.err (!%p8760_p13)
}
  0xc0   : > { %s8764_s30 = scalar_lea.vmem %s9220_s26, 3840  ;;  %p8772_p6 = scmp.lt.s32.totalorder %s9220_s26, %s9220_s26 }
  0xc1   : > { %p8765_p0 = scmp.ne.s32.totalorder %s9220_s26, %s8764_s30  ;;  %p8773_p8 = scmp.lt.s32.totalorder %s8764_s30, %s8764_s30 }
  0xc3   : > { %p8767_p2 = pnand %p8765_p0, %p9081_p7  ;;  %p8774_p9 = por %p8773_p8, %p8772_p6 }
  0xc5   : > { %p8768_p4 = pneg %p8767_p2 }
  0xc7   : > { %p8775_p10 = pnand %p8774_p9, %p8768_p4 }
  0xc9   : > { %8778 = shalt.err (!%p8775_p10)
}
  0xca   : > { %s10525_s1 = smov 8   ;;  %s10526_s20 = smov 128  }
  0xcb   : > { %7947 = dma.hbm_to_vmem [thread:$0]  (!%p9065_p5), %s10490_s9, 3840, %s9220_s26, [#allocation11], %s10526_s20, %s10526_s20, %s10525_s1  }
  0xcc   : > { %s8937_s17 = smov [#allocation15]   ;;  %s8938_s18 = smov [#allocation18]  }
  0xcd   : > { %s523_s8 = sshll.u32 %s8937_s17, 4  ;;  %s553_s10 = sshll.u32 %s8938_s18, 4  ;;  %s524_s8 = int_to_ptr.vmem [resolvable:$true] %s523_s8  ;;  %s9269_s10 = int_to_ptr.vmem [resolvable:$true] %s553_s10 }
  0xce   : > { %s8779_s16 = scalar_lea.hbm %s10493_s12, 384 }
  0xcf   : > { %p8780_p1 = scmp.ne.s32.totalorder %s10493_s12, %s8779_s16  ;;  %p8786_p12 = scmp.lt.u32.totalorder %s8779_s16, %s10493_s12 }
  0xd1   : > { %p8782_p3 = pnand %p8780_p1, %p9081_p7 }
  0xd3   : > { %p8783_p11 = pneg %p8782_p3 }
  0xd5   : > { %p8788_p13 = pnand %p8786_p12, %p8783_p11 }
  0xd7   : > { %8791 = shalt.err (!%p8788_p13)
}
  0xd8   : > { %s8792_s28 = scalar_lea.vmem %s524_s8, 384  ;;  %p8800_p6 = scmp.lt.s32.totalorder %s524_s8, %s524_s8 }
  0xd9   : > { %p8793_p0 = scmp.ne.s32.totalorder %s524_s8, %s8792_s28  ;;  %p8801_p8 = scmp.lt.s32.totalorder %s8792_s28, %s8792_s28 }
  0xdb   : > { %p8795_p2 = pnand %p8793_p0, %p9081_p7  ;;  %p8802_p9 = por %p8801_p8, %p8800_p6 }
  0xdd   : > { %p8796_p4 = pneg %p8795_p2 }
  0xdf   : > { %p8803_p10 = pnand %p8802_p9, %p8796_p4 }
  0xe1   : > { %8806 = shalt.err (!%p8803_p10)
}
  0xe2   : > { %7953 = dma.hbm_to_vmem [thread:$0]  (!%p9065_p5), %s10493_s12, 384, %s524_s8, [#allocation14], %s10526_s20, %s10526_s20, %s10525_s1  }
  0xe3   : > { %s8807_s16 = scalar_lea.hbm %s10496_s15, 480 }
  0xe4   : > { %p8808_p1 = scmp.ne.s32.totalorder %s10496_s15, %s8807_s16  ;;  %p8814_p12 = scmp.lt.u32.totalorder %s8807_s16, %s10496_s15 }
  0xe6   : > { %p8810_p3 = pnand %p8808_p1, %p9081_p7 }
  0xe8   : > { %p8811_p11 = pneg %p8810_p3 }
  0xea   : > { %p8816_p13 = pnand %p8814_p12, %p8811_p11 }
  0xec   : > { %8819 = shalt.err (!%p8816_p13)
}
  0xed   : > { %s8820_s8 = scalar_lea.vmem %s9269_s10, 480  ;;  %p8828_p6 = scmp.lt.s32.totalorder %s9269_s10, %s9269_s10 }
  0xee   : > { %p8821_p0 = scmp.ne.s32.totalorder %s9269_s10, %s8820_s8  ;;  %p8829_p8 = scmp.lt.s32.totalorder %s8820_s8, %s8820_s8 }
  0xf0   : > { %p8823_p2 = pnand %p8821_p0, %p9081_p7  ;;  %p8830_p9 = por %p8829_p8, %p8828_p6 }
  0xf2   : > { %p8824_p4 = pneg %p8823_p2 }
  0xf4   : > { %p8831_p10 = pnand %p8830_p9, %p8824_p4 }
  0xf6   : > { %8834 = shalt.err (!%p8831_p10)
}
  0xf7   : > { %7959 = dma.hbm_to_vmem [thread:$0]  (!%p9065_p5), %s10496_s15, 480, %s9269_s10, [#allocation17]  }
  0xf8   : > { %s9316_s29 = sadd.s32 1, %s8919_s24   ;;  %s41_s0 = sadd.s32 1, %s8915_s23 }
  0xf9   : > { %s38_s18 = ssub.s32 %s8919_s24, %s9316_s29  ;;  %p48_p7 = scmp.ne.s32.totalorder %s8915_s23, %s8911_s22 }
  0xfa   : > { %p39_p1 = scmp.eq.s32.totalorder %s38_s18, 0  ;;  %p49_p3 = scmp.eq.s32.totalorder %s8919_s24, 0 }
  0xfb   : > { %p54_p11 = scmp.ne.s32.totalorder %s8911_s22, %s8907_s21  ;;  %p7974_p12 = scmp.lt.s32.totalorder %s8919_s24, 2 }
  0xfc   : > { %s9328_s19 = scalar_select %p39_p1, %s8915_s23, %s41_s0  }
  0xfd   : > { %p50_p13 = por %p49_p3, %p48_p7  ;;  %p10527_p0 = scmp.eq.s32.totalorder %s9050_s27, 0 }
  0xfe   : > { %s564_s16 = sand.u32 1, %s8915_s23   ;;  %s7391_s10 = sshll.u32 %s8919_s24, 8 }
  0xff   : > { %p9332_p2 = por %p10527_p0, %p54_p11  ;;  %s6857_s14 = sshll.u32 %s564_s16, 4 }
 0x100   : > { %s10529_s26 = sld [smem:[#allocation26_spill]]  ;;  %s568_s21 = scalar_lea.vmem [#allocation2], %s6857_s14 }
 0x101   : > { %s575_s28 = sshll.u32 %s568_s21, 4  ;;  %p9343_p5 = pnand %p7974_p12, %p50_p13  ;;  %s9347_s28 = int_to_ptr.vmem [resolvable:$true] %s575_s28 }
 0x102   : > { %s9349_s24 = scalar_lea.sflag [#allocation3], %s564_s16 }
 0x103   : > { %p8837_p6 = pneg %p9343_p5 }
 0x106   : > { %s9341_s8 = scalar_lea.hbm %s10529_s26, %s7391_s10  ;;  %s8840_s14 = scalar_lea.hbm %s10529_s26, 512 }
 0x107   : > { %s8835_s0 = scalar_lea.hbm %s9341_s8, 256  ;;  %p8841_p10 = scmp.lt.u32.totalorder %s9341_s8, %s10529_s26 }
 0x108   : > { %p8836_p4 = scmp.ne.s32.totalorder %s9341_s8, %s8835_s0  ;;  %p8842_p7 = scmp.lt.u32.totalorder %s8840_s14, %s8835_s0 }
 0x109   : > { %p8844_p3 = scmp.lt.u32.totalorder %s8835_s0, %s9341_s8 }
 0x10a   : > { %p8838_p8 = pnand %p8837_p6, %p8836_p4  ;;  %p8843_p1 = por %p8842_p7, %p8841_p10 }
 0x10c   : > { %p8839_p9 = pneg %p8838_p8  ;;  %p8845_p11 = por %p8844_p3, %p8843_p1 }
 0x10e   : > { %p8846_p12 = pnand %p8845_p11, %p8839_p9 }
 0x110   : > { %8849 = shalt.err (!%p8846_p12)
}
 0x111   : > { %s8850_s16 = scalar_lea.vmem %s9347_s28, 256  ;;  %s8939_s21 = smov [#allocation2]  }
 0x112   : > { %p8851_p13 = scmp.ne.s32.totalorder %s9347_s28, %s8850_s16  ;;  %s8855_s18 = sshll.u32 %s8939_s21, 4  ;;  %s8856_s18 = int_to_ptr.vmem [resolvable:$false] %s8855_s18 }
 0x113   : > { %s8857_s10 = scalar_lea.vmem %s8856_s18, 512  ;;  %p8858_p8 = scmp.lt.s32.totalorder %s9347_s28, %s8856_s18 }
 0x114   : > { %p8853_p0 = pnand %p8851_p13, %p8837_p6  ;;  %p8859_p10 = scmp.lt.s32.totalorder %s8857_s10, %s8850_s16 }
 0x116   : > { %p8854_p4 = pneg %p8853_p0  ;;  %p8860_p7 = por %p8859_p10, %p8858_p8 }
 0x118   : > { %p8861_p1 = pnand %p8860_p7, %p8854_p4 }
 0x11a   : > { %8864 = shalt.err (!%p8861_p1)
}
 0x11b   : > { %7963 = dma.hbm_to_vmem [thread:$0]  (!%p9343_p5), %s9341_s8, 256, %s9347_s28, %s9349_s24, %s10526_s20, %s10526_s20, %s10525_s1  }
 0x11c   : > { %s10531_s0 = sld [smem:[#allocation25_spill]] }
 0x122   : > { %p10532_p6 = scmp.ne.s32.totalorder %s10531_s0, 0 }
 0x123   : > { %s598_s14 = sand.u32 (!%p10532_p6), 1, %s8911_s22  }
 0x124   : > { %596 = sbr.rel (%p10532_p6) target bundleno = 5553 (0x15b1), region = 84  ;;  %s6861_s30 = sshll.u32 (!%p10532_p6), %s598_s14, 4 }
 0x125   : > { %s599_s5 = scalar_lea.sflag (!%p10532_p6), [#allocation3], %s598_s14  ;;  %s602_s16 = scalar_lea.vmem (!%p10532_p6), [#allocation2], %s6861_s30 }
 0x12b   : > { %8882 = dma.done.wait (%p9332_p2), %s599_s5, 256  }
 0x12c   : > { %8884 = vsyncadd (%p9332_p2), %s599_s5, 4294967040  ;;  %p10533_p9 = scmp.eq.s32.totalorder %s9050_s27, 0 }
 0x12e   : > { %8886 = dma.done.wait (%p10533_p9), [#allocation5], 2752   ;;  %p10534_p3 = pmov %p10533_p9 }
 0x130   : > { %8888 = vsyncadd (%p10534_p3), [#allocation5], 4294964544  ;;  %p10535_p5 = pmov %p10534_p3 }
 0x131   : > { %p10536_p11 = pmov %p10534_p3 }
 0x132   : > { %8890 = dma.done.wait (%p10535_p5), [#allocation8], 5440  }
 0x133   : > { %8892 = vsyncadd (%p10536_p11), [#allocation8], 4294961856  ;;  %p10537_p12 = pmov %p10534_p3 }
 0x134   : > { %p10538_p13 = pmov %p10534_p3 }
 0x135   : > { %8894 = dma.done.wait (%p10537_p12), [#allocation11], 4096  }
 0x136   : > { %8896 = vsyncadd (%p10538_p13), [#allocation11], 4294963200  ;;  %p10539_p2 = pmov %p10534_p3 }
 0x138   : > { %8898 = dma.done.wait (%p10539_p2), [#allocation14], 25984   ;;  %p10540_p0 = pmov %p10539_p2 }
 0x13a   : > { %8900 = vsyncadd (%p10540_p0), [#allocation14], 4294941312  ;;  %p10541_p4 = pmov %p10540_p0 }
 0x13b   : > { %p10542_p8 = pmov %p10540_p0 }
 0x13c   : > { %8902 = dma.done.wait (%p10541_p4), [#allocation17], 1248  }
 0x13d   : > { %8904 = vsyncadd (%p10542_p8), [#allocation17], 4294966048  ;;  %v8940_v0 = vmov 0.0   ;;  %vm8941_vm0 = vmmov 0   ;;  %v8039_v1 = vld [vmem:[#allocation4] sm:$0xff]   ;;  %v8040_v2 = vld [vmem:[#allocation4 + $0x8] sm:$0xff]  }
 0x13e   : > { %7663 = vmatprep.subr.bf16.mxu0 %v8940_v0  ;;  %7667 = vmatprep.mubr.msk.bf16.mxu0 %vm8941_vm0, %v8940_v0  ;;  %v710_v3 = vld [vmem:[%s602_s16] sm:$0xff]  ;;  %v711_v4 = vld [vmem:[%s602_s16 + $0x8] sm:$0xff]  ;;  %vm736_vm1 = vcmask 261120   ;;  %vm847_vm2 = vcmask 1041408   ;;  %vm843_vm3 = vcmask 818176   ;;  %vm1080_vm4 = vcmask 1045504  }
 0x13f   : > { %7671 = vmatprep.subr.bf16.mxu1 %v8940_v0  ;;  %7685 = vmatprep.mubr.msk.bf16.mxu1 %vm8941_vm0, %v8940_v0  ;;  %v8041_v5 = vld [vmem:[#allocation6] ss:$12 sps:$4 sm:$0xff]   ;;  %v716_v6 = vpack.c.bf16 %v711_v4, %v710_v3  ;;  %v8042_v7 = vld [vmem:[#allocation6 + $0x18] ss:$12 sps:$4 sm:$0xff]   ;;  %v8043_v8 = vld [vmem:[#allocation6 + $0x30] ss:$12 sps:$4 sm:$0xff]  }
 0x140   : > { %7664 = vmatpush3.bf16.msra.mxu0 %v8039_v1  ;;  %7672 = vmatpush3.bf16.msra.mxu1 %v8041_v5  ;;  %v8044_v9 = vld [vmem:[#allocation6 + $0x48] ss:$12 sps:$4 sm:$0xff]   ;;  %v8045_v10 = vld [vmem:[#allocation6 + $0x60] ss:$12 sps:$4 sm:$0xff]   ;;  %v8046_v11 = vld [vmem:[#allocation6 + $0x78] ss:$12 sps:$4 sm:$0xff]  }
 0x141   : > { %7665 = vmatprep.subr.bf16.mxu0 %v8940_v0  ;;  %7673 = vmatprep.subr.bf16.mxu1 %v8940_v0  ;;  %v8047_v12 = vld [vmem:[#allocation6 + $0x90] ss:$0 sps:$4 sm:$0x33]   ;;  %v8049_v15 = vld [vmem:[#allocation6 + $0x1c] ss:$12 sps:$4 sm:$0xff]   ;;  %vm1081_vm5 = vcmask 1046528  }
 0x142   : > { %v9424_v13 = vsel %vm847_vm2, %v8047_v12, 0  ;;  %v8048_v14 = vld [vmem:[#allocation6 + $0x4] ss:$12 sps:$4 sm:$0xff]   ;;  %v8050_v16 = vld [vmem:[#allocation6 + $0x34] ss:$12 sps:$4 sm:$0xff]   ;;  %v8942_v52 = vmov 65535  }
 0x143   : > { %v8051_v17 = vld [vmem:[#allocation6 + $0x4c] ss:$12 sps:$4 sm:$0xff]   ;;  %v8052_v28 = vld [vmem:[#allocation6 + $0x64] ss:$12 sps:$4 sm:$0xff]   ;;  %v8053_v29 = vld [vmem:[#allocation6 + $0x7c] ss:$12 sps:$4 sm:$0xff]  }
 0x144   : > { %7666 = vmatpush3.bf16.msra.mxu0 %v8040_v2  ;;  %7674 = vmatpush3.bf16.msra.mxu1 %v8042_v7  ;;  %v6876_v18 = vld [vmem:[#allocation18] ss:$0 sm:$0xff]  ;;  %v8054_v30 = vld [vmem:[#allocation6 + $0x94] ss:$0 sps:$4 sm:$0x33]   ;;  %v1082_v53 = vsel %vm1080_vm4, 4294967295, %v8942_v52 }
 0x145   : > { %7689 = vmatprep.subr.bf16.mxu0 %v8940_v0  ;;  %7675 = vmatprep.subr.bf16.mxu1 %v8940_v0  ;;  %v960_v31 = vsel %vm847_vm2, %v8054_v30, 0  ;;  %v9438_v32 = vld [vmem:[#allocation7] ss:$16 sps:$4 sm:$0xff]   ;;  %v9462_v38 = vld [vmem:[#allocation18 + $0x1] ss:$0 sm:$0xff]  ;;  %v9480_v54 = vsel %vm1081_vm5, %v1082_v53, 0 }
 0x146   : > { %v9441_v33 = vld [vmem:[#allocation7 + $0x20] ss:$16 sps:$4 sm:$0xff]   ;;  %v8063_v56 = vld [vmem:[#allocation7 + $0x4] ss:$16 sps:$4 sm:$0xff]   ;;  %v8065_v57 = vld [vmem:[#allocation7 + $0x8] ss:$16 sps:$4 sm:$0xff]  }
 0x147   : > { %7668 = vmatmul.mubr.msk.bf16.vlgmr.msra.gmra.mrb[0].mxu0 %vm736_vm1, %v716_v6  ;;  %v9445_v34 = vld [vmem:[#allocation7 + $0x40] ss:$16 sps:$4 sm:$0xff]   ;;  %v8068_v58 = vld [vmem:[#allocation7 + $0x28] ss:$16 sps:$4 sm:$0xff]   ;;  %v8066_v59 = vld [vmem:[#allocation7 + $0x24] ss:$16 sps:$4 sm:$0xff]  }
 0x148   : > { %7703 = vmatprep.mubr.msk.bf16.mxu0 %vm8941_vm0, %v8940_v0  ;;  %7676 = vmatpush3.bf16.msra.mxu1 %v8043_v8  ;;  %v9449_v35 = vld [vmem:[#allocation7 + $0x60] ss:$16 sps:$4 sm:$0xff]   ;;  %v8071_v60 = vld [vmem:[#allocation7 + $0x48] ss:$16 sps:$4 sm:$0xff]   ;;  %v8069_v61 = vld [vmem:[#allocation7 + $0x44] ss:$16 sps:$4 sm:$0xff]  }
 0x149   : > { %7677 = vmatprep.subr.bf16.mxu1 %v8940_v0  ;;  %7690 = vmatpush3.bf16.msra.mxu0 %v8048_v14  ;;  %v9453_v36 = vld [vmem:[#allocation7 + $0x80] ss:$16 sps:$4 sm:$0xff]   ;;  %v8074_v62 = vld [vmem:[#allocation7 + $0x68] ss:$16 sps:$4 sm:$0xff]   ;;  %v8072_v63 = vld [vmem:[#allocation7 + $0x64] ss:$16 sps:$4 sm:$0xff]  }
 0x14a   : > { %7691 = vmatprep.subr.bf16.mxu0 %v8940_v0  ;;  %v9457_v37 = vld [vmem:[#allocation7 + $0xa0] ss:$16 sps:$4 sm:$0xff]   ;;  %v8077_v1 = vld [vmem:[#allocation7 + $0x88] ss:$16 sps:$4 sm:$0xff]   ;;  %v8075_v2 = vld [vmem:[#allocation7 + $0x84] ss:$16 sps:$4 sm:$0xff]  }
 0x14b   : > { %v9473_v50 = vld [vmem:[#allocation7 + $0xc0] ss:$16 sps:$4 sm:$0xff]   ;;  %v8080_v3 = vld [vmem:[#allocation7 + $0xa8] ss:$16 sps:$4 sm:$0xff]   ;;  %v8078_v4 = vld [vmem:[#allocation7 + $0xa4] ss:$16 sps:$4 sm:$0xff]  }
 0x14c   : > { %7678 = vmatpush3.bf16.msra.mxu1 %v8044_v9  ;;  %v8062_v51 = vld [vmem:[#allocation7 + $0xe0] ss:$16 sps:$4 sm:$0x7f]   ;;  %v6889_v5 = vld [vmem:[#allocation18 + $0x2] ss:$0 sm:$0xff]  ;;  %vm1076_vm6 = vcmask 1022976  }
 0x14d   : > { %7679 = vmatprep.subr.bf16.mxu1 %v8940_v0  ;;  %7692 = vmatpush3.bf16.msra.mxu0 %v8049_v15  ;;  %v9483_v55 = vand.u32 %v8062_v51, %v9480_v54  ;;  %s10543_s25 = sld [smem:[#allocation28_spill]]  ;;  %v9555_v51 = vld [vmem:[#allocation18 + $0x4] ss:$0 sm:$0xff]  ;;  %vm1443_vm7 = vcmask 1047552   ;;  %vm1439_vm8 = vcmask 384000   ;;  %s6872_s14 = sshll.u32 %s9050_s27, 4 }
 0x14e   : > { %7693 = vmatprep.subr.bf16.mxu0 %v8940_v0  ;;  %p698_p10 = scmp.lt.s32.totalorder %s6872_s14, 31  ;;  %s10544_s1 = sld [smem:[#allocation27_spill]]  ;;  %vm2114_vm9 = vcmask 130048   ;;  %vm2017_vm10 = vcmask 1040384   ;;  %vm2013_vm11 = vcmask 408576   ;;  %vm2418_vm12 = vcmask 97280  }
 0x14f   : > { %s10545_s17 = sld [smem:[#allocation29_spill]]  ;;  %vm2802_vm13 = vcmask 916480   ;;  %vm3415_vm14 = vcmask 1044480   ;;  %vm3390_vm15 = vcmask 998400   ;;  %vm6073_vm1 = vcmask 162816   ;;  %s10548_s21 = sld [smem:[#allocation32_spill]] }
 0x150   : > { %7680 = vmatpush3.bf16.msra.mxu1 %v8045_v10  ;;  %s10554_s14 = smov (!%p698_p10, %s6872_s14), 31 }
 0x151   : > { %7681 = vmatprep.subr.bf16.mxu1 %v8940_v0  ;;  %7694 = vmatpush3.bf16.msra.mxu0 %v8050_v16  ;;  %v8083_v16 = vld [vmem:[#allocation7 + $0xc8] ss:$16 sps:$4 sm:$0xff]   ;;  %s6873_s30 = sshll.u32 %s10554_s14, 3 }
 0x152   : > { %7695 = vmatprep.subr.bf16.mxu0 %v8940_v0 }
 0x153   : > { %v8096_v30 = vld [vmem:[%s10543_s25 + $0x48] ss:$12 sps:$4 sm:$0xff]  }
 0x154   : > { %7682 = vmatpush3.bf16.msra.mxu1 %v8046_v11  ;;  %s9707_s20 = scalar_lea.vmem %s10544_s1, %s6873_s30  ;;  %s10547_s30 = sld [smem:[#allocation31_spill]] }
 0x155   : > { %7683 = vmatprep.subr.bf16.mxu1 %v8940_v0  ;;  %7696 = vmatpush3.bf16.msra.mxu0 %v8051_v17  ;;  %v8081_v17 = vld [vmem:[#allocation7 + $0xc4] ss:$16 sps:$4 sm:$0xff]   ;;  %s6874_s1 = sshll.u32 %s9050_s27, 1 }
 0x156   : > { %7697 = vmatprep.subr.bf16.mxu0 %v8940_v0  ;;  %p704_p7 = scmp.lt.s32.totalorder %s6874_s1, 3 }
 0x158   : > { %7684 = vmatpush3.bf16.msra.mxu1 %v9424_v13  ;;  %s10556_s1 = smov (!%p704_p7, %s6874_s1), 3 }
 0x159   : > { %7707 = vmatprep.subr.bf16.mxu1 %v8940_v0  ;;  %7698 = vmatpush3.bf16.msra.mxu0 %v8052_v28  ;;  %v8093_v28 = vld [vmem:[%s10543_s25 + $0x30] ss:$12 sps:$4 sm:$0xff]   ;;  %s6875_s8 = sshll.u32 %s10556_s1, 3 }
 0x15a   : > { %7699 = vmatprep.subr.bf16.mxu0 %v8940_v0  ;;  %s707_s18 = scalar_lea.vmem %s10548_s21, %s6875_s8 }
 0x15d   : > { %7700 = vmatpush3.bf16.msra.mxu0 %v8053_v29  ;;  %v8098_v29 = vld [vmem:[%s10543_s25 + $0x4c] ss:$12 sps:$4 sm:$0xff]  }
 0x15e   : > { %7701 = vmatprep.subr.bf16.mxu0 %v8940_v0 }
 0x161   : > { %7702 = vmatpush3.bf16.msra.mxu0 %v960_v31  ;;  %v8101_v31 = vld [vmem:[%s10543_s25 + $0x64] ss:$12 sps:$4 sm:$0xff]  }
 0x162   : > { %1248 = vmatprep.subr.bf16.mxu0 %v8065_v57 }
 0x21a   : > { %v774_v19 = vpop.f32.mrb[0].mxu0 }
 0x21b   : > { %v775_v20 = vadd.f32 %v6876_v18, %v774_v19  ;;  %v7669_v21 = vpop.f32.mrb[1].mxu0  ;;  %v8084_v19 = vld [vmem:[#allocation7 + $0xe4] ss:$16 sps:$4 sm:$0x7f]  }
 0x21c   : > { %v777_v22 = vpop.f32.mrb[2].mxu0  ;;  %v1243_v21 = vand.u32 %v8084_v19, %v9480_v54  ;;  %v8127_v19 = vld [vmem:[%s10543_s25 + $0xb0] ss:$12 sps:$4 sm:$0xff]  }
 0x21d   : > { %v778_v23 = vadd.f32 %v6876_v18, %v777_v22  ;;  %v7670_v24 = vpop.f32.mrb[3].mxu0  ;;  %v781_v25 = vmax.f32 %v775_v20, 0.0  ;;  %v8086_v18 = vld [vmem:[#allocation7 + $0xe8] ss:$16 sps:$4 sm:$0x7f]   ;;  %v8943_v22 = vmov 0  }
 0x21e   : > { %v1246_v20 = vand.u32 %v8086_v18, %v9480_v54  ;;  %v8089_v24 = vld [vmem:[%s10543_s25 + $0x4] ss:$12 sps:$4 sm:$0xff]  }
 0x21f   : > { %v782_v26 = vmax.f32 %v778_v23, 0.0  ;;  %v8087_v23 = vld [vmem:[%s10543_s25] ss:$12 sps:$4 sm:$0xff]   ;;  %v8126_v18 = vld [vmem:[%s10543_s25 + $0x98] ss:$12 sps:$4 sm:$0xff]  }
 0x221   : > { %v796_v27 = vpack.c.bf16 %v782_v26, %v781_v25 }
 0x223   : > { %7686 = vmatmul.mubr.msk.bf16.vlgmr.msra.gmra.mrb[0].mxu1 %vm843_vm3, %v796_v27  ;;  %v8095_v27 = vld [vmem:[%s10543_s25 + $0x34] ss:$12 sps:$4 sm:$0xff]  }
 0x224   : > { %7723 = vmatprep.mubr.msk.bf16.mxu1 %vm8941_vm0, %v8940_v0  ;;  %7708 = vmatpush3.bf16.msra.mxu1 %v9438_v32 }
 0x225   : > { %7709 = vmatprep.subr.bf16.mxu1 %v8940_v0 }
 0x228   : > { %7710 = vmatpush3.bf16.msra.mxu1 %v9441_v33 }
 0x229   : > { %7711 = vmatprep.subr.bf16.mxu1 %v8940_v0 }
 0x22c   : > { %7712 = vmatpush3.bf16.msra.mxu1 %v9445_v34 }
 0x22d   : > { %7713 = vmatprep.subr.bf16.mxu1 %v8940_v0 }
 0x230   : > { %7714 = vmatpush3.bf16.msra.mxu1 %v9449_v35 }
 0x231   : > { %7715 = vmatprep.subr.bf16.mxu1 %v8940_v0 }
 0x234   : > { %7716 = vmatpush3.bf16.msra.mxu1 %v9453_v36 }
 0x235   : > { %7717 = vmatprep.subr.bf16.mxu1 %v8940_v0 }
 0x238   : > { %7718 = vmatpush3.bf16.msra.mxu1 %v9457_v37 }
 0x239   : > { %7719 = vmatprep.subr.bf16.mxu1 %v8940_v0 }
 0x23c   : > { %7720 = vmatpush3.bf16.msra.mxu1 %v9473_v50 }
 0x23d   : > { %7721 = vmatprep.subr.bf16.mxu1 %v8940_v0 }
 0x240   : > { %7722 = vmatpush3.bf16.msra.mxu1 %v9483_v55 }
 0x241   : > { %1452 = vmatprep.subr.bf16.mxu1 %v8089_v24  ;;  %v1149_v24 = vld [vmem:[#allocation18 + $0x5] sm:$0x3] }
 0x2f6   : > { %v885_v39 = vpop.f32.mrb[0].mxu1 }
 0x2f7   : > { %v886_v40 = vadd.f32 %v9462_v38, %v885_v39  ;;  %v7687_v41 = vpop.f32.mrb[1].mxu1  ;;  %v8099_v39 = vld [vmem:[%s10543_s25 + $0x60] ss:$12 sps:$4 sm:$0xff]  }
 0x2f8   : > { %v888_v42 = vpop.f32.mrb[2].mxu1  ;;  %v8102_v41 = vld [vmem:[%s10543_s25 + $0x78] ss:$12 sps:$4 sm:$0xff]  }
 0x2f9   : > { %v892_v43 = vmax.f32 %v886_v40, 0.0  ;;  %v889_v44 = vadd.f32 %v9462_v38, %v888_v42  ;;  %v7688_v45 = vpop.f32.mrb[3].mxu1  ;;  %v8104_v40 = vld [vmem:[%s10543_s25 + $0x7c] ss:$12 sps:$4 sm:$0xff]   ;;  %v8107_v42 = vld [vmem:[%s10543_s25 + $0x94] ss:$12 sps:$4 sm:$0xff]  }
 0x2fa   : > { %v8108_v45 = vld [vmem:[%s10543_s25 + $0xa8] ss:$12 sps:$4 sm:$0xff]  }
 0x2fb   : > { %v893_v46 = vmax.f32 %v889_v44, 0.0  ;;  %v9466_v47 = vadd.f32 %v892_v43, %v781_v25  ;;  %v8092_v25 = vld [vmem:[%s10543_s25 + $0x1c] ss:$12 sps:$4 sm:$0xff]   ;;  %v8110_v44 = vld [vmem:[%s10543_s25 + $0xac] ss:$12 sps:$4 sm:$0xff]  }
 0x2fc   : > { %v8105_v43 = vld [vmem:[%s10543_s25 + $0x90] ss:$12 sps:$4 sm:$0xff]  }
 0x2fd   : > { %v9468_v48 = vadd.f32 %v893_v46, %v782_v26  ;;  %v8090_v26 = vld [vmem:[%s10543_s25 + $0x18] ss:$12 sps:$4 sm:$0xff]  }
 0x2fe   : > { %v8113_v46 = vld [vmem:[%s10543_s25 + $0xc4] ss:$12 sps:$4 sm:$0xff]  }
 0x2ff   : > { %v909_v49 = vpack.c.bf16 %v9468_v48, %v9466_v47 }
 0x301   : > { %7704 = vmatmul.mubr.msk.bf16.vlgmr.msra.gmra.mrb[4].mxu0 %vm843_vm3, %v909_v49  ;;  %v8111_v49 = vld [vmem:[%s10543_s25 + $0xc0] ss:$12 sps:$4 sm:$0xff]  }
 0x302   : > { %1249 = vmatpush1.bf16.msra.mxu0 %v8063_v56  ;;  %1280 = vmatprep.mubr.bf16.mxu0 %v8943_v22 }
 0x303   : > { %1250 = vmatprep.subr.bf16.mxu0 %v8068_v58 }
 0x306   : > { %1251 = vmatpush1.bf16.msra.mxu0 %v8066_v59 }
 0x307   : > { %1252 = vmatprep.subr.bf16.mxu0 %v8071_v60 }
 0x30a   : > { %1253 = vmatpush1.bf16.msra.mxu0 %v8069_v61 }
 0x30b   : > { %1254 = vmatprep.subr.bf16.mxu0 %v8074_v62 }
 0x30e   : > { %1255 = vmatpush1.bf16.msra.mxu0 %v8072_v63 }
 0x30f   : > { %1256 = vmatprep.subr.bf16.mxu0 %v8077_v1 }
 0x312   : > { %1257 = vmatpush1.bf16.msra.mxu0 %v8075_v2 }
 0x313   : > { %1258 = vmatprep.subr.bf16.mxu0 %v8080_v3  ;;  %v8116_v3 = vld [vmem:[%s10543_s25 + $0xdc] ss:$12 sps:$4 sm:$0xff]  }
 0x316   : > { %1259 = vmatpush1.bf16.msra.mxu0 %v8078_v4  ;;  %v8114_v4 = vld [vmem:[%s10543_s25 + $0xd8] ss:$12 sps:$4 sm:$0xff]  }
 0x317   : > { %1260 = vmatprep.subr.bf16.mxu0 %v8083_v16  ;;  %v8124_v16 = vld [vmem:[%s10543_s25 + $0x68] ss:$12 sps:$4 sm:$0xff]  }
 0x31a   : > { %1261 = vmatpush1.bf16.msra.mxu0 %v8081_v17  ;;  %v8125_v17 = vld [vmem:[%s10543_s25 + $0x80] ss:$12 sps:$4 sm:$0xff]  }
 0x31b   : > { %1262 = vmatprep.subr.bf16.mxu0 %v1246_v20  ;;  %v1151_v20 = vlaneseq }
 0x31e   : > { %1263 = vmatpush1.bf16.msra.mxu0 %v1243_v21  ;;  %v9615_v21 = vshrl.u32 %v1151_v20, 7 }
 0x31f   : > { %1605 = vmatprep.subr.bf16.mxu0 %v8943_v22 }
 0x3d4   : > { %v996_v6 = vpop.f32.mrb[4].mxu0 }
 0x3d5   : > { %v9486_v7 = vadd.f32 %v6889_v5, %v996_v6  ;;  %v7705_v8 = vpop.f32.mrb[5].mxu0  ;;  %v8119_v6 = vld [vmem:[%s10543_s25 + $0xf4] ss:$12 sps:$4 sm:$0xff]  }
 0x3d6   : > { %v999_v9 = vpop.f32.mrb[6].mxu0 }
 0x3d7   : > { %v9488_v10 = vadd.f32 %v6889_v5, %v999_v9  ;;  %v7706_v11 = vpop.f32.mrb[7].mxu0  ;;  %v1003_v12 = vmax.f32 %v9486_v7, 0.0  ;;  %v8117_v5 = vld [vmem:[%s10543_s25 + $0xf0] ss:$12 sps:$4 sm:$0xff]   ;;  %v1444_v7 = vsel %vm1081_vm5, 4294967295, %v8942_v52 }
 0x3d8   : > { %v9578_v8 = vsel %vm1443_vm7, %v1444_v7, 0  ;;  %v8120_v11 = vld [vmem:[%s10543_s25 + $0x8] ss:$12 sps:$4 sm:$0xff]  }
 0x3d9   : > { %v1004_v14 = vmax.f32 %v9488_v10, 0.0  ;;  %v1450_v9 = vand.u32 %v8119_v6, %v9578_v8  ;;  %v1447_v10 = vand.u32 %v8117_v5, %v9578_v8 }
 0x3db   : > { %v1021_v15 = vpack.c.bf16 %v1004_v14, %v1003_v12 }
 0x3dd   : > { %7724 = vmatmul.mubr.msk.bf16.vlgmr.msra.gmra.mrb[4].mxu1 %vm1076_vm6, %v1021_v15  ;;  %v8123_v15 = vld [vmem:[%s10543_s25 + $0x50] ss:$12 sps:$4 sm:$0xff]  }
 0x3de   : > { %1453 = vmatpush1.bf16.msra.mxu1 %v8087_v23  ;;  %v9618_v23 = vsub.s32 1, %v9615_v21 }
 0x3df   : > { %1454 = vmatprep.subr.bf16.mxu1 %v8092_v25  ;;  %v9621_v25 = vsub.s32 0, %v9615_v21 }
 0x3e2   : > { %1455 = vmatpush1.bf16.msra.mxu1 %v8090_v26  ;;  %v1158_v26 = vrot.slane %v1149_v24, %v9618_v23 }
 0x3e3   : > { %1456 = vmatprep.subr.bf16.mxu1 %v8095_v27  ;;  %v1154_v27 = vrot.slane %v1149_v24, %v9621_v25 }
 0x3e6   : > { %1457 = vmatpush1.bf16.msra.mxu1 %v8093_v28 }
 0x3e7   : > { %1458 = vmatprep.subr.bf16.mxu1 %v8098_v29 }
 0x3ea   : > { %1459 = vmatpush1.bf16.msra.mxu1 %v8096_v30 }
 0x3eb   : > { %1460 = vmatprep.subr.bf16.mxu1 %v8101_v31 }
 0x3ee   : > { %1461 = vmatpush1.bf16.msra.mxu1 %v8099_v39 }
 0x3ef   : > { %1462 = vmatprep.subr.bf16.mxu1 %v8104_v40 }
 0x3f2   : > { %1463 = vmatpush1.bf16.msra.mxu1 %v8102_v41 }
 0x3f3   : > { %1464 = vmatprep.subr.bf16.mxu1 %v8107_v42 }
 0x3f6   : > { %1465 = vmatpush1.bf16.msra.mxu1 %v8105_v43 }
 0x3f7   : > { %1466 = vmatprep.subr.bf16.mxu1 %v8110_v44 }
 0x3fa   : > { %1467 = vmatpush1.bf16.msra.mxu1 %v8108_v45 }
 0x3fb   : > { %1468 = vmatprep.subr.bf16.mxu1 %v8113_v46 }
 0x3fe   : > { %1469 = vmatpush1.bf16.msra.mxu1 %v8111_v49 }
 0x3ff   : > { %1470 = vmatprep.subr.bf16.mxu1 %v8116_v3 }
 0x402   : > { %1471 = vmatpush1.bf16.msra.mxu1 %v8114_v4 }
 0x403   : > { %1472 = vmatprep.subr.bf16.mxu1 %v1450_v9 }
 0x406   : > { %1473 = vmatpush1.bf16.msra.mxu1 %v1447_v10  ;;  %v8131_v10 = vld [vmem:[#allocation7 + $0xc] ss:$16 sps:$4 sm:$0xff]  }
 0x407   : > { %7727 = vmatprep.subr.bf16.mxu1 %v8940_v0 }
 0x4b0   : > { %v1121_v53 = vpop.f32.mrb[4].mxu1 }
 0x4b1   : > { %v1122_v56 = vadd.f32 %v9555_v51, %v1121_v53  ;;  %v7725_v57 = vpop.f32.mrb[5].mxu1 }
 0x4b2   : > { %v1124_v58 = vpop.f32.mrb[6].mxu1 }
 0x4b3   : > { %v1128_v59 = vmax.f32 %v1122_v56, 0.0  ;;  %v1125_v60 = vadd.f32 %v9555_v51, %v1124_v58  ;;  %v7726_v61 = vpop.f32.mrb[7].mxu1 }
 0x4b5   : > { %v1129_v62 = vmax.f32 %v1125_v60, 0.0  ;;  %v1130_v63 = vadd.f32 %v1128_v59, %v1003_v12  ;;  %v8121_v12 = vld [vmem:[%s10543_s25 + $0x20] ss:$12 sps:$4 sm:$0xff]  }
 0x4b7   : > { %v1131_v1 = vadd.f32 %v1129_v62, %v1004_v14  ;;  %v8122_v14 = vld [vmem:[%s10543_s25 + $0x38] ss:$12 sps:$4 sm:$0xff]  }
 0x4b9   : > { %v1148_v2 = vpack.c.bf16 %v1131_v1, %v1130_v63 }
 0x4bb   : > { %6924 = vmatmul.mubr.msk.bf16.vlgmr.msra.gmra.mrb[8].mxu0 %vm1076_vm6, %v1148_v2 }
 0x4bc   : > { %1606 = vmatpush1.bf16.msra.mxu0 %v8120_v11  ;;  %v8132_v11 = vld [vmem:[#allocation7 + $0x2c] ss:$16 sps:$4 sm:$0xff]  }
 0x4bd   : > { %1607 = vmatprep.subr.bf16.mxu0 %v8943_v22 }
 0x4c0   : > { %1608 = vmatpush1.bf16.msra.mxu0 %v8121_v12  ;;  %v8133_v12 = vld [vmem:[#allocation7 + $0x4c] ss:$16 sps:$4 sm:$0xff]  }
 0x4c1   : > { %1609 = vmatprep.subr.bf16.mxu0 %v8943_v22 }
 0x4c4   : > { %1610 = vmatpush1.bf16.msra.mxu0 %v8122_v14  ;;  %v8134_v14 = vld [vmem:[#allocation7 + $0x6c] ss:$16 sps:$4 sm:$0xff]  }
 0x4c5   : > { %1611 = vmatprep.subr.bf16.mxu0 %v8943_v22 }
 0x4c8   : > { %1612 = vmatpush1.bf16.msra.mxu0 %v8123_v15  ;;  %v8135_v15 = vld [vmem:[#allocation7 + $0x8c] ss:$16 sps:$4 sm:$0xff]  }
 0x4c9   : > { %1613 = vmatprep.subr.bf16.mxu0 %v8943_v22 }
 0x4cc   : > { %1614 = vmatpush1.bf16.msra.mxu0 %v8124_v16  ;;  %v6948_v16 = vld [vmem:[#allocation18 + $0xa] ss:$0 sm:$0xff] }
 0x4cd   : > { %1615 = vmatprep.subr.bf16.mxu0 %v8943_v22 }
 0x4d0   : > { %1616 = vmatpush1.bf16.msra.mxu0 %v8125_v17 }
 0x4d1   : > { %1617 = vmatprep.subr.bf16.mxu0 %v8943_v22 }
 0x4d4   : > { %1618 = vmatpush1.bf16.msra.mxu0 %v8126_v18 }
 0x4d5   : > { %1619 = vmatprep.subr.bf16.mxu0 %v8943_v22 }
 0x4d8   : > { %1620 = vmatpush1.bf16.msra.mxu0 %v8127_v19 }
 0x4d9   : > { %1621 = vmatprep.subr.bf16.mxu0 %v8943_v22 }
 0x58e   : > { %v1282_v28 = vpop.f32.mrb[8].mxu0 }
 0x58f   : > { %v1284_v29 = vpop.f32.mrb[9].mxu0  ;;  %v1283_v39 = vadd.f32 %v1282_v28, %v1154_v27 }
 0x590   : > { %v1285_v30 = vadd.f32 %v1284_v29, %v1158_v26  ;;  %v1286_v31 = vpop.f32.mrb[10].mxu0 }
 0x591   : > { %v1287_v40 = vadd.f32 %v1286_v31, %v1154_v27  ;;  %v1288_v41 = vpop.f32.mrb[11].mxu0  ;;  %v1291_v46 = vmax.f32 %v1283_v39, 0.0  ;;  %v8550_v31 = vld [vmem:[#allocation6 + $0x18] ss:$12 sps:$4 sm:$0xff]   ;;  %v8551_v39 = vld [vmem:[#allocation6 + $0x30] ss:$12 sps:$4 sm:$0xff]  }
 0x592   : > { %v1289_v42 = vadd.f32 %v1288_v41, %v1158_v26  ;;  %v1292_v44 = vmax.f32 %v1285_v30, 0.0  ;;  %v8549_v30 = vld [vmem:[#allocation6] ss:$12 sps:$4 sm:$0xff]  }
 0x593   : > { %v1293_v43 = vmax.f32 %v1287_v40, 0.0  ;;  %v8552_v40 = vld [vmem:[#allocation6 + $0x48] ss:$12 sps:$4 sm:$0xff]   ;;  %v8553_v41 = vld [vmem:[#allocation6 + $0x60] ss:$12 sps:$4 sm:$0xff]  }
 0x594   : > { %v1294_v45 = vmax.f32 %v1289_v42, 0.0  ;;  %v8554_v42 = vld [vmem:[#allocation6 + $0x78] ss:$12 sps:$4 sm:$0xff]  }
 0x595   : > { %v1317_v53 = vpack.c.bf16 %v1293_v43, %v1291_v46 }
 0x596   : > { %v1318_v49 = vpack.c.bf16 %v1294_v45, %v1292_v44 }
 0x598   : > { %6947 = vmatprep.mubr.msk.bf16.mxu1 %vm1439_vm8, %v1318_v49 }
 0x599   : > { %1485 = vmatmul.mubr.bf16.vlgmr.msra.gmra.mrb[8].mxu1 %v1317_v53 }
 0x59a   : > { %7728 = vmatpush3.bf16.msra.mxu1 %v9438_v32  ;;  %7743 = vmatprep.mubr.msk.bf16.mxu1 %vm8941_vm0, %v8940_v0  ;;  %v8128_v32 = vld [vmem:[%s10543_s25 + $0xc8] ss:$12 sps:$4 sm:$0xff]  }
 0x59b   : > { %7729 = vmatprep.subr.bf16.mxu1 %v8940_v0  ;;  %1622 = vmatpush1.bf16.msra.mxu0 %v8128_v32 }
 0x59c   : > { %1623 = vmatprep.subr.bf16.mxu0 %v8943_v22 }
 0x59e   : > { %7730 = vmatpush3.bf16.msra.mxu1 %v9441_v33  ;;  %v8129_v33 = vld [vmem:[%s10543_s25 + $0xe0] ss:$12 sps:$4 sm:$0xff]  }
 0x59f   : > { %7731 = vmatprep.subr.bf16.mxu1 %v8940_v0  ;;  %1624 = vmatpush1.bf16.msra.mxu0 %v8129_v33 }
 0x5a0   : > { %1625 = vmatprep.subr.bf16.mxu0 %v8943_v22 }
 0x5a2   : > { %7732 = vmatpush3.bf16.msra.mxu1 %v9445_v34  ;;  %v8130_v34 = vld [vmem:[%s10543_s25 + $0xf8] ss:$12 sps:$4 sm:$0xff]  }
 0x5a3   : > { %7733 = vmatprep.subr.bf16.mxu1 %v8940_v0 }
 0x5a6   : > { %7734 = vmatpush3.bf16.msra.mxu1 %v9449_v35  ;;  %v1603_v35 = vand.u32 %v8130_v34, %v9578_v8 }
 0x5a7   : > { %7735 = vmatprep.subr.bf16.mxu1 %v8940_v0 }
 0x5a8   : > { %1626 = vmatpush1.bf16.msra.mxu0 %v1603_v35 }
 0x5a9   : > { %7747 = vmatprep.subr.bf16.mxu0 %v8940_v0 }
 0x5aa   : > { %7736 = vmatpush3.bf16.msra.mxu1 %v9453_v36  ;;  %v1319_v36 = vld [vmem:[#allocation18 + $0x8] sm:$0x3] }
 0x5ab   : > { %7737 = vmatprep.subr.bf16.mxu1 %v8940_v0 }
 0x5ae   : > { %7738 = vmatpush3.bf16.msra.mxu1 %v9457_v37  ;;  %v1324_v37 = vrot.slane %v1319_v36, %v9621_v25 }
 0x5af   : > { %7739 = vmatprep.subr.bf16.mxu1 %v8940_v0 }
 0x5b2   : > { %7740 = vmatpush3.bf16.msra.mxu1 %v9473_v50  ;;  %v1328_v50 = vrot.slane %v1319_v36, %v9618_v23 }
 0x5b3   : > { %7741 = vmatprep.subr.bf16.mxu1 %v8940_v0 }
 0x5b6   : > { %7742 = vmatpush3.bf16.msra.mxu1 %v9483_v55 }
 0x5b7   : > { %7767 = vmatprep.subr.bf16.mxu1 %v8940_v0 }
 0x66c   : > { %v1486_v55 = vpop.f32.mrb[8].mxu1 }
 0x66d   : > { %v1487_v56 = vadd.f32 %v1486_v55, %v1324_v37  ;;  %v1488_v57 = vpop.f32.mrb[9].mxu1 }
 0x66e   : > { %v1489_v58 = vadd.f32 %v1488_v57, %v1328_v50  ;;  %v1490_v59 = vpop.f32.mrb[10].mxu1  ;;  %v8141_v57 = vld [vmem:[#allocation6 + $0x38] ss:$12 sps:$4 sm:$0xff]  }
 0x66f   : > { %v1495_v60 = vmax.f32 %v1487_v56, 0.0  ;;  %v1491_v61 = vadd.f32 %v1490_v59, %v1324_v37  ;;  %v1492_v62 = vpop.f32.mrb[11].mxu1  ;;  %v8140_v56 = vld [vmem:[#allocation6 + $0x20] ss:$12 sps:$4 sm:$0xff]  }
 0x670   : > { %v1496_v63 = vmax.f32 %v1489_v58, 0.0  ;;  %v1493_v1 = vadd.f32 %v1492_v62, %v1328_v50  ;;  %v6962_v58 = vld [vmem:[#allocation18 + $0x7] ss:$0 sm:$0xff] }
 0x671   : > { %v1497_v2 = vmax.f32 %v1491_v61, 0.0  ;;  %v1499_v4 = vadd.f32 %v1495_v60, %v1291_v46 }
 0x672   : > { %v1498_v3 = vmax.f32 %v1493_v1, 0.0  ;;  %v1500_v6 = vadd.f32 %v1496_v63, %v1292_v44  ;;  %v8137_v44 = vld [vmem:[#allocation7 + $0xcc] ss:$16 sps:$4 sm:$0xff]  }
 0x673   : > { %v1501_v5 = vadd.f32 %v1497_v2, %v1293_v43  ;;  %v8136_v43 = vld [vmem:[#allocation7 + $0xac] ss:$16 sps:$4 sm:$0xff]  }
 0x674   : > { %v1502_v7 = vadd.f32 %v1498_v3, %v1294_v45  ;;  %v8138_v45 = vld [vmem:[#allocation7 + $0xec] ss:$16 sps:$4 sm:$0x7f]  }
 0x675   : > { %v1525_v8 = vpack.c.bf16 %v1501_v5, %v1499_v4  ;;  %v1772_v46 = vand.u32 %v8138_v45, %v9480_v54  ;;  %v8139_v54 = vld [vmem:[#allocation6 + $0x8] ss:$12 sps:$4 sm:$0xff]  }
 0x676   : > { %v1526_v9 = vpack.c.bf16 %v1502_v7, %v1500_v6  ;;  %v8143_v7 = vld [vmem:[#allocation6 + $0x68] ss:$12 sps:$4 sm:$0xff]  }
 0x677   : > { %v2073_v45 = vld [vmem:[%s9707_s20 + $0x38] sm:$0xff] }
 0x678   : > { %6960 = vmatprep.mubr.msk.bf16.mxu0 %vm1439_vm8, %v1526_v9  ;;  %v8145_v9 = vld [vmem:[#allocation6 + $0x98] ss:$0 sps:$4 sm:$0x33]  }
 0x679   : > { %1638 = vmatmul.mubr.bf16.vlgmr.msra.gmra.mrb[12].mxu0 %v1525_v8  ;;  %v8144_v8 = vld [vmem:[#allocation6 + $0x80] ss:$12 sps:$4 sm:$0xff]  }
 0x67a   : > { %7763 = vmatprep.mubr.msk.bf16.mxu0 %vm8941_vm0, %v8940_v0  ;;  %7748 = vmatpush3.bf16.msra.mxu0 %v8131_v10  ;;  %v8149_v10 = vld [vmem:[#allocation9] ss:$12 sps:$4 sm:$0xff]  }
 0x67b   : > { %7749 = vmatprep.subr.bf16.mxu0 %v8940_v0 }
 0x67e   : > { %7750 = vmatpush3.bf16.msra.mxu0 %v8132_v11  ;;  %v8150_v11 = vld [vmem:[#allocation9 + $0x18] ss:$12 sps:$4 sm:$0xff]  }
 0x67f   : > { %7751 = vmatprep.subr.bf16.mxu0 %v8940_v0 }
 0x682   : > { %7752 = vmatpush3.bf16.msra.mxu0 %v8133_v12 }
 0x683   : > { %7753 = vmatprep.subr.bf16.mxu0 %v8940_v0 }
 0x686   : > { %7754 = vmatpush3.bf16.msra.mxu0 %v8134_v14 }
 0x687   : > { %7755 = vmatprep.subr.bf16.mxu0 %v8940_v0 }
 0x68a   : > { %7756 = vmatpush3.bf16.msra.mxu0 %v8135_v15 }
 0x68b   : > { %7757 = vmatprep.subr.bf16.mxu0 %v8940_v0 }
 0x68e   : > { %7758 = vmatpush3.bf16.msra.mxu0 %v8136_v43 }
 0x68f   : > { %7759 = vmatprep.subr.bf16.mxu0 %v8940_v0 }
 0x692   : > { %7760 = vmatpush3.bf16.msra.mxu0 %v8137_v44  ;;  %v2072_v44 = vld [vmem:[%s9707_s20 + $0x30] sm:$0xff] }
 0x693   : > { %7761 = vmatprep.subr.bf16.mxu0 %v8940_v0 }
 0x696   : > { %7762 = vmatpush3.bf16.msra.mxu0 %v1772_v46  ;;  %v2087_v46 = vpack.c.bf16 %v2073_v45, %v2072_v44  ;;  %v8164_v45 = vld [vmem:[%s10545_s17 + $0x34] ss:$8 sps:$4 sm:$0xff]  }
 0x697   : > { %7785 = vmatprep.subr.bf16.mxu0 %v8940_v0 }
 0x74c   : > { %v1639_v17 = vpop.f32.mrb[12].mxu0 }
 0x74d   : > { %v1640_v18 = vadd.f32 %v6948_v16, %v1639_v17  ;;  %v1641_v19 = vpop.f32.mrb[13].mxu0 }
 0x74e   : > { %v1642_v20 = vpop.f32.mrb[14].mxu0 }
 0x74f   : > { %v1643_v24 = vadd.f32 %v6948_v16, %v1642_v20  ;;  %v1644_v26 = vpop.f32.mrb[15].mxu0  ;;  %v1646_v27 = vmax.f32 %v1640_v18, 0.0 }
 0x751   : > { %v1647_v28 = vmax.f32 %v1643_v24, 0.0 }
 0x753   : > { %v1648_v29 = vpack.c.bf16 %v1647_v28, %v1646_v27 }
 0x755   : > { %7744 = vmatmul.mubr.msk.bf16.vlgmr.msra.gmra.mrb[12].mxu1 %vm1076_vm6, %v1648_v29  ;;  %v2067_v29 = vld [vmem:[%s9707_s20 + $0x8] sm:$0xff] }
 0x756   : > { %7768 = vmatpush3.bf16.msra.mxu1 %v8549_v30  ;;  %7781 = vmatprep.mubr.msk.bf16.mxu1 %vm8941_vm0, %v8940_v0 }
 0x757   : > { %7769 = vmatprep.subr.bf16.mxu1 %v8940_v0 }
 0x75a   : > { %7770 = vmatpush3.bf16.msra.mxu1 %v8550_v31  ;;  %v2068_v31 = vld [vmem:[%s9707_s20 + $0x10] sm:$0xff] }
 0x75b   : > { %7771 = vmatprep.subr.bf16.mxu1 %v8940_v0 }
 0x75e   : > { %7772 = vmatpush3.bf16.msra.mxu1 %v8551_v39  ;;  %v2069_v39 = vld [vmem:[%s9707_s20 + $0x18] sm:$0xff] }
 0x75f   : > { %7773 = vmatprep.subr.bf16.mxu1 %v8940_v0 }
 0x762   : > { %7774 = vmatpush3.bf16.msra.mxu1 %v8552_v40  ;;  %v2085_v40 = vpack.c.bf16 %v2069_v39, %v2068_v31 }
 0x763   : > { %7775 = vmatprep.subr.bf16.mxu1 %v8940_v0 }
 0x766   : > { %7776 = vmatpush3.bf16.msra.mxu1 %v8553_v41  ;;  %v2070_v41 = vld [vmem:[%s9707_s20 + $0x20] sm:$0xff] }
 0x767   : > { %7777 = vmatprep.subr.bf16.mxu1 %v8940_v0 }
 0x76a   : > { %7778 = vmatpush3.bf16.msra.mxu1 %v8554_v42  ;;  %v2071_v42 = vld [vmem:[%s9707_s20 + $0x28] sm:$0xff] }
 0x76b   : > { %7779 = vmatprep.subr.bf16.mxu1 %v8940_v0  ;;  %v2086_v43 = vpack.c.bf16 %v2071_v42, %v2070_v41 }
 0x76e   : > { %7780 = vmatpush3.bf16.msra.mxu1 %v9424_v13 }
 0x76f   : > { %7803 = vmatprep.subr.bf16.mxu1 %v8940_v0 }
 0x828   : > { %v1686_v49 = vpop.f32.mrb[12].mxu1 }
 0x829   : > { %v1687_v53 = vadd.f32 %v9555_v51, %v1686_v49  ;;  %v7745_v13 = vpop.f32.mrb[13].mxu1  ;;  %v2074_v49 = vld [vmem:[%s9707_s20 + $0x40] sm:$0xff] }
 0x82a   : > { %v1689_v32 = vpop.f32.mrb[14].mxu1 }
 0x82b   : > { %v1693_v33 = vmax.f32 %v1687_v53, 0.0  ;;  %v1690_v34 = vadd.f32 %v9555_v51, %v1689_v32  ;;  %v7746_v35 = vpop.f32.mrb[15].mxu1  ;;  %v8142_v51 = vld [vmem:[#allocation6 + $0x50] ss:$12 sps:$4 sm:$0xff]   ;;  %v2076_v32 = vld [vmem:[%s9707_s20 + $0x50] sm:$0xff] }
 0x82c   : > { %v2075_v53 = vld [vmem:[%s9707_s20 + $0x48] sm:$0xff] }
 0x82d   : > { %v1694_v36 = vmax.f32 %v1690_v34, 0.0  ;;  %v1695_v37 = vadd.f32 %v1693_v33, %v1646_v27  ;;  %v8146_v27 = vld [vmem:[#allocation10] ss:$8 sps:$4 sm:$0xff]   ;;  %v2088_v13 = vpack.c.bf16 %v2075_v53, %v2074_v49  ;;  %v2077_v33 = vld [vmem:[%s9707_s20 + $0x58] sm:$0xff] }
 0x82e   : > { %v2089_v34 = vpack.c.bf16 %v2077_v33, %v2076_v32  ;;  %v8151_v35 = vld [vmem:[#allocation9 + $0x30] ss:$12 sps:$4 sm:$0xff]   ;;  %v8162_v33 = vld [vmem:[%s10545_s17 + $0x30] ss:$8 sps:$4 sm:$0xff]  }
 0x82f   : > { %v1696_v50 = vadd.f32 %v1694_v36, %v1647_v28  ;;  %v2078_v36 = vld [vmem:[%s9707_s20 + $0x60] sm:$0xff] }
 0x831   : > { %v1713_v55 = vpack.c.bf16 %v1696_v50, %v1695_v37  ;;  %v2079_v37 = vld [vmem:[%s9707_s20 + $0x68] sm:$0xff] }
 0x832   : > { %v2090_v50 = vpack.c.bf16 %v2079_v37, %v2078_v36  ;;  %v8167_v36 = vld [vmem:[%s10545_s17 + $0x44] ss:$8 sps:$4 sm:$0xff]  }
 0x833   : > { %7764 = vmatmul.mubr.msk.bf16.vlgmr.msra.gmra.mrb[16].mxu0 %vm1076_vm6, %v1713_v55  ;;  %v8152_v55 = vld [vmem:[#allocation9 + $0x48] ss:$0 sps:$4 sm:$0x11]   ;;  %vm6382_vm6 = vcmask 203776  }
 0x834   : > { %7799 = vmatprep.mubr.msk.bf16.mxu0 %vm8941_vm0, %v8940_v0  ;;  %7786 = vmatpush3.bf16.msra.mxu0 %v8139_v54  ;;  %v2019_v54 = vsel %vm2017_vm10, %v8152_v55, 0 }
 0x835   : > { %7787 = vmatprep.subr.bf16.mxu0 %v8940_v0 }
 0x838   : > { %7788 = vmatpush3.bf16.msra.mxu0 %v8140_v56  ;;  %v8155_v56 = vld [vmem:[%s10545_s17 + $0x4] ss:$8 sps:$4 sm:$0xff]  }
 0x839   : > { %7789 = vmatprep.subr.bf16.mxu0 %v8940_v0 }
 0x83c   : > { %7790 = vmatpush3.bf16.msra.mxu0 %v8141_v57  ;;  %v2080_v57 = vld [vmem:[%s9707_s20 + $0x70] sm:$0xff] }
 0x83d   : > { %7791 = vmatprep.subr.bf16.mxu0 %v8940_v0 }
 0x840   : > { %7792 = vmatpush3.bf16.msra.mxu0 %v8142_v51  ;;  %v2081_v51 = vld [vmem:[%s9707_s20 + $0x78] sm:$0xff] }
 0x841   : > { %7793 = vmatprep.subr.bf16.mxu0 %v8940_v0 }
 0x844   : > { %7794 = vmatpush3.bf16.msra.mxu0 %v8143_v7 }
 0x845   : > { %7795 = vmatprep.subr.bf16.mxu0 %v8940_v0 }
 0x848   : > { %7796 = vmatpush3.bf16.msra.mxu0 %v8144_v8 }
 0x849   : > { %7797 = vmatprep.subr.bf16.mxu0 %v8940_v0 }
 0x906   : > { %v1808_v59 = vpop.f32.mrb[16].mxu0 }
 0x907   : > { %v1809_v60 = vadd.f32 %v6962_v58, %v1808_v59  ;;  %v7765_v61 = vpop.f32.mrb[17].mxu0  ;;  %v8180_v59 = vld [vmem:[#allocation12] ss:$8 sps:$4 sm:$0xff]  }
 0x908   : > { %v1811_v62 = vpop.f32.mrb[18].mxu0  ;;  %v8185_v61 = vld [vmem:[#allocation12 + $0x14] ss:$8 sps:$4 sm:$0xff]  }
 0x909   : > { %v1815_v63 = vmax.f32 %v1809_v60, 0.0  ;;  %v1812_v1 = vadd.f32 %v6962_v58, %v1811_v62  ;;  %v7766_v2 = vpop.f32.mrb[19].mxu0  ;;  %v2091_v58 = vpack.c.bf16 %v2081_v51, %v2080_v57  ;;  %v8182_v60 = vld [vmem:[#allocation12 + $0x4] ss:$8 sps:$4 sm:$0xff]   ;;  %v8183_v62 = vld [vmem:[#allocation12 + $0x10] ss:$8 sps:$4 sm:$0xff]  }
 0x90a   : > { %v8191_v2 = vld [vmem:[#allocation12 + $0x34] ss:$8 sps:$4 sm:$0xff]   ;;  %v8165_v51 = vld [vmem:[%s10545_s17 + $0x40] ss:$8 sps:$4 sm:$0xff]  }
 0x90b   : > { %v1816_v3 = vmax.f32 %v1812_v1, 0.0  ;;  %v1817_v4 = vadd.f32 %v1815_v63, %v9466_v47  ;;  %v1932_v47 = vsel %vm847_vm2, %v8145_v9, 0  ;;  %v8188_v63 = vld [vmem:[#allocation12 + $0x24] ss:$8 sps:$4 sm:$0xff]   ;;  %v8186_v1 = vld [vmem:[#allocation12 + $0x20] ss:$8 sps:$4 sm:$0xff]  }
 0x90c   : > { %7798 = vmatpush3.bf16.msra.mxu0 %v1932_v47  ;;  %v2092_v47 = vld [vmem:[#allocation18 + $0xd] sm:$0x3] }
 0x90d   : > { %v1818_v5 = vadd.f32 %v1816_v3, %v9468_v48  ;;  %v8148_v48 = vld [vmem:[#allocation10 + $0x4] ss:$8 sps:$4 sm:$0xff]   ;;  %v8189_v3 = vld [vmem:[#allocation12 + $0x30] ss:$8 sps:$4 sm:$0xff]  }
 0x90e   : > { %2139 = vmatprep.subr.bf16.mxu0 %v8148_v48 }
 0x90f   : > { %v1819_v6 = vpack.c.bf16 %v1818_v5, %v1817_v4 }
 0x911   : > { %7782 = vmatmul.mubr.msk.bf16.vlgmr.msra.gmra.mrb[16].mxu1 %vm843_vm3, %v1819_v6  ;;  %v6973_v6 = vld [vmem:[#allocation18 + $0x3] ss:$0 sm:$0xff] }
 0x912   : > { %7811 = vmatprep.mubr.msk.bf16.mxu1 %vm8941_vm0, %v8940_v0  ;;  %7804 = vmatpush3.bf16.msra.mxu1 %v8149_v10 }
 0x913   : > { %7805 = vmatprep.subr.bf16.mxu1 %v8940_v0 }
 0x916   : > { %7806 = vmatpush3.bf16.msra.mxu1 %v8150_v11 }
 0x917   : > { %7807 = vmatprep.subr.bf16.mxu1 %v8940_v0 }
 0x91a   : > { %7808 = vmatpush3.bf16.msra.mxu1 %v8151_v35 }
 0x91b   : > { %7809 = vmatprep.subr.bf16.mxu1 %v8940_v0 }
 0x91e   : > { %7810 = vmatpush3.bf16.msra.mxu1 %v2019_v54 }
 0x91f   : > { %2449 = vmatprep.subr.bf16.mxu1 %v8155_v56 }
 0x9e4   : > { %v1857_v12 = vpop.f32.mrb[16].mxu1 }
 0x9e5   : > { %v1858_v14 = vadd.f32 %v9462_v38, %v1857_v12  ;;  %v7783_v15 = vpop.f32.mrb[17].mxu1  ;;  %v9752_v12 = vrot.slane %v2092_v47, %v9621_v25 }
 0x9e6   : > { %v1860_v16 = vpop.f32.mrb[18].mxu1 }
 0x9e7   : > { %v1864_v17 = vmax.f32 %v1858_v14, 0.0  ;;  %v1861_v18 = vadd.f32 %v9462_v38, %v1860_v16  ;;  %v7784_v19 = vpop.f32.mrb[19].mxu1  ;;  %v2066_v38 = vld [vmem:[%s9707_s20] sm:$0xff]  ;;  %v9757_v16 = vrot.slane %v2092_v47, %v9618_v23  ;;  %s10546_s20 = sld [smem:[#allocation30_spill]] }
 0x9e8   : > { %v2084_v30 = vpack.c.bf16 %v2067_v29, %v2066_v38  ;;  %v8158_v19 = vld [vmem:[%s10545_s17 + $0x14] ss:$8 sps:$4 sm:$0xff]   ;;  %v8161_v29 = vld [vmem:[%s10545_s17 + $0x24] ss:$8 sps:$4 sm:$0xff]  }
 0x9e9   : > { %v1865_v20 = vmax.f32 %v1861_v18, 0.0  ;;  %v1866_v24 = vadd.f32 %v1864_v17, %v1817_v4  ;;  %v8194_v4 = vld [vmem:[#allocation12 + $0x44] ss:$8 sps:$4 sm:$0xff]   ;;  %v8153_v17 = vld [vmem:[%s10545_s17] ss:$8 sps:$4 sm:$0xff]  }
 0x9eb   : > { %v1867_v26 = vadd.f32 %v1865_v20, %v1818_v5  ;;  %v8192_v5 = vld [vmem:[#allocation12 + $0x40] ss:$8 sps:$4 sm:$0xff]  }
 0x9ed   : > { %v1881_v28 = vpack.c.bf16 %v1867_v26, %v1866_v24 }
 0x9ef   : > { %7800 = vmatmul.mubr.msk.bf16.vlgmr.msra.gmra.mrb[20].mxu0 %vm843_vm3, %v1881_v28  ;;  %vm6232_vm3 = vcmask 244736  }
 0x9f0   : > { %2140 = vmatpush1.bf16.msra.mxu0 %v8146_v27  ;;  %2171 = vmatprep.mubr.bf16.mxu0 %v8943_v22  ;;  %v8156_v27 = vld [vmem:[%s10545_s17 + $0x10] ss:$8 sps:$4 sm:$0xff]  }
 0x9f1   : > { %2827 = vmatprep.subr.bf16.mxu0 %v8182_v60 }
 0x9f7   : > { %6990 = vmatmul.mubr.msk.bf16.vlgmr.msra.gmra.mrb[24].mxu0 %vm2114_vm9, %v2084_v30 }
 0x9f8   : > { %2181 = vmatprep.mubr.bf16.mxu0 %v8943_v22  ;;  %2828 = vmatpush1.bf16.msra.mxu0 %v8180_v59  ;;  %v8170_v59 = vld [vmem:[%s10545_s17 + $0x54] ss:$8 sps:$4 sm:$0xff]  }
 0x9f9   : > { %2829 = vmatprep.subr.bf16.mxu0 %v8185_v61 }
 0x9fc   : > { %2830 = vmatpush1.bf16.msra.mxu0 %v8183_v62 }
 0x9fd   : > { %2831 = vmatprep.subr.bf16.mxu0 %v8188_v63 }
 0x9ff   : > { %6991 = vmatmul.mubr.msk.bf16.gmra.mrb[28].mxu0 %vm2114_vm9, %v2085_v40 }
 0xa00   : > { %2191 = vmatprep.mubr.bf16.mxu0 %v8943_v22  ;;  %2832 = vmatpush1.bf16.msra.mxu0 %v8186_v1 }
 0xa01   : > { %2833 = vmatprep.subr.bf16.mxu0 %v8191_v2  ;;  %v8168_v2 = vld [vmem:[%s10545_s17 + $0x50] ss:$8 sps:$4 sm:$0xff]  }
 0xa04   : > { %2834 = vmatpush1.bf16.msra.mxu0 %v8189_v3 }
 0xa05   : > { %2835 = vmatprep.subr.bf16.mxu0 %v8194_v4 }
 0xa07   : > { %6992 = vmatmul.mubr.msk.bf16.gmra.mrb[32].mxu0 %vm2114_vm9, %v2086_v43  ;;  %v8159_v43 = vld [vmem:[%s10545_s17 + $0x20] ss:$8 sps:$4 sm:$0xff]  }
 0xa08   : > { %2201 = vmatprep.mubr.bf16.mxu0 %v8943_v22  ;;  %2836 = vmatpush1.bf16.msra.mxu0 %v8192_v5  ;;  %v8173_v5 = vld [vmem:[%s10545_s17 + $0x64] ss:$8 sps:$4 sm:$0xff]  }
 0xa0f   : > { %6993 = vmatmul.mubr.msk.bf16.gmra.mrb[36].mxu0 %vm2114_vm9, %v2087_v46 }
 0xa10   : > { %2211 = vmatprep.mubr.bf16.mxu0 %v8943_v22 }
 0xa17   : > { %6994 = vmatmul.mubr.msk.bf16.gmra.mrb[40].mxu0 %vm2114_vm9, %v2088_v13 }
 0xa18   : > { %2221 = vmatprep.mubr.bf16.mxu0 %v8943_v22 }
 0xa1f   : > { %6995 = vmatmul.mubr.msk.bf16.gmra.mrb[44].mxu0 %vm2114_vm9, %v2089_v34 }
 0xa20   : > { %2231 = vmatprep.mubr.bf16.mxu0 %v8943_v22 }
 0xa27   : > { %6996 = vmatmul.mubr.msk.bf16.gmra.mrb[48].mxu0 %vm2114_vm9, %v2090_v50 }
 0xa28   : > { %2241 = vmatprep.mubr.bf16.mxu0 %v8943_v22 }
 0xa2f   : > { %6997 = vmatmul.mubr.msk.bf16.gmra.mrb[52].mxu0 %vm2114_vm9, %v2091_v58 }
 0xac2   : > { %v1968_v7 = vpop.f32.mrb[20].mxu0 }
 0xac3   : > { %v9747_v8 = vadd.f32 %v6973_v6, %v1968_v7  ;;  %v7801_v9 = vpop.f32.mrb[21].mxu0 }
 0xac4   : > { %v1971_v48 = vpop.f32.mrb[22].mxu0 }
 0xac5   : > { %v9749_v10 = vadd.f32 %v6973_v6, %v1971_v48  ;;  %v7802_v11 = vpop.f32.mrb[23].mxu0  ;;  %v1975_v14 = vmax.f32 %v9747_v8, 0.0  ;;  %v2318_v8 = vld [vmem:[#allocation18 + $0xf] sm:$0x3] }
 0xac7   : > { %v1976_v15 = vmax.f32 %v9749_v10, 0.0  ;;  %v9961_v10 = vrot.slane %v2318_v8, %v9621_v25 }
 0xac9   : > { %v1984_v18 = vpack.c.bf16 %v1976_v15, %v1975_v14 }
 0xaca   : > { %v2173_v20 = vpop.f32.mrb[24].mxu0 }
 0xacb   : > { %7812 = vmatmul.mubr.msk.bf16.vlgmr.msra.gmra.mrb[20].mxu1 %vm2013_vm11, %v1984_v18  ;;  %v2174_v24 = vadd.f32 %v2173_v20, %v9752_v12  ;;  %v2175_v26 = vpop.f32.mrb[25].mxu0 }
 0xacc   : > { %2450 = vmatpush1.bf16.msra.mxu1 %v8153_v17  ;;  %v2176_v28 = vadd.f32 %v2175_v26, %v9757_v16  ;;  %v2177_v38 = vpop.f32.mrb[26].mxu0  ;;  %v8171_v17 = vld [vmem:[%s10545_s17 + $0x60] ss:$8 sps:$4 sm:$0xff]  }
 0xacd   : > { %2451 = vmatprep.subr.bf16.mxu1 %v8158_v19  ;;  %v2252_v30 = vmax.f32 %v2174_v24, 0.0  ;;  %v2178_v31 = vadd.f32 %v2177_v38, %v9752_v12  ;;  %v2179_v39 = vpop.f32.mrb[27].mxu0  ;;  %v8176_v19 = vld [vmem:[%s10545_s17 + $0x74] ss:$8 sps:$4 sm:$0xff]   ;;  %v8174_v38 = vld [vmem:[%s10545_s17 + $0x70] ss:$8 sps:$4 sm:$0xff]  }
 0xace   : > { %v2253_v40 = vmax.f32 %v2176_v28, 0.0  ;;  %v2180_v41 = vadd.f32 %v2179_v39, %v9757_v16  ;;  %v8179_v39 = vld [vmem:[%s10545_s17 + $0x80] ss:$8 sps:$4 sm:$0x3f]  }
 0xacf   : > { %v2254_v42 = vmax.f32 %v2178_v31, 0.0 }
 0xad0   : > { %2452 = vmatpush1.bf16.msra.mxu1 %v8156_v27  ;;  %v2255_v44 = vmax.f32 %v2180_v41, 0.0 }
 0xad1   : > { %2453 = vmatprep.subr.bf16.mxu1 %v8161_v29  ;;  %v9786_v46 = vpack.c.bf16 %v2254_v42, %v2252_v30  ;;  %v8177_v29 = vld [vmem:[%s10545_s17 + $0x84] ss:$8 sps:$4 sm:$0x3f]  }
 0xad2   : > { %v2303_v49 = vpack.c.bf16 %v2255_v44, %v2253_v40  ;;  %v2183_v53 = vpop.f32.mrb[28].mxu0 }
 0xad3   : > { %v2184_v13 = vadd.f32 %v2183_v53, %v9752_v12  ;;  %v2185_v32 = vpop.f32.mrb[29].mxu0  ;;  %v2444_v53 = vsel %vm1080_vm4, %v8179_v39, 0 }
 0xad4   : > { %2454 = vmatpush1.bf16.msra.mxu1 %v8159_v43  ;;  %v2186_v34 = vadd.f32 %v2185_v32, %v9757_v16  ;;  %v2187_v35 = vpop.f32.mrb[30].mxu0  ;;  %7017 = vmatprep.mubr.msk.bf16.mxu1 %vm2418_vm12, %v2303_v49 }
 0xad5   : > { %2455 = vmatprep.subr.bf16.mxu1 %v8164_v45  ;;  %v2256_v37 = vmax.f32 %v2184_v13, 0.0  ;;  %v2188_v50 = vadd.f32 %v2187_v35, %v9752_v12  ;;  %v2189_v55 = vpop.f32.mrb[31].mxu0 }
 0xad6   : > { %v2257_v54 = vmax.f32 %v2186_v34, 0.0  ;;  %v2190_v56 = vadd.f32 %v2189_v55, %v9757_v16 }
 0xad7   : > { %v2258_v57 = vmax.f32 %v2188_v50, 0.0 }
 0xad8   : > { %2456 = vmatpush1.bf16.msra.mxu1 %v8162_v33  ;;  %v2259_v58 = vmax.f32 %v2190_v56, 0.0 }
 0xad9   : > { %2457 = vmatprep.subr.bf16.mxu1 %v8167_v36  ;;  %v9805_v60 = vpack.c.bf16 %v2258_v57, %v2256_v37 }
 0xada   : > { %v2305_v61 = vpack.c.bf16 %v2259_v58, %v2257_v54  ;;  %v2193_v62 = vpop.f32.mrb[32].mxu0 }
 0xadb   : > { %v2194_v63 = vadd.f32 %v2193_v62, %v9752_v12  ;;  %v2195_v1 = vpop.f32.mrb[33].mxu0 }
 0xadc   : > { %2458 = vmatpush1.bf16.msra.mxu1 %v8165_v51  ;;  %v2196_v3 = vadd.f32 %v2195_v1, %v9757_v16  ;;  %v2197_v4 = vpop.f32.mrb[34].mxu0 }
 0xadd   : > { %2459 = vmatprep.subr.bf16.mxu1 %v8170_v59  ;;  %v2260_v6 = vmax.f32 %v2194_v63, 0.0  ;;  %v2198_v7 = vadd.f32 %v2197_v4, %v9752_v12  ;;  %v2199_v9 = vpop.f32.mrb[35].mxu0 }
 0xade   : > { %v2261_v47 = vmax.f32 %v2196_v3, 0.0  ;;  %v2200_v48 = vadd.f32 %v2199_v9, %v9757_v16 }
 0xadf   : > { %v2262_v11 = vmax.f32 %v2198_v7, 0.0 }
 0xae0   : > { %2460 = vmatpush1.bf16.msra.mxu1 %v8168_v2  ;;  %v2263_v18 = vmax.f32 %v2200_v48, 0.0 }
 0xae1   : > { %2461 = vmatprep.subr.bf16.mxu1 %v8173_v5  ;;  %v2306_v20 = vpack.c.bf16 %v2262_v11, %v2260_v6 }
 0xae2   : > { %v2307_v24 = vpack.c.bf16 %v2263_v18, %v2261_v47  ;;  %v2203_v26 = vpop.f32.mrb[36].mxu0 }
 0xae3   : > { %v2204_v27 = vadd.f32 %v2203_v26, %v9752_v12  ;;  %v2205_v28 = vpop.f32.mrb[37].mxu0 }
 0xae4   : > { %2462 = vmatpush1.bf16.msra.mxu1 %v8171_v17  ;;  %v2206_v30 = vadd.f32 %v2205_v28, %v9757_v16  ;;  %v2207_v31 = vpop.f32.mrb[38].mxu0 }
 0xae5   : > { %2463 = vmatprep.subr.bf16.mxu1 %v8176_v19  ;;  %v2264_v40 = vmax.f32 %v2204_v27, 0.0  ;;  %v2208_v41 = vadd.f32 %v2207_v31, %v9752_v12  ;;  %v2209_v42 = vpop.f32.mrb[39].mxu0 }
 0xae6   : > { %v2265_v43 = vmax.f32 %v2206_v30, 0.0  ;;  %v2210_v44 = vadd.f32 %v2209_v42, %v9757_v16  ;;  %v8198_v42 = vld [vmem:[#allocation12 + $0x60] ss:$8 sps:$4 sm:$0xff]  }
 0xae7   : > { %v2266_v45 = vmax.f32 %v2208_v41, 0.0  ;;  %v8195_v41 = vld [vmem:[#allocation12 + $0x50] ss:$8 sps:$4 sm:$0xff]  }
 0xae8   : > { %2464 = vmatpush1.bf16.msra.mxu1 %v8174_v38  ;;  %v2267_v49 = vmax.f32 %v2210_v44, 0.0  ;;  %v8203_v44 = vld [vmem:[#allocation12 + $0x74] ss:$8 sps:$4 sm:$0xff]  }
 0xae9   : > { %7016 = vmatprep.subr.msk.bf16.mxu1 %vm1080_vm4, %v8177_v29  ;;  %v2308_v13 = vpack.c.bf16 %v2266_v45, %v2264_v40  ;;  %v8197_v40 = vld [vmem:[#allocation12 + $0x54] ss:$8 sps:$4 sm:$0xff]   ;;  %v8201_v45 = vld [vmem:[#allocation12 + $0x70] ss:$8 sps:$4 sm:$0xff]   ;;  %vm6386_vm4 = vcmask 1043456  }
 0xaea   : > { %v2309_v32 = vpack.c.bf16 %v2267_v49, %v2265_v43  ;;  %v2213_v33 = vpop.f32.mrb[40].mxu0  ;;  %2837 = vmatprep.subr.bf16.mxu0 %v8197_v40  ;;  %v8200_v43 = vld [vmem:[#allocation12 + $0x64] ss:$8 sps:$4 sm:$0xff]   ;;  %v8279_v40 = vld [vmem:[%s10546_s20 + $0x120] ss:$16 sps:$4 sm:$0xff]  }
 0xaeb   : > { %v2214_v34 = vadd.f32 %v2213_v33, %v9752_v12  ;;  %v2215_v35 = vpop.f32.mrb[41].mxu0  ;;  %2838 = vmatpush1.bf16.msra.mxu0 %v8195_v41  ;;  %v8206_v49 = vld [vmem:[#allocation12 + $0x84] ss:$8 sps:$4 sm:$0xff]  }
 0xaec   : > { %2466 = vmatpush1.bf16.msra.mxu1 %v2444_v53  ;;  %v2216_v36 = vadd.f32 %v2215_v35, %v9757_v16  ;;  %v2217_v37 = vpop.f32.mrb[42].mxu0  ;;  %2839 = vmatprep.subr.bf16.mxu0 %v8200_v43  ;;  %v8204_v53 = vld [vmem:[#allocation12 + $0x80] ss:$8 sps:$4 sm:$0xff]   ;;  %v8287_v41 = vld [vmem:[%s10546_s20 + $0x144] ss:$16 sps:$4 sm:$0xff]  }
 0xaed   : > { %v2268_v50 = vmax.f32 %v2214_v34, 0.0  ;;  %v2218_v55 = vadd.f32 %v2217_v37, %v9752_v12  ;;  %v2219_v54 = vpop.f32.mrb[43].mxu0  ;;  %v8212_v34 = vld [vmem:[#allocation12 + $0xa4] ss:$8 sps:$4 sm:$0xff]   ;;  %v8285_v43 = vld [vmem:[%s10546_s20 + $0x140] ss:$16 sps:$4 sm:$0xff]  }
 0xaee   : > { %v2269_v56 = vmax.f32 %v2216_v36, 0.0  ;;  %v2220_v57 = vadd.f32 %v2219_v54, %v9757_v16 }
 0xaef   : > { %2482 = vmatmul.mubr.bf16.vlgmr.msra.gmra.mrb[24].mxu1 %v9786_v46  ;;  %v2270_v51 = vmax.f32 %v2218_v55, 0.0  ;;  %2840 = vmatpush1.bf16.msra.mxu0 %v8198_v42  ;;  %v6982_v42 = vld [vmem:[#allocation18 + $0xb] ss:$0 sm:$0xff] }
 0xaf0   : > { %7018 = vmatprep.mubr.msk.bf16.mxu1 %vm2418_vm12, %v2305_v61  ;;  %v2271_v58 = vmax.f32 %v2220_v57, 0.0  ;;  %2841 = vmatprep.subr.bf16.mxu0 %v8203_v44  ;;  %v8210_v57 = vld [vmem:[#allocation12 + $0xa0] ss:$8 sps:$4 sm:$0xff]   ;;  %v8293_v44 = vld [vmem:[%s10546_s20 + $0x164] ss:$16 sps:$4 sm:$0xff]  }
 0xaf1   : > { %v2310_v59 = vpack.c.bf16 %v2270_v51, %v2268_v50 }
 0xaf2   : > { %v2311_v62 = vpack.c.bf16 %v2271_v58, %v2269_v56  ;;  %v2223_v63 = vpop.f32.mrb[44].mxu0 }
 0xaf3   : > { %v2224_v1 = vadd.f32 %v2223_v63, %v9752_v12  ;;  %v2225_v2 = vpop.f32.mrb[45].mxu0  ;;  %2842 = vmatpush1.bf16.msra.mxu0 %v8201_v45 }
 0xaf4   : > { %v2226_v3 = vadd.f32 %v2225_v2, %v9757_v16  ;;  %v2227_v4 = vpop.f32.mrb[46].mxu0  ;;  %2843 = vmatprep.subr.bf16.mxu0 %v8206_v49  ;;  %v8213_v2 = vld [vmem:[#allocation12 + $0xb0] ss:$8 sps:$4 sm:$0xff]  }
 0xaf5   : > { %v2272_v5 = vmax.f32 %v2224_v1, 0.0  ;;  %v2228_v6 = vadd.f32 %v2227_v4, %v9752_v12  ;;  %v2229_v7 = vpop.f32.mrb[47].mxu0  ;;  %v8218_v4 = vld [vmem:[#allocation12 + $0xc4] ss:$8 sps:$4 sm:$0xff]  }
 0xaf6   : > { %v2273_v9 = vmax.f32 %v2226_v3, 0.0  ;;  %v2230_v46 = vadd.f32 %v2229_v7, %v9757_v16  ;;  %v8222_v7 = vld [vmem:[#allocation12 + $0xe0] ss:$8 sps:$4 sm:$0xff]  }
 0xaf7   : > { %2492 = vmatmul.mubr.bf16.gmra.mrb[28].mxu1 %v9805_v60  ;;  %v2274_v61 = vmax.f32 %v2228_v6, 0.0  ;;  %2844 = vmatpush1.bf16.msra.mxu0 %v8204_v53  ;;  %v8219_v6 = vld [vmem:[#allocation12 + $0xd0] ss:$8 sps:$4 sm:$0xff]  }
 0xaf8   : > { %7019 = vmatprep.mubr.msk.bf16.mxu1 %vm2418_vm12, %v2307_v24  ;;  %v2275_v47 = vmax.f32 %v2230_v46, 0.0  ;;  %v8227_v46 = vld [vmem:[%s10546_s20 + $0x4] ss:$16 sps:$4 sm:$0xff]  }
 0xaf9   : > { %v2312_v48 = vpack.c.bf16 %v2274_v61, %v2272_v5  ;;  %v8221_v5 = vld [vmem:[#allocation12 + $0xd4] ss:$8 sps:$4 sm:$0xff]   ;;  %3428 = vmatprep.subr.bf16.mxu1 %v8227_v46  ;;  %v8228_v46 = vld [vmem:[%s10546_s20 + $0x8] ss:$16 sps:$4 sm:$0xff]  }
 0xafa   : > { %v2313_v11 = vpack.c.bf16 %v2275_v47, %v2273_v9  ;;  %v2233_v17 = vpop.f32.mrb[48].mxu0  ;;  %v8225_v9 = vld [vmem:[%s10546_s20] ss:$16 sps:$4 sm:$0xff]   ;;  %v8230_v61 = vld [vmem:[%s10546_s20 + $0xc] ss:$16 sps:$4 sm:$0xff]  }
 0xafb   : > { %v2234_v18 = vadd.f32 %v2233_v17, %v9752_v12  ;;  %v2235_v60 = vpop.f32.mrb[49].mxu0  ;;  %v8233_v47 = vld [vmem:[%s10546_s20 + $0x24] ss:$16 sps:$4 sm:$0xff]   ;;  %3429 = vmatpush1.bf16.msra.mxu1 %v8225_v9  ;;  %v8237_v17 = vld [vmem:[%s10546_s20 + $0x40] ss:$16 sps:$4 sm:$0xff]  }
 0xafc   : > { %v2236_v19 = vadd.f32 %v2235_v60, %v9757_v16  ;;  %v2237_v24 = vpop.f32.mrb[50].mxu0  ;;  %3430 = vmatprep.subr.bf16.mxu1 %v8233_v47  ;;  %v8243_v60 = vld [vmem:[%s10546_s20 + $0x60] ss:$16 sps:$4 sm:$0xff]  }
 0xafd   : > { %v2276_v26 = vmax.f32 %v2234_v18, 0.0  ;;  %v2238_v27 = vadd.f32 %v2237_v24, %v9752_v12  ;;  %v8245_v18 = vld [vmem:[%s10546_s20 + $0x64] ss:$16 sps:$4 sm:$0xff]   ;;  %v8249_v24 = vld [vmem:[%s10546_s20 + $0x80] ss:$16 sps:$4 sm:$0xff]  }
 0xafe   : > { %v2277_v28 = vmax.f32 %v2236_v19, 0.0  ;;  %v8251_v19 = vld [vmem:[%s10546_s20 + $0x84] ss:$16 sps:$4 sm:$0xff]  }
 0xaff   : > { %2502 = vmatmul.mubr.bf16.gmra.mrb[32].mxu1 %v2306_v20  ;;  %v2239_v20 = vpop.f32.mrb[51].mxu0  ;;  %v2278_v29 = vmax.f32 %v2238_v27, 0.0  ;;  %v8255_v27 = vld [vmem:[%s10546_s20 + $0xa0] ss:$16 sps:$4 sm:$0xff]  }
 0xb00   : > { %7020 = vmatprep.mubr.msk.bf16.mxu1 %vm2418_vm12, %v2309_v32  ;;  %v2240_v38 = vadd.f32 %v2239_v20, %v9757_v16  ;;  %v8207_v32 = vld [vmem:[#allocation12 + $0x90] ss:$8 sps:$4 sm:$0xff]   ;;  %v8263_v20 = vld [vmem:[%s10546_s20 + $0xc4] ss:$16 sps:$4 sm:$0xff]  }
 0xb01   : > { %v2314_v31 = vpack.c.bf16 %v2278_v29, %v2276_v26  ;;  %v8257_v26 = vld [vmem:[%s10546_s20 + $0xa4] ss:$16 sps:$4 sm:$0xff]   ;;  %v8267_v29 = vld [vmem:[%s10546_s20 + $0xe0] ss:$16 sps:$4 sm:$0xff]  }
 0xb02   : > { %v2279_v30 = vmax.f32 %v2240_v38, 0.0  ;;  %v2243_v33 = vpop.f32.mrb[52].mxu0  ;;  %v8269_v38 = vld [vmem:[%s10546_s20 + $0xe4] ss:$16 sps:$4 sm:$0xff]  }
 0xb03   : > { %v2244_v35 = vadd.f32 %v2243_v33, %v9752_v12  ;;  %v2245_v36 = vpop.f32.mrb[53].mxu0 }
 0xb04   : > { %v2315_v39 = vpack.c.bf16 %v2279_v30, %v2277_v28  ;;  %v2246_v37 = vadd.f32 %v2245_v36, %v9757_v16  ;;  %v2247_v50 = vpop.f32.mrb[54].mxu0  ;;  %v8261_v28 = vld [vmem:[%s10546_s20 + $0xc0] ss:$16 sps:$4 sm:$0xff]   ;;  %v8275_v30 = vld [vmem:[%s10546_s20 + $0x104] ss:$16 sps:$4 sm:$0xff]  }
 0xb05   : > { %v2280_v55 = vmax.f32 %v2244_v35, 0.0  ;;  %v2248_v54 = vadd.f32 %v2247_v50, %v9752_v12  ;;  %v2249_v56 = vpop.f32.mrb[55].mxu0  ;;  %v8216_v12 = vld [vmem:[#allocation12 + $0xc0] ss:$8 sps:$4 sm:$0xff]   ;;  %v8299_v36 = vld [vmem:[%s10546_s20 + $0x184] ss:$16 sps:$4 sm:$0xff]  }
 0xb06   : > { %v2281_v51 = vmax.f32 %v2246_v37, 0.0  ;;  %v2250_v58 = vadd.f32 %v2249_v56, %v9757_v16  ;;  %v8224_v16 = vld [vmem:[#allocation12 + $0xe4] ss:$8 sps:$4 sm:$0xff]   ;;  %v8297_v50 = vld [vmem:[%s10546_s20 + $0x180] ss:$16 sps:$4 sm:$0xff]  }
 0xb07   : > { %2512 = vmatmul.mubr.bf16.gmra.mrb[36].mxu1 %v2308_v13  ;;  %v8209_v13 = vld [vmem:[#allocation12 + $0x94] ss:$8 sps:$4 sm:$0xff]  }
 0xb08   : > { %7021 = vmatprep.mubr.msk.bf16.mxu1 %vm2418_vm12, %v2311_v62  ;;  %2845 = vmatprep.subr.bf16.mxu0 %v8209_v13  ;;  %v2282_v62 = vmax.f32 %v2248_v54, 0.0  ;;  %v2283_v63 = vmax.f32 %v2250_v58, 0.0  ;;  %v8305_v56 = vld [vmem:[%s10546_s20 + $0x1a4] ss:$16 sps:$4 sm:$0xff]  }
 0xb09   : > { %2846 = vmatpush1.bf16.msra.mxu0 %v8207_v32  ;;  %v8291_v32 = vld [vmem:[%s10546_s20 + $0x160] ss:$16 sps:$4 sm:$0xff]  }
 0xb0a   : > { %2847 = vmatprep.subr.bf16.mxu0 %v8212_v34  ;;  %v2316_v1 = vpack.c.bf16 %v2282_v62, %v2280_v55  ;;  %v2317_v3 = vpack.c.bf16 %v2283_v63, %v2281_v51  ;;  %v8303_v51 = vld [vmem:[%s10546_s20 + $0x1a0] ss:$16 sps:$4 sm:$0xff]  }
 0xb0d   : > { %2848 = vmatpush1.bf16.msra.mxu0 %v8210_v57 }
 0xb0f   : > { %2522 = vmatmul.mubr.bf16.gmra.mrb[40].mxu1 %v2310_v59  ;;  %v8215_v59 = vld [vmem:[#allocation12 + $0xb4] ss:$8 sps:$4 sm:$0xff]  }
 0xb10   : > { %7022 = vmatprep.mubr.msk.bf16.mxu1 %vm2418_vm12, %v2313_v11  ;;  %2849 = vmatprep.subr.bf16.mxu0 %v8215_v59  ;;  %v8239_v11 = vld [vmem:[%s10546_s20 + $0x44] ss:$16 sps:$4 sm:$0xff]  }
 0xb11   : > { %2850 = vmatpush1.bf16.msra.mxu0 %v8213_v2 }
 0xb12   : > { %2851 = vmatprep.subr.bf16.mxu0 %v8218_v4 }
 0xb15   : > { %2852 = vmatpush1.bf16.msra.mxu0 %v8216_v12 }
 0xb16   : > { %2853 = vmatprep.subr.bf16.mxu0 %v8221_v5 }
 0xb17   : > { %2532 = vmatmul.mubr.bf16.gmra.mrb[44].mxu1 %v2312_v48  ;;  %v8231_v48 = vld [vmem:[%s10546_s20 + $0x20] ss:$16 sps:$4 sm:$0xff]  }
 0xb18   : > { %7023 = vmatprep.mubr.msk.bf16.mxu1 %vm2418_vm12, %v2315_v39  ;;  %3431 = vmatpush1.bf16.msra.mxu1 %v8231_v48  ;;  %v8281_v39 = vld [vmem:[%s10546_s20 + $0x124] ss:$16 sps:$4 sm:$0xff]   ;;  %v8236_v48 = vld [vmem:[%s10546_s20 + $0x2c] ss:$16 sps:$4 sm:$0xff]  }
 0xb19   : > { %2854 = vmatpush1.bf16.msra.mxu0 %v8219_v6  ;;  %3432 = vmatprep.subr.bf16.mxu1 %v8239_v11 }
 0xb1a   : > { %2855 = vmatprep.subr.bf16.mxu0 %v8224_v16 }
 0xb1c   : > { %3433 = vmatpush1.bf16.msra.mxu1 %v8237_v17 }
 0xb1d   : > { %2856 = vmatpush1.bf16.msra.mxu0 %v8222_v7  ;;  %3434 = vmatprep.subr.bf16.mxu1 %v8245_v18 }
 0xb1e   : > { %3541 = vmatprep.subr.bf16.mxu0 %v8230_v61 }
 0xb1f   : > { %2542 = vmatmul.mubr.bf16.gmra.mrb[48].mxu1 %v2314_v31  ;;  %v8273_v31 = vld [vmem:[%s10546_s20 + $0x100] ss:$16 sps:$4 sm:$0xff]  }
 0xb20   : > { %7024 = vmatprep.mubr.msk.bf16.mxu1 %vm2418_vm12, %v2317_v3  ;;  %3435 = vmatpush1.bf16.msra.mxu1 %v8243_v60 }
 0xb21   : > { %3436 = vmatprep.subr.bf16.mxu1 %v8251_v19 }
 0xb24   : > { %3437 = vmatpush1.bf16.msra.mxu1 %v8249_v24  ;;  %v8234_v24 = vld [vmem:[%s10546_s20 + $0x28] ss:$16 sps:$4 sm:$0xff]  }
 0xb25   : > { %3438 = vmatprep.subr.bf16.mxu1 %v8257_v26 }
 0xb27   : > { %2552 = vmatmul.mubr.bf16.gmra.mrb[52].mxu1 %v2316_v1 }
 0xb28   : > { %3439 = vmatpush1.bf16.msra.mxu1 %v8255_v27 }
 0xb29   : > { %3440 = vmatprep.subr.bf16.mxu1 %v8263_v20  ;;  %v8242_v20 = vld [vmem:[%s10546_s20 + $0x4c] ss:$16 sps:$4 sm:$0xff]  }
 0xb2c   : > { %3441 = vmatpush1.bf16.msra.mxu1 %v8261_v28 }
 0xb2d   : > { %3442 = vmatprep.subr.bf16.mxu1 %v8269_v38 }
 0xb30   : > { %3443 = vmatpush1.bf16.msra.mxu1 %v8267_v29 }
 0xb31   : > { %3444 = vmatprep.subr.bf16.mxu1 %v8275_v30 }
 0xb34   : > { %3445 = vmatpush1.bf16.msra.mxu1 %v8273_v31 }
 0xb35   : > { %3446 = vmatprep.subr.bf16.mxu1 %v8281_v39  ;;  %v8240_v39 = vld [vmem:[%s10546_s20 + $0x48] ss:$16 sps:$4 sm:$0xff]  }
 0xb38   : > { %3447 = vmatpush1.bf16.msra.mxu1 %v8279_v40 }
 0xb39   : > { %3448 = vmatprep.subr.bf16.mxu1 %v8287_v41 }
 0xb3c   : > { %3449 = vmatpush1.bf16.msra.mxu1 %v8285_v43 }
 0xb3d   : > { %3450 = vmatprep.subr.bf16.mxu1 %v8293_v44 }
 0xb40   : > { %3451 = vmatpush1.bf16.msra.mxu1 %v8291_v32 }
 0xb41   : > { %3452 = vmatprep.subr.bf16.mxu1 %v8299_v36 }
 0xb44   : > { %3453 = vmatpush1.bf16.msra.mxu1 %v8297_v50 }
 0xb45   : > { %3454 = vmatprep.subr.bf16.mxu1 %v8305_v56 }
 0xb48   : > { %3455 = vmatpush1.bf16.msra.mxu1 %v8303_v51  ;;  %v8252_v51 = vld [vmem:[%s10546_s20 + $0x88] ss:$16 sps:$4 sm:$0xff]  }
 0xb9e   : > { %v2055_v45 = vpop.f32.mrb[20].mxu1 }
 0xb9f   : > { %v2056_v49 = vadd.f32 %v6982_v42, %v2055_v45  ;;  %v7813_v53 = vpop.f32.mrb[21].mxu1 }
 0xba0   : > { %v2058_v13 = vpop.f32.mrb[22].mxu1 }
 0xba1   : > { %v2062_v33 = vmax.f32 %v2056_v49, 0.0  ;;  %v2059_v34 = vadd.f32 %v6982_v42, %v2058_v13  ;;  %v7814_v35 = vpop.f32.mrb[23].mxu1  ;;  %v8248_v42 = vld [vmem:[%s10546_s20 + $0x6c] ss:$16 sps:$4 sm:$0xff]  }
 0xba2   : > { %v8254_v35 = vld [vmem:[%s10546_s20 + $0x8c] ss:$16 sps:$4 sm:$0xff]  }
 0xba3   : > { %v2063_v37 = vmax.f32 %v2059_v34, 0.0  ;;  %v9946_v55 = vadd.f32 %v2062_v33, %v1975_v14  ;;  %v9964_v14 = vrot.slane %v2318_v8, %v9618_v23  ;;  %v8246_v33 = vld [vmem:[%s10546_s20 + $0x68] ss:$16 sps:$4 sm:$0xff]  }
 0xba5   : > { %v9950_v54 = vadd.f32 %v2063_v37, %v1976_v15 }
 0xba7   : > { %v6219_v57 = vpack.c.bf16 %v9950_v54, %v9946_v55 }
 0xbc2   : > { %v2483_v15 = vpop.f32.mrb[24].mxu1 }
 0xbc3   : > { %v2484_v58 = vadd.f32 %v2483_v15, %v9961_v10  ;;  %v2485_v59 = vpop.f32.mrb[25].mxu1 }
 0xbc4   : > { %v2486_v62 = vadd.f32 %v2485_v59, %v9964_v14  ;;  %v2487_v63 = vpop.f32.mrb[26].mxu1 }
 0xbc5   : > { %v2488_v1 = vadd.f32 %v2487_v63, %v9961_v10  ;;  %v2489_v2 = vpop.f32.mrb[27].mxu1  ;;  %v2562_v4 = vmax.f32 %v2484_v58, 0.0  ;;  %v8260_v58 = vld [vmem:[%s10546_s20 + $0xac] ss:$16 sps:$4 sm:$0xff]  }
 0xbc6   : > { %v2490_v3 = vadd.f32 %v2489_v2, %v9964_v14  ;;  %v2563_v5 = vmax.f32 %v2486_v62, 0.0 }
 0xbc7   : > { %v2564_v12 = vmax.f32 %v2488_v1, 0.0 }
 0xbc8   : > { %v2565_v6 = vmax.f32 %v2490_v3, 0.0 }
 0xbc9   : > { %v2624_v16 = vpack.c.bf16 %v2564_v12, %v2562_v4  ;;  %v8258_v12 = vld [vmem:[%s10546_s20 + $0xa8] ss:$16 sps:$4 sm:$0xff]  }
 0xbca   : > { %v2625_v7 = vpack.c.bf16 %v2565_v6, %v2563_v5  ;;  %v2493_v9 = vpop.f32.mrb[28].mxu1  ;;  %v8266_v6 = vld [vmem:[%s10546_s20 + $0xcc] ss:$16 sps:$4 sm:$0xff]  }
 0xbcb   : > { %v2494_v61 = vadd.f32 %v2493_v9, %v9961_v10  ;;  %v2495_v47 = vpop.f32.mrb[29].mxu1 }
 0xbcc   : > { %v2496_v11 = vadd.f32 %v2495_v47, %v9964_v14  ;;  %v2497_v17 = vpop.f32.mrb[30].mxu1  ;;  %7055 = vmatprep.mubr.msk.bf16.mxu0 %vm2802_vm13, %v2625_v7 }
 0xbcd   : > { %v2498_v18 = vadd.f32 %v2497_v17, %v9961_v10  ;;  %v2499_v60 = vpop.f32.mrb[31].mxu1  ;;  %2860 = vmatmul.mubr.bf16.vlgmr.msra.gmra.mrb[56].mxu0 %v2624_v16  ;;  %v2566_v26 = vmax.f32 %v2494_v61, 0.0  ;;  %v8264_v61 = vld [vmem:[%s10546_s20 + $0xc8] ss:$16 sps:$4 sm:$0xff]  }
 0xbce   : > { %v2500_v19 = vadd.f32 %v2499_v60, %v9964_v14  ;;  %3542 = vmatpush1.bf16.msra.mxu0 %v8228_v46  ;;  %v2567_v28 = vmax.f32 %v2496_v11, 0.0  ;;  %v8272_v11 = vld [vmem:[%s10546_s20 + $0xec] ss:$16 sps:$4 sm:$0xff]  }
 0xbcf   : > { %v2568_v27 = vmax.f32 %v2498_v18, 0.0  ;;  %3543 = vmatprep.subr.bf16.mxu0 %v8236_v48 }
 0xbd0   : > { %v2569_v38 = vmax.f32 %v2500_v19, 0.0 }
 0xbd1   : > { %v2626_v29 = vpack.c.bf16 %v2568_v27, %v2566_v26 }
 0xbd2   : > { %v2627_v30 = vpack.c.bf16 %v2569_v38, %v2567_v28  ;;  %v2503_v31 = vpop.f32.mrb[32].mxu1  ;;  %3544 = vmatpush1.bf16.msra.mxu0 %v8234_v24  ;;  %v8278_v38 = vld [vmem:[%s10546_s20 + $0x10c] ss:$16 sps:$4 sm:$0xff]  }
 0xbd3   : > { %v2504_v40 = vadd.f32 %v2503_v31, %v9961_v10  ;;  %v2505_v41 = vpop.f32.mrb[33].mxu1  ;;  %3545 = vmatprep.subr.bf16.mxu0 %v8242_v20  ;;  %v8270_v20 = vld [vmem:[%s10546_s20 + $0xe8] ss:$16 sps:$4 sm:$0xff]  }
 0xbd4   : > { %7056 = vmatprep.mubr.msk.bf16.mxu0 %vm2802_vm13, %v2627_v30  ;;  %v2506_v43 = vadd.f32 %v2505_v41, %v9964_v14  ;;  %v2507_v44 = vpop.f32.mrb[34].mxu1 }
 0xbd5   : > { %2870 = vmatmul.mubr.bf16.gmra.mrb[60].mxu0 %v2626_v29  ;;  %v2570_v45 = vmax.f32 %v2504_v40, 0.0  ;;  %v2508_v49 = vadd.f32 %v2507_v44, %v9961_v10  ;;  %v2509_v53 = vpop.f32.mrb[35].mxu1  ;;  %v8276_v40 = vld [vmem:[%s10546_s20 + $0x108] ss:$16 sps:$4 sm:$0xff]  }
 0xbd6   : > { %v2571_v13 = vmax.f32 %v2506_v43, 0.0  ;;  %v2510_v32 = vadd.f32 %v2509_v53, %v9964_v14  ;;  %3546 = vmatpush1.bf16.msra.mxu0 %v8240_v39  ;;  %v8284_v43 = vld [vmem:[%s10546_s20 + $0x12c] ss:$16 sps:$4 sm:$0xff]  }
 0xbd7   : > { %v2572_v34 = vmax.f32 %v2508_v49, 0.0  ;;  %3547 = vmatprep.subr.bf16.mxu0 %v8248_v42 }
 0xbd8   : > { %v2573_v36 = vmax.f32 %v2510_v32, 0.0 }
 0xbd9   : > { %v2628_v37 = vpack.c.bf16 %v2572_v34, %v2570_v45  ;;  %v8282_v34 = vld [vmem:[%s10546_s20 + $0x128] ss:$16 sps:$4 sm:$0xff]  }
 0xbda   : > { %v2629_v50 = vpack.c.bf16 %v2573_v36, %v2571_v13  ;;  %v2513_v56 = vpop.f32.mrb[36].mxu1  ;;  %3548 = vmatpush1.bf16.msra.mxu0 %v8246_v33  ;;  %v8290_v36 = vld [vmem:[%s10546_s20 + $0x14c] ss:$16 sps:$4 sm:$0xff]  }
 0xbdb   : > { %v2514_v8 = vadd.f32 %v2513_v56, %v9961_v10  ;;  %v2515_v15 = vpop.f32.mrb[37].mxu1  ;;  %3549 = vmatprep.subr.bf16.mxu0 %v8254_v35 }
 0xbdc   : > { %7057 = vmatprep.mubr.msk.bf16.mxu0 %vm2802_vm13, %v2629_v50  ;;  %v2516_v59 = vadd.f32 %v2515_v15, %v9964_v14  ;;  %v2517_v62 = vpop.f32.mrb[38].mxu1 }
 0xbdd   : > { %2880 = vmatmul.mubr.bf16.gmra.mrb[64].mxu0 %v2628_v37  ;;  %v2574_v63 = vmax.f32 %v2514_v8, 0.0  ;;  %v2518_v1 = vadd.f32 %v2517_v62, %v9961_v10  ;;  %v2519_v2 = vpop.f32.mrb[39].mxu1  ;;  %v8296_v8 = vld [vmem:[%s10546_s20 + $0x16c] ss:$16 sps:$4 sm:$0xff]   ;;  %v8294_v62 = vld [vmem:[%s10546_s20 + $0x168] ss:$16 sps:$4 sm:$0xff]  }
 0xbde   : > { %v2575_v3 = vmax.f32 %v2516_v59, 0.0  ;;  %v2520_v4 = vadd.f32 %v2519_v2, %v9964_v14  ;;  %3550 = vmatpush1.bf16.msra.mxu0 %v8252_v51  ;;  %v8288_v51 = vld [vmem:[%s10546_s20 + $0x148] ss:$16 sps:$4 sm:$0xff]   ;;  %v8302_v2 = vld [vmem:[%s10546_s20 + $0x18c] ss:$16 sps:$4 sm:$0xff]  }
 0xbdf   : > { %v2576_v5 = vmax.f32 %v2518_v1, 0.0  ;;  %3551 = vmatprep.subr.bf16.mxu0 %v8260_v58 }
 0xbe0   : > { %v2577_v16 = vmax.f32 %v2520_v4, 0.0 }
 0xbe1   : > { %v2630_v7 = vpack.c.bf16 %v2576_v5, %v2574_v63 }
 0xbe2   : > { %v2631_v9 = vpack.c.bf16 %v2577_v16, %v2575_v3  ;;  %v2523_v46 = vpop.f32.mrb[40].mxu1  ;;  %3552 = vmatpush1.bf16.msra.mxu0 %v8258_v12 }
 0xbe3   : > { %v2524_v47 = vadd.f32 %v2523_v46, %v9961_v10  ;;  %v2525_v48 = vpop.f32.mrb[41].mxu1  ;;  %3553 = vmatprep.subr.bf16.mxu0 %v8266_v6  ;;  %v8308_v46 = vld [vmem:[%s10546_s20 + $0x1ac] ss:$16 sps:$4 sm:$0xff]  }
 0xbe4   : > { %7058 = vmatprep.mubr.msk.bf16.mxu0 %vm2802_vm13, %v2631_v9  ;;  %v2526_v17 = vadd.f32 %v2525_v48, %v9964_v14  ;;  %v2527_v18 = vpop.f32.mrb[42].mxu1  ;;  %v8306_v48 = vld [vmem:[%s10546_s20 + $0x1a8] ss:$16 sps:$4 sm:$0xff]  }
 0xbe5   : > { %2890 = vmatmul.mubr.bf16.gmra.mrb[68].mxu0 %v2630_v7  ;;  %v2578_v60 = vmax.f32 %v2524_v47, 0.0  ;;  %v2528_v19 = vadd.f32 %v2527_v18, %v9961_v10  ;;  %v2529_v24 = vpop.f32.mrb[43].mxu1  ;;  %v8300_v7 = vld [vmem:[%s10546_s20 + $0x188] ss:$16 sps:$4 sm:$0xff]  }
 0xbe6   : > { %v2579_v26 = vmax.f32 %v2526_v17, 0.0  ;;  %v2530_v27 = vadd.f32 %v2529_v24, %v9964_v14  ;;  %3554 = vmatpush1.bf16.msra.mxu0 %v8264_v61 }
 0xbe7   : > { %v2580_v28 = vmax.f32 %v2528_v19, 0.0  ;;  %3555 = vmatprep.subr.bf16.mxu0 %v8272_v11 }
 0xbe8   : > { %v2581_v29 = vmax.f32 %v2530_v27, 0.0 }
 0xbe9   : > { %v2632_v30 = vpack.c.bf16 %v2580_v28, %v2578_v60 }
 0xbea   : > { %v2633_v31 = vpack.c.bf16 %v2581_v29, %v2579_v26  ;;  %v2533_v39 = vpop.f32.mrb[44].mxu1  ;;  %3556 = vmatpush1.bf16.msra.mxu0 %v8270_v20 }
 0xbeb   : > { %v2534_v41 = vadd.f32 %v2533_v39, %v9961_v10  ;;  %v2535_v42 = vpop.f32.mrb[45].mxu1  ;;  %3557 = vmatprep.subr.bf16.mxu0 %v8278_v38  ;;  %v8311_v39 = vld [vmem:[%s10546_s20 + $0x1c4] ss:$16 sps:$4 sm:$0xff]  }
 0xbec   : > { %7059 = vmatprep.mubr.msk.bf16.mxu0 %vm2802_vm13, %v2633_v31  ;;  %v2536_v44 = vadd.f32 %v2535_v42, %v9964_v14  ;;  %v2537_v45 = vpop.f32.mrb[46].mxu1  ;;  %3456 = vmatprep.subr.bf16.mxu1 %v8311_v39  ;;  %v8317_v42 = vld [vmem:[%s10546_s20 + $0x1e0] ss:$16 sps:$4 sm:$0x1f]  }
 0xbed   : > { %2900 = vmatmul.mubr.bf16.gmra.mrb[72].mxu0 %v2632_v30  ;;  %v2582_v49 = vmax.f32 %v2534_v41, 0.0  ;;  %v2538_v53 = vadd.f32 %v2537_v45, %v9961_v10  ;;  %v2539_v13 = vpop.f32.mrb[47].mxu1  ;;  %v8315_v41 = vld [vmem:[%s10546_s20 + $0x1e4] ss:$16 sps:$4 sm:$0x1f]  }
 0xbee   : > { %v2583_v32 = vmax.f32 %v2536_v44, 0.0  ;;  %v2540_v33 = vadd.f32 %v2539_v13, %v9964_v14  ;;  %3558 = vmatpush1.bf16.msra.mxu0 %v8276_v40  ;;  %v8314_v40 = vld [vmem:[%s10546_s20 + $0x1cc] ss:$16 sps:$4 sm:$0xff]   ;;  %v3417_v44 = vsel %vm3415_vm14, %v8317_v42, 0  ;;  %v2640_v13 = vld [vmem:[#allocation18 + $0x11] sm:$0x3] }
 0xbef   : > { %v2584_v35 = vmax.f32 %v2538_v53, 0.0  ;;  %3559 = vmatprep.subr.bf16.mxu0 %v8284_v43  ;;  %v8318_v43 = vld [vmem:[%s10546_s20 + $0x1ec] ss:$16 sps:$4 sm:$0x1f]  }
 0xbf0   : > { %v2585_v37 = vmax.f32 %v2540_v33, 0.0  ;;  %v8320_v45 = vld [vmem:[%s10546_s20 + $0x1e8] ss:$16 sps:$4 sm:$0x1f]   ;;  %v10120_v33 = vrot.slane %v2640_v13, %v9618_v23 }
 0xbf1   : > { %v2634_v50 = vpack.c.bf16 %v2584_v35, %v2582_v49  ;;  %v3423_v49 = vsel %vm3415_vm14, %v8320_v45, 0  ;;  %v8321_v53 = vld [vmem:[#allocation13 + $0x108] sm:$0xff]  }
 0xbf2   : > { %v2635_v56 = vpack.c.bf16 %v2585_v37, %v2583_v32  ;;  %3560 = vmatpush1.bf16.msra.mxu0 %v8282_v34  ;;  %v2543_v15 = vpop.f32.mrb[48].mxu1  ;;  %v10117_v32 = vrot.slane %v2640_v13, %v9621_v25 }
 0xbf3   : > { %3561 = vmatprep.subr.bf16.mxu0 %v8290_v36  ;;  %v2544_v58 = vadd.f32 %v2543_v15, %v9961_v10  ;;  %v2545_v59 = vpop.f32.mrb[49].mxu1 }
 0xbf4   : > { %7060 = vmatprep.mubr.msk.bf16.mxu0 %vm2802_vm13, %v2635_v56  ;;  %v2546_v63 = vadd.f32 %v2545_v59, %v9964_v14  ;;  %v2547_v1 = vpop.f32.mrb[50].mxu1 }
 0xbf5   : > { %2910 = vmatmul.mubr.bf16.gmra.mrb[76].mxu0 %v2634_v50  ;;  %v2586_v3 = vmax.f32 %v2544_v58, 0.0  ;;  %v2548_v4 = vadd.f32 %v2547_v1, %v9961_v10  ;;  %v2549_v12 = vpop.f32.mrb[51].mxu1 }
 0xbf6   : > { %3562 = vmatpush1.bf16.msra.mxu0 %v8288_v51  ;;  %v2587_v5 = vmax.f32 %v2546_v63, 0.0  ;;  %v2550_v6 = vadd.f32 %v2549_v12, %v9964_v14 }
 0xbf7   : > { %3563 = vmatprep.subr.bf16.mxu0 %v8296_v8  ;;  %v2588_v16 = vmax.f32 %v2548_v4, 0.0  ;;  %v8329_v4 = vld [vmem:[#allocation13 + $0x148] sm:$0xff]  }
 0xbf8   : > { %v2589_v9 = vmax.f32 %v2550_v6, 0.0  ;;  %v8323_v6 = vld [vmem:[#allocation13 + $0x110] sm:$0xff]  }
 0xbf9   : > { %v2636_v61 = vpack.c.bf16 %v2588_v16, %v2586_v3  ;;  %v8322_v3 = vld [vmem:[#allocation13 + $0xc8] sm:$0xff]  }
 0xbfa   : > { %3564 = vmatpush1.bf16.msra.mxu0 %v8294_v62  ;;  %v2637_v47 = vpack.c.bf16 %v2589_v9, %v2587_v5  ;;  %v2553_v11 = vpop.f32.mrb[52].mxu1 }
 0xbfb   : > { %3565 = vmatprep.subr.bf16.mxu0 %v8302_v2  ;;  %v2554_v17 = vadd.f32 %v2553_v11, %v9961_v10  ;;  %v2555_v18 = vpop.f32.mrb[53].mxu1 }
 0xbfc   : > { %7061 = vmatprep.mubr.msk.bf16.mxu0 %vm2802_vm13, %v2637_v47  ;;  %v2556_v60 = vadd.f32 %v2555_v18, %v9964_v14  ;;  %v2557_v19 = vpop.f32.mrb[54].mxu1  ;;  %v8324_v47 = vld [vmem:[#allocation13 + $0xd0] sm:$0xff]   ;;  %v8325_v18 = vld [vmem:[#allocation13 + $0x118] sm:$0xff]  }
 0xbfd   : > { %2920 = vmatmul.mubr.bf16.gmra.mrb[80].mxu0 %v2636_v61  ;;  %v2590_v24 = vmax.f32 %v2554_v17, 0.0  ;;  %v2558_v26 = vadd.f32 %v2557_v19, %v9961_v10  ;;  %v2559_v27 = vpop.f32.mrb[55].mxu1  ;;  %v8309_v10 = vld [vmem:[%s10546_s20 + $0x1c0] ss:$16 sps:$4 sm:$0xff]  }
 0xbfe   : > { %3566 = vmatpush1.bf16.msra.mxu0 %v8300_v7  ;;  %v2591_v20 = vmax.f32 %v2556_v60, 0.0  ;;  %v2560_v28 = vadd.f32 %v2559_v27, %v9964_v14  ;;  %v8312_v14 = vld [vmem:[%s10546_s20 + $0x1c8] ss:$16 sps:$4 sm:$0xff]   ;;  %3457 = vmatpush1.bf16.msra.mxu1 %v8309_v10 }
 0xbff   : > { %3567 = vmatprep.subr.bf16.mxu0 %v8308_v46  ;;  %v2592_v38 = vmax.f32 %v2558_v26, 0.0  ;;  %7127 = vmatprep.subr.msk.bf16.mxu1 %vm3415_vm14, %v8315_v41 }
 0xc00   : > { %v2593_v29 = vmax.f32 %v2560_v28, 0.0  ;;  %v8333_v28 = vld [vmem:[#allocation13 + $0x158] sm:$0xff]  }
 0xc01   : > { %v2638_v30 = vpack.c.bf16 %v2592_v38, %v2590_v24 }
 0xc02   : > { %3568 = vmatpush1.bf16.msra.mxu0 %v8306_v48  ;;  %v2639_v31 = vpack.c.bf16 %v2593_v29, %v2591_v20  ;;  %3459 = vmatpush1.bf16.msra.mxu1 %v3417_v44  ;;  %v8332_v48 = vld [vmem:[#allocation13 + $0x150] sm:$0xff]   ;;  %v8326_v20 = vld [vmem:[#allocation13 + $0xd8] sm:$0xff]   ;;  %v8336_v44 = vld [vmem:[#allocation13 + $0x160] sm:$0xff]  }
 0xc03   : > { %3569 = vmatprep.subr.bf16.mxu0 %v8314_v40  ;;  %7459 = vmatprep.subr.bf16.mxu1 %v8321_v53 }
 0xc04   : > { %7062 = vmatprep.mubr.msk.bf16.mxu0 %vm2802_vm13, %v2639_v31 }
 0xc05   : > { %2930 = vmatmul.mubr.bf16.gmra.mrb[84].mxu0 %v2638_v30  ;;  %v8327_v30 = vld [vmem:[#allocation13 + $0x120] sm:$0xff]  }
 0xc06   : > { %3570 = vmatpush1.bf16.msra.mxu0 %v8312_v14 }
 0xc07   : > { %7136 = vmatprep.subr.msk.bf16.mxu0 %vm3415_vm14, %v8318_v43  ;;  %v8328_v43 = vld [vmem:[#allocation13 + $0xe0] sm:$0xff]  }
 0xc0a   : > { %3572 = vmatpush1.bf16.msra.mxu0 %v3423_v49  ;;  %v8330_v49 = vld [vmem:[#allocation13 + $0x128] sm:$0xff]  }
 0xc0b   : > { %4020 = vmatprep.subr.bf16.mxu0 %v8943_v22 }
 0xca0   : > { %v2861_v34 = vpop.f32.mrb[56].mxu0 }
 0xca1   : > { %v2862_v35 = vadd.f32 %v2861_v34, %v10117_v32  ;;  %v2863_v36 = vpop.f32.mrb[57].mxu0 }
 0xca2   : > { %v2864_v37 = vadd.f32 %v2863_v36, %v10120_v33  ;;  %v2865_v50 = vpop.f32.mrb[58].mxu0  ;;  %v8331_v36 = vld [vmem:[#allocation13 + $0xe8] sm:$0xff]  }
 0xca3   : > { %v2866_v56 = vadd.f32 %v2865_v50, %v10117_v32  ;;  %v2867_v51 = vpop.f32.mrb[59].mxu0  ;;  %v2940_v15 = vmax.f32 %v2862_v35, 0.0 }
 0xca4   : > { %v2868_v8 = vadd.f32 %v2867_v51, %v10120_v33  ;;  %v2941_v59 = vmax.f32 %v2864_v37, 0.0  ;;  %v8337_v37 = vld [vmem:[#allocation13 + $0x168] sm:$0xff]   ;;  %v8334_v51 = vld [vmem:[#allocation13 + $0x130] sm:$0xff]  }
 0xca5   : > { %v2942_v58 = vmax.f32 %v2866_v56, 0.0 }
 0xca6   : > { %v2943_v62 = vmax.f32 %v2868_v8, 0.0 }
 0xca7   : > { %v3036_v63 = vpack.c.bf16 %v2942_v58, %v2940_v15 }
 0xca8   : > { %v3037_v1 = vpack.c.bf16 %v2943_v62, %v2941_v59  ;;  %v2871_v2 = vpop.f32.mrb[60].mxu0 }
 0xca9   : > { %v2872_v12 = vadd.f32 %v2871_v2, %v10117_v32  ;;  %v2873_v5 = vpop.f32.mrb[61].mxu0  ;;  %v8335_v2 = vld [vmem:[#allocation13 + $0xf0] sm:$0xff]  }
 0xcaa   : > { %v2874_v16 = vadd.f32 %v2873_v5, %v10120_v33  ;;  %v2875_v7 = vpop.f32.mrb[62].mxu0  ;;  %7128 = vmatprep.mubr.msk.bf16.mxu1 %vm3390_vm15, %v3037_v1  ;;  %7137 = vmatprep.mubr.msk.bf16.mxu0 %vm3390_vm15, %v3037_v1 }
 0xcab   : > { %v2876_v9 = vadd.f32 %v2875_v7, %v10117_v32  ;;  %v2877_v46 = vpop.f32.mrb[63].mxu0  ;;  %3461 = vmatmul.mubr.bf16.vlgmr.msra.gmra.mrb[56].mxu1 %v3036_v63  ;;  %3574 = vmatmul.mubr.bf16.vlgmr.msra.gmra.mrb[88].mxu0 %v3036_v63  ;;  %v2944_v11 = vmax.f32 %v2872_v12, 0.0 }
 0xcac   : > { %v2878_v61 = vadd.f32 %v2877_v46, %v10120_v33  ;;  %7460 = vmatpush3.bf16.msra.mxu1 %v8322_v3  ;;  %4021 = vmatpush1.bf16.msra.mxu0 %v8329_v4  ;;  %v2945_v60 = vmax.f32 %v2874_v16, 0.0 }
 0xcad   : > { %v2946_v17 = vmax.f32 %v2876_v9, 0.0  ;;  %7461 = vmatprep.subr.bf16.mxu1 %v8323_v6  ;;  %4022 = vmatprep.subr.bf16.mxu0 %v8943_v22 }
 0xcae   : > { %v2947_v19 = vmax.f32 %v2878_v61, 0.0 }
 0xcaf   : > { %v3038_v24 = vpack.c.bf16 %v2946_v17, %v2944_v11 }
 0xcb0   : > { %v3039_v26 = vpack.c.bf16 %v2947_v19, %v2945_v60  ;;  %v2881_v27 = vpop.f32.mrb[64].mxu0  ;;  %7462 = vmatpush3.bf16.msra.mxu1 %v8324_v47  ;;  %4023 = vmatpush1.bf16.msra.mxu0 %v8332_v48 }
 0xcb1   : > { %v2882_v38 = vadd.f32 %v2881_v27, %v10117_v32  ;;  %v2883_v29 = vpop.f32.mrb[65].mxu0  ;;  %7463 = vmatprep.subr.bf16.mxu1 %v8325_v18  ;;  %4024 = vmatprep.subr.bf16.mxu0 %v8943_v22 }
 0xcb2   : > { %7129 = vmatprep.mubr.msk.bf16.mxu1 %vm3390_vm15, %v3039_v26  ;;  %7138 = vmatprep.mubr.msk.bf16.mxu0 %vm3390_vm15, %v3039_v26  ;;  %v2884_v31 = vadd.f32 %v2883_v29, %v10120_v33  ;;  %v2885_v39 = vpop.f32.mrb[66].mxu0 }
 0xcb3   : > { %3471 = vmatmul.mubr.bf16.gmra.mrb[60].mxu1 %v3038_v24  ;;  %3584 = vmatmul.mubr.bf16.gmra.mrb[92].mxu0 %v3038_v24  ;;  %v2948_v40 = vmax.f32 %v2882_v38, 0.0  ;;  %v2886_v10 = vadd.f32 %v2885_v39, %v10117_v32  ;;  %v2887_v14 = vpop.f32.mrb[67].mxu0 }
 0xcb4   : > { %v2949_v41 = vmax.f32 %v2884_v31, 0.0  ;;  %v2888_v42 = vadd.f32 %v2887_v14, %v10120_v33  ;;  %7464 = vmatpush3.bf16.msra.mxu1 %v8326_v20  ;;  %4025 = vmatpush1.bf16.msra.mxu0 %v8333_v28 }
 0xcb5   : > { %v2950_v45 = vmax.f32 %v2886_v10, 0.0  ;;  %7465 = vmatprep.subr.bf16.mxu1 %v8327_v30  ;;  %4026 = vmatprep.subr.bf16.mxu0 %v8943_v22 }
 0xcb6   : > { %v2951_v53 = vmax.f32 %v2888_v42, 0.0 }
 0xcb7   : > { %v3040_v13 = vpack.c.bf16 %v2950_v45, %v2948_v40 }
 0xcb8   : > { %v3041_v34 = vpack.c.bf16 %v2951_v53, %v2949_v41  ;;  %v2891_v35 = vpop.f32.mrb[68].mxu0  ;;  %7466 = vmatpush3.bf16.msra.mxu1 %v8328_v43  ;;  %4027 = vmatpush1.bf16.msra.mxu0 %v8336_v44 }
 0xcb9   : > { %v2892_v50 = vadd.f32 %v2891_v35, %v10117_v32  ;;  %v2893_v56 = vpop.f32.mrb[69].mxu0  ;;  %7467 = vmatprep.subr.bf16.mxu1 %v8330_v49  ;;  %4028 = vmatprep.subr.bf16.mxu0 %v8943_v22 }
 0xcba   : > { %7130 = vmatprep.mubr.msk.bf16.mxu1 %vm3390_vm15, %v3041_v34  ;;  %7139 = vmatprep.mubr.msk.bf16.mxu0 %vm3390_vm15, %v3041_v34  ;;  %v2894_v8 = vadd.f32 %v2893_v56, %v10120_v33  ;;  %v2895_v15 = vpop.f32.mrb[70].mxu0 }
 0xcbb   : > { %3481 = vmatmul.mubr.bf16.gmra.mrb[64].mxu1 %v3040_v13  ;;  %3594 = vmatmul.mubr.bf16.gmra.mrb[96].mxu0 %v3040_v13  ;;  %v2952_v58 = vmax.f32 %v2892_v50, 0.0  ;;  %v2896_v59 = vadd.f32 %v2895_v15, %v10117_v32  ;;  %v2897_v62 = vpop.f32.mrb[71].mxu0 }
 0xcbc   : > { %v2953_v63 = vmax.f32 %v2894_v8, 0.0  ;;  %v2898_v1 = vadd.f32 %v2897_v62, %v10120_v33  ;;  %7468 = vmatpush3.bf16.msra.mxu1 %v8331_v36  ;;  %4029 = vmatpush1.bf16.msra.mxu0 %v8337_v37 }
 0xcbd   : > { %v2954_v3 = vmax.f32 %v2896_v59, 0.0  ;;  %7469 = vmatprep.subr.bf16.mxu1 %v8334_v51  ;;  %4030 = vmatprep.subr.bf16.mxu0 %v8943_v22 }
 0xcbe   : > { %v2955_v4 = vmax.f32 %v2898_v1, 0.0 }
 0xcbf   : > { %v3042_v12 = vpack.c.bf16 %v2954_v3, %v2952_v58 }
 0xcc0   : > { %v3043_v5 = vpack.c.bf16 %v2955_v4, %v2953_v63  ;;  %v2901_v6 = vpop.f32.mrb[72].mxu0  ;;  %7470 = vmatpush3.bf16.msra.mxu1 %v8335_v2 }
 0xcc1   : > { %v2902_v16 = vadd.f32 %v2901_v6, %v10117_v32  ;;  %v2903_v7 = vpop.f32.mrb[73].mxu0 }
 0xcc2   : > { %7131 = vmatprep.mubr.msk.bf16.mxu1 %vm3390_vm15, %v3043_v5  ;;  %7140 = vmatprep.mubr.msk.bf16.mxu0 %vm3390_vm15, %v3043_v5  ;;  %v2904_v9 = vadd.f32 %v2903_v7, %v10120_v33  ;;  %v2905_v46 = vpop.f32.mrb[74].mxu0 }
 0xcc3   : > { %3491 = vmatmul.mubr.bf16.gmra.mrb[68].mxu1 %v3042_v12  ;;  %3604 = vmatmul.mubr.bf16.gmra.mrb[100].mxu0 %v3042_v12  ;;  %v2956_v61 = vmax.f32 %v2902_v16, 0.0  ;;  %v2906_v47 = vadd.f32 %v2905_v46, %v10117_v32  ;;  %v2907_v48 = vpop.f32.mrb[75].mxu0  ;;  %v8341_v46 = vld [vmem:[#allocation13 + $0x178] sm:$0xff]  }
 0xcc4   : > { %v2957_v11 = vmax.f32 %v2904_v9, 0.0  ;;  %v2908_v17 = vadd.f32 %v2907_v48, %v10120_v33  ;;  %v8340_v9 = vld [vmem:[#allocation13 + $0x170] sm:$0xff]   ;;  %v8343_v48 = vld [vmem:[#allocation13 + $0x100] sm:$0xff]  }
 0xcc5   : > { %v2958_v18 = vmax.f32 %v2906_v47, 0.0  ;;  %4031 = vmatpush1.bf16.msra.mxu0 %v8340_v9  ;;  %v8342_v47 = vld [vmem:[#allocation13 + $0x140] sm:$0xff]  }
 0xcc6   : > { %v2959_v60 = vmax.f32 %v2908_v17, 0.0  ;;  %4032 = vmatprep.subr.bf16.mxu0 %v8943_v22  ;;  %v8346_v17 = vld [vmem:[#allocation13 + $0x40] sm:$0xff]  }
 0xcc7   : > { %v3044_v19 = vpack.c.bf16 %v2958_v18, %v2956_v61  ;;  %v8339_v61 = vld [vmem:[#allocation13 + $0xf8] sm:$0xff]   ;;  %v3064_v18 = vsub.s32 2, %v9615_v21 }
 0xcc8   : > { %v3045_v24 = vpack.c.bf16 %v2959_v60, %v2957_v11  ;;  %v2911_v26 = vpop.f32.mrb[76].mxu0  ;;  %v8345_v11 = vld [vmem:[#allocation13 + $0x188] sm:$0xff]   ;;  %v3052_v60 = vld [vmem:[#allocation18 + $0x13] sm:$0xf] }
 0xcc9   : > { %v2912_v27 = vadd.f32 %v2911_v26, %v10117_v32  ;;  %v2913_v20 = vpop.f32.mrb[77].mxu0  ;;  %4033 = vmatpush1.bf16.msra.mxu0 %v8341_v46  ;;  %v10184_v26 = vrot.slane %v3052_v60, %v3064_v18 }
 0xcca   : > { %7132 = vmatprep.mubr.msk.bf16.mxu1 %vm3390_vm15, %v3045_v24  ;;  %7141 = vmatprep.mubr.msk.bf16.mxu0 %vm3390_vm15, %v3045_v24  ;;  %v2914_v28 = vadd.f32 %v2913_v20, %v10120_v33  ;;  %v2915_v38 = vpop.f32.mrb[78].mxu0  ;;  %v10182_v24 = vrot.slane %v3052_v60, %v9621_v25  ;;  %v10189_v20 = vrot.slane %v3052_v60, %v9618_v23 }
 0xccb   : > { %3501 = vmatmul.mubr.bf16.gmra.mrb[72].mxu1 %v3044_v19  ;;  %v2960_v29 = vmax.f32 %v2912_v27, 0.0  ;;  %3614 = vmatmul.mubr.bf16.gmra.mrb[104].mxu0 %v3044_v19  ;;  %v2916_v30 = vadd.f32 %v2915_v38, %v10117_v32  ;;  %v2917_v31 = vpop.f32.mrb[79].mxu0  ;;  %v3068_v19 = vsub.s32 3, %v9615_v21 }
 0xccc   : > { %v2961_v39 = vmax.f32 %v2914_v28, 0.0  ;;  %v2918_v40 = vadd.f32 %v2917_v31, %v10120_v33  ;;  %4034 = vmatprep.subr.bf16.mxu0 %v8943_v22 }
 0xccd   : > { %v2962_v10 = vmax.f32 %v2916_v30, 0.0  ;;  %v10186_v27 = vrot.slane %v3052_v60, %v3068_v19 }
 0xcce   : > { %v2963_v14 = vmax.f32 %v2918_v40, 0.0 }
 0xccf   : > { %v3046_v41 = vpack.c.bf16 %v2962_v10, %v2960_v29 }
 0xcd0   : > { %v3047_v42 = vpack.c.bf16 %v2963_v14, %v2961_v39  ;;  %v2921_v43 = vpop.f32.mrb[80].mxu0 }
 0xcd1   : > { %v2922_v44 = vadd.f32 %v2921_v43, %v10117_v32  ;;  %v2923_v45 = vpop.f32.mrb[81].mxu0 }
 0xcd2   : > { %7133 = vmatprep.mubr.msk.bf16.mxu1 %vm3390_vm15, %v3047_v42  ;;  %7142 = vmatprep.mubr.msk.bf16.mxu0 %vm3390_vm15, %v3047_v42  ;;  %v2924_v49 = vadd.f32 %v2923_v45, %v10120_v33  ;;  %v2925_v53 = vpop.f32.mrb[82].mxu0 }
 0xcd3   : > { %3511 = vmatmul.mubr.bf16.gmra.mrb[76].mxu1 %v3046_v41  ;;  %3624 = vmatmul.mubr.bf16.gmra.mrb[108].mxu0 %v3046_v41  ;;  %v2964_v13 = vmax.f32 %v2922_v44, 0.0  ;;  %v2926_v34 = vadd.f32 %v2925_v53, %v10117_v32  ;;  %v2927_v35 = vpop.f32.mrb[83].mxu0 }
 0xcd4   : > { %v2965_v36 = vmax.f32 %v2924_v49, 0.0  ;;  %v2928_v37 = vadd.f32 %v2927_v35, %v10120_v33 }
 0xcd5   : > { %v2966_v50 = vmax.f32 %v2926_v34, 0.0 }
 0xcd6   : > { %v2967_v56 = vmax.f32 %v2928_v37, 0.0 }
 0xcd7   : > { %v3048_v51 = vpack.c.bf16 %v2966_v50, %v2964_v13 }
 0xcd8   : > { %v3049_v8 = vpack.c.bf16 %v2967_v56, %v2965_v36  ;;  %v2931_v15 = vpop.f32.mrb[84].mxu0 }
 0xcd9   : > { %v2932_v58 = vadd.f32 %v2931_v15, %v10117_v32  ;;  %v2933_v59 = vpop.f32.mrb[85].mxu0 }
 0xcda   : > { %7134 = vmatprep.mubr.msk.bf16.mxu1 %vm3390_vm15, %v3049_v8  ;;  %7143 = vmatprep.mubr.msk.bf16.mxu0 %vm3390_vm15, %v3049_v8  ;;  %v2934_v62 = vadd.f32 %v2933_v59, %v10120_v33  ;;  %v2935_v63 = vpop.f32.mrb[86].mxu0 }
 0xcdb   : > { %3521 = vmatmul.mubr.bf16.gmra.mrb[80].mxu1 %v3048_v51  ;;  %3634 = vmatmul.mubr.bf16.gmra.mrb[112].mxu0 %v3048_v51  ;;  %v2968_v1 = vmax.f32 %v2932_v58, 0.0  ;;  %v2936_v2 = vadd.f32 %v2935_v63, %v10117_v32  ;;  %v2937_v3 = vpop.f32.mrb[87].mxu0  ;;  %v8338_v32 = vld [vmem:[#allocation13 + $0x138] sm:$0xff]  }
 0xcdc   : > { %v2969_v4 = vmax.f32 %v2934_v62, 0.0  ;;  %v2938_v12 = vadd.f32 %v2937_v3, %v10120_v33  ;;  %7471 = vmatprep.subr.bf16.mxu1 %v8338_v32  ;;  %v8344_v33 = vld [vmem:[#allocation13 + $0x180] sm:$0xff]  }
 0xcdd   : > { %v2970_v5 = vmax.f32 %v2936_v2, 0.0  ;;  %7472 = vmatpush3.bf16.msra.mxu1 %v8339_v61  ;;  %4035 = vmatpush1.bf16.msra.mxu0 %v8344_v33 }
 0xcde   : > { %v2971_v6 = vmax.f32 %v2938_v12, 0.0  ;;  %4036 = vmatprep.subr.bf16.mxu0 %v8943_v22  ;;  %7473 = vmatprep.subr.bf16.mxu1 %v8342_v47 }
 0xcdf   : > { %v3050_v16 = vpack.c.bf16 %v2970_v5, %v2968_v1 }
 0xce0   : > { %v3051_v7 = vpack.c.bf16 %v2971_v6, %v2969_v4 }
 0xce1   : > { %7474 = vmatpush3.bf16.msra.mxu1 %v8343_v48  ;;  %4037 = vmatpush1.bf16.msra.mxu0 %v8345_v11 }
 0xce2   : > { %7135 = vmatprep.mubr.msk.bf16.mxu1 %vm3390_vm15, %v3051_v7  ;;  %7144 = vmatprep.mubr.msk.bf16.mxu0 %vm3390_vm15, %v3051_v7 }
 0xce3   : > { %3531 = vmatmul.mubr.bf16.gmra.mrb[84].mxu1 %v3050_v16  ;;  %3644 = vmatmul.mubr.bf16.gmra.mrb[116].mxu0 %v3050_v16 }
 0xce4   : > { %4255 = vmatprep.subr.bf16.mxu0 %v8943_v22  ;;  %7481 = vmatprep.subr.bf16.mxu1 %v8346_v17 }
 0xd7e   : > { %v3462_v28 = vpop.f32.mrb[56].mxu1  ;;  %v3575_v38 = vpop.f32.mrb[88].mxu0 }
 0xd7f   : > { %v3463_v29 = vadd.f32 %v3462_v28, %v10182_v24  ;;  %v3576_v30 = vadd.f32 %v3575_v38, %v10184_v26  ;;  %v3464_v31 = vpop.f32.mrb[57].mxu1  ;;  %v3577_v39 = vpop.f32.mrb[89].mxu0 }
 0xd80   : > { %v3465_v21 = vadd.f32 %v3464_v31, %v10189_v20  ;;  %v3578_v25 = vadd.f32 %v3577_v39, %v10186_v27  ;;  %v3466_v40 = vpop.f32.mrb[58].mxu1  ;;  %v3579_v10 = vpop.f32.mrb[90].mxu0 }
 0xd81   : > { %v3467_v14 = vadd.f32 %v3466_v40, %v10182_v24  ;;  %v3580_v41 = vadd.f32 %v3579_v10, %v10184_v26  ;;  %v3468_v23 = vpop.f32.mrb[59].mxu1  ;;  %v3581_v42 = vpop.f32.mrb[91].mxu0  ;;  %v3654_v45 = vmax.f32 %v3463_v29, 0.0  ;;  %v3656_v49 = vmax.f32 %v3576_v30, 0.0  ;;  %v8347_v29 = vld [vmem:[#allocation13] sm:$0xff]  }
 0xd82   : > { %v3469_v43 = vadd.f32 %v3468_v23, %v10189_v20  ;;  %v3582_v44 = vadd.f32 %v3581_v42, %v10186_v27  ;;  %v3655_v34 = vmax.f32 %v3465_v21, 0.0  ;;  %v3657_v35 = vmax.f32 %v3578_v25, 0.0  ;;  %v8348_v30 = vld [vmem:[#allocation13 + $0x80] sm:$0xff]  }
 0xd83   : > { %v3658_v53 = vmax.f32 %v3467_v14, 0.0  ;;  %v3660_v13 = vmax.f32 %v3580_v41, 0.0  ;;  %v8349_v14 = vld [vmem:[#allocation13 + $0x48] sm:$0xff]  }
 0xd84   : > { %v3659_v36 = vmax.f32 %v3469_v43, 0.0  ;;  %v3661_v37 = vmax.f32 %v3582_v44, 0.0 }
 0xd85   : > { %v10199_v50 = vpack.c.bf16 %v3658_v53, %v3654_v45  ;;  %v10201_v56 = vpack.c.bf16 %v3660_v13, %v3656_v49 }
 0xd86   : > { %v3719_v51 = vpack.c.bf16 %v3659_v36, %v3655_v34  ;;  %v3721_v8 = vpack.c.bf16 %v3661_v37, %v3657_v35  ;;  %v3472_v15 = vpop.f32.mrb[60].mxu1  ;;  %v3585_v58 = vpop.f32.mrb[92].mxu0  ;;  %v8350_v35 = vld [vmem:[#allocation13 + $0x8] sm:$0xff]  }
 0xd87   : > { %v3473_v59 = vadd.f32 %v3472_v15, %v10182_v24  ;;  %v3586_v62 = vadd.f32 %v3585_v58, %v10184_v26  ;;  %v3474_v63 = vpop.f32.mrb[61].mxu1  ;;  %v3587_v1 = vpop.f32.mrb[93].mxu0  ;;  %v8351_v36 = vld [vmem:[#allocation13 + $0x88] sm:$0xff]  }
 0xd88   : > { %v3475_v2 = vadd.f32 %v3474_v63, %v10189_v20  ;;  %v3588_v3 = vadd.f32 %v3587_v1, %v10186_v27  ;;  %v3476_v4 = vpop.f32.mrb[62].mxu1  ;;  %v3589_v12 = vpop.f32.mrb[94].mxu0 }
 0xd89   : > { %v3477_v5 = vadd.f32 %v3476_v4, %v10182_v24  ;;  %v3590_v6 = vadd.f32 %v3589_v12, %v10184_v26  ;;  %v3478_v16 = vpop.f32.mrb[63].mxu1  ;;  %v3591_v7 = vpop.f32.mrb[95].mxu0  ;;  %v3662_v32 = vmax.f32 %v3473_v59, 0.0  ;;  %v3664_v61 = vmax.f32 %v3586_v62, 0.0  ;;  %v8352_v62 = vld [vmem:[#allocation13 + $0x50] sm:$0xff]  }
 0xd8a   : > { %v3479_v9 = vadd.f32 %v3478_v16, %v10189_v20  ;;  %v3592_v46 = vadd.f32 %v3591_v7, %v10186_v27  ;;  %v3663_v48 = vmax.f32 %v3475_v2, 0.0  ;;  %v3665_v11 = vmax.f32 %v3588_v3, 0.0 }
 0xd8b   : > { %v3666_v33 = vmax.f32 %v3477_v5, 0.0  ;;  %v3668_v47 = vmax.f32 %v3590_v6, 0.0  ;;  %v8353_v5 = vld [vmem:[#allocation13 + $0x10] sm:$0xff]  }
 0xd8c   : > { %v3667_v17 = vmax.f32 %v3479_v9, 0.0  ;;  %v3669_v18 = vmax.f32 %v3592_v46, 0.0  ;;  %v8354_v6 = vld [vmem:[#allocation13 + $0x90] sm:$0xff]   ;;  %v8355_v9 = vld [vmem:[#allocation13 + $0x58] sm:$0xff]  }
 0xd8d   : > { %v3772_v60 = vpack.c.bf16 %v3666_v33, %v3662_v32  ;;  %v3774_v19 = vpack.c.bf16 %v3668_v47, %v3664_v61 }
 0xd8e   : > { %v3773_v28 = vpack.c.bf16 %v3667_v17, %v3663_v48  ;;  %v3775_v38 = vpack.c.bf16 %v3669_v18, %v3665_v11  ;;  %v3482_v31 = vpop.f32.mrb[64].mxu1  ;;  %v3595_v39 = vpop.f32.mrb[96].mxu0 }
 0xd8f   : > { %v3483_v21 = vadd.f32 %v3482_v31, %v10182_v24  ;;  %v3596_v25 = vadd.f32 %v3595_v39, %v10184_v26  ;;  %v3484_v40 = vpop.f32.mrb[65].mxu1  ;;  %v3597_v10 = vpop.f32.mrb[97].mxu0  ;;  %v8357_v31 = vld [vmem:[#allocation13 + $0x98] sm:$0xff]  }
 0xd90   : > { %4011 = vmatprep.mubr.bf16.mxu1 %v3773_v28  ;;  %7170 = vmatprep.mubr.msk.bf16.mxu0 %vm2114_vm9, %v3775_v38  ;;  %v3485_v41 = vadd.f32 %v3484_v40, %v10189_v20  ;;  %v3598_v23 = vadd.f32 %v3597_v10, %v10186_v27  ;;  %v3486_v42 = vpop.f32.mrb[66].mxu1  ;;  %v3599_v43 = vpop.f32.mrb[98].mxu0  ;;  %v8358_v10 = vld [vmem:[#allocation13 + $0x60] sm:$0xff]  }
 0xd91   : > { %4012 = vmatmul.mubr.bf16.vlgmr.msra.gmra.mrb[88].mxu1 %v3772_v60  ;;  %4053 = vmatmul.mubr.bf16.vlgmr.msra.gmra.mrb[120].mxu0 %v3774_v19  ;;  %v3670_v44 = vmax.f32 %v3483_v21, 0.0  ;;  %v3672_v45 = vmax.f32 %v3596_v25, 0.0  ;;  %v3487_v49 = vadd.f32 %v3486_v42, %v10182_v24  ;;  %v3600_v53 = vadd.f32 %v3599_v43, %v10184_v26  ;;  %v3488_v13 = vpop.f32.mrb[67].mxu1  ;;  %v3601_v34 = vpop.f32.mrb[99].mxu0 }
 0xd92   : > { %7482 = vmatpush3.bf16.msra.mxu1 %v8347_v29  ;;  %4256 = vmatpush1.bf16.msra.mxu0 %v8348_v30  ;;  %v3671_v37 = vmax.f32 %v3485_v41, 0.0  ;;  %v3673_v15 = vmax.f32 %v3598_v23, 0.0  ;;  %v3489_v58 = vadd.f32 %v3488_v13, %v10189_v20  ;;  %v3602_v59 = vadd.f32 %v3601_v34, %v10186_v27  ;;  %v8356_v30 = vld [vmem:[#allocation13 + $0x18] sm:$0xff]  }
 0xd93   : > { %4246 = vmatprep.mubr.bf16.mxu1 %v3719_v51  ;;  %7196 = vmatprep.mubr.msk.bf16.mxu0 %vm2114_vm9, %v3721_v8  ;;  %v3674_v63 = vmax.f32 %v3487_v49, 0.0  ;;  %v3676_v1 = vmax.f32 %v3600_v53, 0.0  ;;  %v8360_v49 = vld [vmem:[#allocation13 + $0xa0] sm:$0xff]  }
 0xd94   : > { %7483 = vmatprep.subr.bf16.mxu1 %v8349_v14  ;;  %4257 = vmatprep.subr.bf16.mxu0 %v8943_v22  ;;  %v3675_v2 = vmax.f32 %v3489_v58, 0.0  ;;  %v3677_v3 = vmax.f32 %v3602_v59, 0.0 }
 0xd95   : > { %v10222_v4 = vpack.c.bf16 %v3674_v63, %v3670_v44  ;;  %v10224_v12 = vpack.c.bf16 %v3676_v1, %v3672_v45  ;;  %v8359_v45 = vld [vmem:[#allocation13 + $0x20] sm:$0xff]  }
 0xd96   : > { %7484 = vmatpush3.bf16.msra.mxu1 %v8350_v35  ;;  %4258 = vmatpush1.bf16.msra.mxu0 %v8351_v36  ;;  %v10226_v16 = vpack.c.bf16 %v3675_v2, %v3671_v37  ;;  %v10228_v51 = vpack.c.bf16 %v3677_v3, %v3673_v15  ;;  %v3492_v8 = vpop.f32.mrb[68].mxu1  ;;  %v3605_v7 = vpop.f32.mrb[100].mxu0  ;;  %v8361_v36 = vld [vmem:[#allocation13 + $0x68] sm:$0xff]  }
 0xd97   : > { %7485 = vmatprep.subr.bf16.mxu1 %v8352_v62  ;;  %4259 = vmatprep.subr.bf16.mxu0 %v8943_v22  ;;  %v3493_v46 = vadd.f32 %v3492_v8, %v10182_v24  ;;  %v3606_v32 = vadd.f32 %v3605_v7, %v10184_v26  ;;  %v3494_v61 = vpop.f32.mrb[69].mxu1  ;;  %v3607_v33 = vpop.f32.mrb[101].mxu0 }
 0xd98   : > { %v3495_v47 = vadd.f32 %v3494_v61, %v10189_v20  ;;  %v3608_v48 = vadd.f32 %v3607_v33, %v10186_v27  ;;  %v3496_v11 = vpop.f32.mrb[70].mxu1  ;;  %v3609_v17 = vpop.f32.mrb[102].mxu0 }
 0xd99   : > { %v3678_v18 = vmax.f32 %v3493_v46, 0.0  ;;  %v3680_v60 = vmax.f32 %v3606_v32, 0.0  ;;  %v3497_v19 = vadd.f32 %v3496_v11, %v10182_v24  ;;  %v3610_v28 = vadd.f32 %v3609_v17, %v10184_v26  ;;  %v3498_v38 = vpop.f32.mrb[71].mxu1  ;;  %v3611_v29 = vpop.f32.mrb[103].mxu0  ;;  %v8362_v46 = vld [vmem:[#allocation13 + $0x28] sm:$0xff]   ;;  %v8364_v11 = vld [vmem:[#allocation13 + $0x70] sm:$0xff]  }
 0xd9a   : > { %7486 = vmatpush3.bf16.msra.mxu1 %v8353_v5  ;;  %4260 = vmatpush1.bf16.msra.mxu0 %v8354_v6  ;;  %v3679_v39 = vmax.f32 %v3495_v47, 0.0  ;;  %v3681_v21 = vmax.f32 %v3608_v48, 0.0  ;;  %v3499_v25 = vadd.f32 %v3498_v38, %v10189_v20  ;;  %v3612_v40 = vadd.f32 %v3611_v29, %v10186_v27  ;;  %v8363_v32 = vld [vmem:[#allocation13 + $0xa8] sm:$0xff]   ;;  %v8365_v29 = vld [vmem:[#allocation13 + $0x30] sm:$0xff]  }
 0xd9b   : > { %7487 = vmatprep.subr.bf16.mxu1 %v8355_v9  ;;  %4261 = vmatprep.subr.bf16.mxu0 %v8943_v22  ;;  %v3682_v14 = vmax.f32 %v3497_v19, 0.0  ;;  %v3684_v41 = vmax.f32 %v3610_v28, 0.0 }
 0xd9c   : > { %v3683_v23 = vmax.f32 %v3499_v25, 0.0  ;;  %v3685_v42 = vmax.f32 %v3612_v40, 0.0  ;;  %v8367_v40 = vld [vmem:[#allocation13 + $0x78] sm:$0xff]  }
 0xd9d   : > { %v10240_v43 = vpack.c.bf16 %v3682_v14, %v3678_v18  ;;  %v10242_v44 = vpack.c.bf16 %v3684_v41, %v3680_v60 }
 0xd9e   : > { %7488 = vmatpush3.bf16.msra.mxu1 %v8356_v30  ;;  %4262 = vmatpush1.bf16.msra.mxu0 %v8357_v31  ;;  %v10244_v53 = vpack.c.bf16 %v3683_v23, %v3679_v39  ;;  %v10246_v13 = vpack.c.bf16 %v3685_v42, %v3681_v21  ;;  %v3502_v34 = vpop.f32.mrb[72].mxu1  ;;  %v3615_v35 = vpop.f32.mrb[104].mxu0  ;;  %v8366_v30 = vld [vmem:[#allocation13 + $0xb0] sm:$0xff]  }
 0xd9f   : > { %7489 = vmatprep.subr.bf16.mxu1 %v8358_v10  ;;  %4263 = vmatprep.subr.bf16.mxu0 %v8943_v22  ;;  %v3503_v37 = vadd.f32 %v3502_v34, %v10182_v24  ;;  %v3504_v15 = vpop.f32.mrb[73].mxu1  ;;  %v3616_v58 = vadd.f32 %v3615_v35, %v10184_v26  ;;  %v3617_v59 = vpop.f32.mrb[105].mxu0 }
 0xda0   : > { %v3505_v62 = vadd.f32 %v3504_v15, %v10189_v20  ;;  %v3506_v63 = vpop.f32.mrb[74].mxu1  ;;  %v3618_v1 = vadd.f32 %v3617_v59, %v10186_v27  ;;  %v3619_v2 = vpop.f32.mrb[106].mxu0 }
 0xda1   : > { %v3686_v3 = vmax.f32 %v3503_v37, 0.0  ;;  %v3507_v5 = vadd.f32 %v3506_v63, %v10182_v24  ;;  %v3508_v6 = vpop.f32.mrb[75].mxu1  ;;  %v3688_v8 = vmax.f32 %v3616_v58, 0.0  ;;  %v3620_v7 = vadd.f32 %v3619_v2, %v10184_v26  ;;  %v3621_v9 = vpop.f32.mrb[107].mxu0  ;;  %v8369_v63 = vld [vmem:[#allocation13 + $0xb8] sm:$0xff]  }
 0xda2   : > { %7490 = vmatpush3.bf16.msra.mxu1 %v8359_v45  ;;  %4264 = vmatpush1.bf16.msra.mxu0 %v8360_v49  ;;  %v3687_v61 = vmax.f32 %v3505_v62, 0.0  ;;  %v3509_v33 = vadd.f32 %v3508_v6, %v10189_v20  ;;  %v3689_v47 = vmax.f32 %v3618_v1, 0.0  ;;  %v3622_v48 = vadd.f32 %v3621_v9, %v10186_v27  ;;  %v8368_v62 = vld [vmem:[#allocation13 + $0x38] sm:$0xff]   ;;  %v8370_v6 = vld [vmem:[#allocation13 + $0x1d0] sm:$0xff]  }
 0xda3   : > { %7491 = vmatprep.subr.bf16.mxu1 %v8361_v36  ;;  %4265 = vmatprep.subr.bf16.mxu0 %v8943_v22  ;;  %v3690_v17 = vmax.f32 %v3507_v5, 0.0  ;;  %v3692_v18 = vmax.f32 %v3620_v7, 0.0 }
 0xda4   : > { %v3691_v60 = vmax.f32 %v3509_v33, 0.0  ;;  %v3693_v19 = vmax.f32 %v3622_v48, 0.0  ;;  %v8371_v33 = vld [vmem:[#allocation13 + $0xc0] sm:$0xff]  }
 0xda5   : > { %v10258_v28 = vpack.c.bf16 %v3690_v17, %v3686_v3  ;;  %v10260_v38 = vpack.c.bf16 %v3692_v18, %v3688_v8  ;;  %v8373_v17 = vld [vmem:[#allocation13 + $0x1d8] sm:$0xff]  }
 0xda6   : > { %7492 = vmatpush3.bf16.msra.mxu1 %v8362_v46  ;;  %4266 = vmatpush1.bf16.msra.mxu0 %v8363_v32  ;;  %v10262_v31 = vpack.c.bf16 %v3691_v60, %v3687_v61  ;;  %v10264_v39 = vpack.c.bf16 %v3693_v19, %v3689_v47  ;;  %v3512_v21 = vpop.f32.mrb[76].mxu1  ;;  %v3625_v25 = vpop.f32.mrb[108].mxu0  ;;  %v8372_v47 = vld [vmem:[#allocation13 + $0x190] sm:$0xff]   ;;  %v8374_v18 = vld [vmem:[#allocation13 + $0x198] sm:$0xff]   ;;  %v8376_v19 = vld [vmem:[#allocation13 + $0x1e0] sm:$0xff]  }
 0xda7   : > { %7493 = vmatprep.subr.bf16.mxu1 %v8364_v11  ;;  %4267 = vmatprep.subr.bf16.mxu0 %v8943_v22  ;;  %v3513_v10 = vadd.f32 %v3512_v21, %v10182_v24  ;;  %v3626_v14 = vadd.f32 %v3625_v25, %v10184_v26  ;;  %v3514_v41 = vpop.f32.mrb[77].mxu1  ;;  %v3627_v23 = vpop.f32.mrb[109].mxu0  ;;  %v8375_v60 = vld [vmem:[#allocation13 + $0x210] sm:$0xff]  }
 0xda8   : > { %v3515_v42 = vadd.f32 %v3514_v41, %v10189_v20  ;;  %v3628_v45 = vadd.f32 %v3627_v23, %v10186_v27  ;;  %v3516_v49 = vpop.f32.mrb[78].mxu1  ;;  %v3629_v34 = vpop.f32.mrb[110].mxu0 }
 0xda9   : > { %v3694_v35 = vmax.f32 %v3513_v10, 0.0  ;;  %v3696_v36 = vmax.f32 %v3626_v14, 0.0  ;;  %v3517_v37 = vadd.f32 %v3516_v49, %v10182_v24  ;;  %v3630_v15 = vadd.f32 %v3629_v34, %v10184_v26  ;;  %v3518_v58 = vpop.f32.mrb[79].mxu1  ;;  %v3631_v59 = vpop.f32.mrb[111].mxu0  ;;  %v8378_v10 = vld [vmem:[#allocation13 + $0x218] sm:$0xff]   ;;  %v8380_v34 = vld [vmem:[#allocation13 + $0x1a8] sm:$0xff]  }
 0xdaa   : > { %7494 = vmatpush3.bf16.msra.mxu1 %v8365_v29  ;;  %4268 = vmatpush1.bf16.msra.mxu0 %v8366_v30  ;;  %v3695_v1 = vmax.f32 %v3515_v42, 0.0  ;;  %v3697_v2 = vmax.f32 %v3628_v45, 0.0  ;;  %v3519_v3 = vadd.f32 %v3518_v58, %v10189_v20  ;;  %v3632_v5 = vadd.f32 %v3631_v59, %v10186_v27  ;;  %v8383_v58 = vld [vmem:[#allocation13 + $0x1b0] sm:$0xff]   ;;  %v8384_v59 = vld [vmem:[#allocation13 + $0x228] sm:$0xff]  }
 0xdab   : > { %7495 = vmatprep.subr.bf16.mxu1 %v8367_v40  ;;  %4269 = vmatprep.subr.bf16.mxu0 %v8943_v22  ;;  %v3698_v8 = vmax.f32 %v3517_v37, 0.0  ;;  %v3700_v7 = vmax.f32 %v3630_v15, 0.0  ;;  %v8382_v37 = vld [vmem:[#allocation13 + $0x1f0] sm:$0xff]  }
 0xdac   : > { %v3699_v9 = vmax.f32 %v3519_v3, 0.0  ;;  %v3701_v46 = vmax.f32 %v3632_v5, 0.0  ;;  %v8389_v5 = vld [vmem:[#allocation13 + $0x1c0] sm:$0xff]  }
 0xdad   : > { %v10276_v32 = vpack.c.bf16 %v3698_v8, %v3694_v35  ;;  %v10278_v61 = vpack.c.bf16 %v3700_v7, %v3696_v36  ;;  %v8381_v35 = vld [vmem:[#allocation13 + $0x220] sm:$0xff]   ;;  %v8391_v8 = vld [vmem:[#allocation13 + $0x208] sm:$0xff]  }
 0xdae   : > { %7496 = vmatpush3.bf16.msra.mxu1 %v8368_v62  ;;  %4270 = vmatpush1.bf16.msra.mxu0 %v8369_v63  ;;  %v10280_v48 = vpack.c.bf16 %v3699_v9, %v3695_v1  ;;  %v10282_v11 = vpack.c.bf16 %v3701_v46, %v3697_v2  ;;  %v3522_v29 = vpop.f32.mrb[80].mxu1  ;;  %v8386_v62 = vld [vmem:[#allocation13 + $0x1b8] sm:$0xff]   ;;  %v8387_v63 = vld [vmem:[#allocation13 + $0x230] sm:$0xff]   ;;  %v8388_v1 = vld [vmem:[#allocation13 + $0x200] sm:$0xff]   ;;  %v3635_v2 = vpop.f32.mrb[112].mxu0 }
 0xdaf   : > { %4271 = vmatprep.subr.bf16.mxu0 %v8943_v22  ;;  %7503 = vmatprep.subr.bf16.mxu1 %v8370_v6  ;;  %v3523_v30 = vadd.f32 %v3522_v29, %v10182_v24  ;;  %v3524_v21 = vpop.f32.mrb[81].mxu1  ;;  %v3636_v3 = vadd.f32 %v3635_v2, %v10184_v26  ;;  %v8390_v6 = vld [vmem:[#allocation13 + $0x238] sm:$0xff]   ;;  %v3637_v7 = vpop.f32.mrb[113].mxu0 }
 0xdb0   : > { %v3525_v25 = vadd.f32 %v3524_v21, %v10189_v20  ;;  %v3526_v40 = vpop.f32.mrb[82].mxu1  ;;  %v3638_v9 = vadd.f32 %v3637_v7, %v10186_v27  ;;  %v3639_v46 = vpop.f32.mrb[114].mxu0 }
 0xdb1   : > { %4247 = vmatmul.mubr.bf16.vlgmr.msra.gmra.mrb[92].mxu1 %v10199_v50  ;;  %v8377_v50 = vld [vmem:[#allocation13 + $0x1a0] sm:$0xff]   ;;  %v3702_v14 = vmax.f32 %v3523_v30, 0.0  ;;  %v3527_v41 = vadd.f32 %v3526_v40, %v10182_v24  ;;  %v3528_v23 = vpop.f32.mrb[83].mxu1  ;;  %v8394_v30 = vld [vmem:[#allocation13 + $0x298] sm:$0xff]  }
 0xdb2   : > { %4272 = vmatpush1.bf16.msra.mxu0 %v8371_v33  ;;  %7504 = vmatpush3.bf16.msra.mxu1 %v8372_v47  ;;  %v3703_v42 = vmax.f32 %v3525_v25, 0.0  ;;  %v3529_v45 = vadd.f32 %v3528_v23, %v10189_v20  ;;  %v3704_v33 = vmax.f32 %v3636_v3, 0.0  ;;  %v3640_v47 = vadd.f32 %v3639_v46, %v10184_v26  ;;  %v8398_v3 = vld [vmem:[#allocation13 + $0x250] sm:$0xff]   ;;  %v8401_v46 = vld [vmem:[#allocation13 + $0x360] sm:$0xff]  }
 0xdb3   : > { %7505 = vmatprep.subr.bf16.mxu1 %v8373_v17  ;;  %4544 = vmatprep.subr.bf16.mxu0 %v8943_v22  ;;  %v3641_v17 = vpop.f32.mrb[115].mxu0 }
 0xdb4   : > { %4535 = vmatprep.mubr.bf16.mxu1 %v10226_v16  ;;  %v8379_v16 = vld [vmem:[#allocation13 + $0x1e8] sm:$0xff]   ;;  %v3707_v49 = vmax.f32 %v3529_v45, 0.0  ;;  %v3642_v29 = vadd.f32 %v3641_v17, %v10186_v27  ;;  %v3708_v21 = vmax.f32 %v3640_v47, 0.0  ;;  %v8397_v45 = vld [vmem:[#allocation13 + $0x2a0] sm:$0xff]  }
 0xdb5   : > { %4288 = vmatmul.mubr.bf16.vlgmr.msra.gmra.mrb[124].mxu0 %v10201_v56  ;;  %v3706_v56 = vmax.f32 %v3527_v41, 0.0  ;;  %v8396_v41 = vld [vmem:[#allocation13 + $0x258] sm:$0xff]  }
 0xdb6   : > { %7506 = vmatpush3.bf16.msra.mxu1 %v8374_v18  ;;  %4545 = vmatpush1.bf16.msra.mxu0 %v8375_v60  ;;  %v10299_v15 = vpack.c.bf16 %v3707_v49, %v3703_v42  ;;  %v8392_v18 = vld [vmem:[#allocation13 + $0x1c8] sm:$0xff]   ;;  %v8393_v60 = vld [vmem:[#allocation13 + $0x240] sm:$0xff]   ;;  %v3709_v25 = vmax.f32 %v3642_v29, 0.0  ;;  %v10309_v40 = vpack.c.bf16 %v3708_v21, %v3704_v33  ;;  %v8404_v29 = vld [vmem:[#allocation13 + $0x2b0] sm:$0xff]  }
 0xdb7   : > { %7507 = vmatprep.subr.bf16.mxu1 %v8376_v19  ;;  %4546 = vmatprep.subr.bf16.mxu0 %v8943_v22  ;;  %v10296_v36 = vpack.c.bf16 %v3706_v56, %v3702_v14  ;;  %v3705_v19 = vmax.f32 %v3638_v9, 0.0  ;;  %v8395_v14 = vld [vmem:[#allocation13 + $0x248] sm:$0xff]  }
 0xdb8   : > { %7222 = vmatprep.mubr.msk.bf16.mxu0 %vm2114_vm9, %v10228_v51  ;;  %v8385_v51 = vld [vmem:[#allocation13 + $0x1f8] sm:$0xff]   ;;  %v8407_v21 = vld [vmem:[#allocation13 + $0x328] sm:$0xff]  }
 0xdb9   : > { %v10311_v23 = vpack.c.bf16 %v3709_v25, %v3705_v19  ;;  %v8408_v25 = vld [vmem:[#allocation13 + $0x2b8] sm:$0xff]  }
 0xdba   : > { %7508 = vmatpush3.bf16.msra.mxu1 %v8377_v50  ;;  %4547 = vmatpush1.bf16.msra.mxu0 %v8378_v10  ;;  %v3532_v50 = vpop.f32.mrb[84].mxu1  ;;  %v3645_v10 = vpop.f32.mrb[116].mxu0 }
 0xdbb   : > { %7509 = vmatprep.subr.bf16.mxu1 %v8379_v16  ;;  %4548 = vmatprep.subr.bf16.mxu0 %v8943_v22  ;;  %v3533_v16 = vadd.f32 %v3532_v50, %v10182_v24  ;;  %v3646_v42 = vadd.f32 %v3645_v10, %v10184_v26  ;;  %v3534_v56 = vpop.f32.mrb[85].mxu1  ;;  %v3647_v49 = vpop.f32.mrb[117].mxu0  ;;  %v8409_v50 = vld [vmem:[#allocation13 + $0x370] sm:$0xff]   ;;  %v8410_v10 = vld [vmem:[#allocation13 + $0x278] sm:$0xff]  }
 0xdbe   : > { %7510 = vmatpush3.bf16.msra.mxu1 %v8380_v34  ;;  %4549 = vmatpush1.bf16.msra.mxu0 %v8381_v35  ;;  %v3535_v34 = vadd.f32 %v3534_v56, %v10189_v20  ;;  %v3648_v35 = vadd.f32 %v3647_v49, %v10186_v27  ;;  %v8417_v56 = vld [vmem:[#allocation13 + $0x380] sm:$0xff]   ;;  %v8418_v49 = vld [vmem:[#allocation13 + $0x288] sm:$0xff]  }
 0xdbf   : > { %7511 = vmatprep.subr.bf16.mxu1 %v8382_v37  ;;  %4550 = vmatprep.subr.bf16.mxu0 %v8943_v22  ;;  %v3536_v37 = vpop.f32.mrb[86].mxu1 }
 0xdc2   : > { %7512 = vmatpush3.bf16.msra.mxu1 %v8383_v58  ;;  %4551 = vmatpush1.bf16.msra.mxu0 %v8384_v59  ;;  %v3649_v58 = vpop.f32.mrb[118].mxu0  ;;  %v3710_v59 = vmax.f32 %v3533_v16, 0.0  ;;  %v8413_v16 = vld [vmem:[#allocation13 + $0x378] sm:$0xff]  }
 0xdc3   : > { %7513 = vmatprep.subr.bf16.mxu1 %v8385_v51  ;;  %4552 = vmatprep.subr.bf16.mxu0 %v8943_v22  ;;  %v3712_v51 = vmax.f32 %v3646_v42, 0.0  ;;  %v3651_v2 = vpop.f32.mrb[119].mxu0  ;;  %v8415_v42 = vld [vmem:[#allocation13 + $0x338] sm:$0xff]  }
 0xdc4   : > { %v3652_v9 = vadd.f32 %v3651_v2, %v10186_v27  ;;  %v8429_v2 = vld [vmem:[#allocation13 + $0x358] sm:$0xff]  }
 0xdc6   : > { %7514 = vmatpush3.bf16.msra.mxu1 %v8386_v62  ;;  %4553 = vmatpush1.bf16.msra.mxu0 %v8387_v63  ;;  %v3537_v62 = vadd.f32 %v3536_v37, %v10182_v24  ;;  %v3650_v63 = vadd.f32 %v3649_v58, %v10184_v26  ;;  %v3717_v47 = vmax.f32 %v3652_v9, 0.0  ;;  %v8422_v37 = vld [vmem:[#allocation13 + $0x290] sm:$0xff]   ;;  %v8423_v58 = vld [vmem:[#allocation13 + $0x348] sm:$0xff]  }
 0xdc7   : > { %7515 = vmatprep.subr.bf16.mxu1 %v8388_v1  ;;  %4554 = vmatprep.subr.bf16.mxu0 %v8943_v22  ;;  %v3538_v1 = vpop.f32.mrb[87].mxu1  ;;  %v8438_v9 = vld [vmem:[#allocation13 + $0x308] sm:$0xff]  }
 0xdc8   : > { %v3539_v7 = vadd.f32 %v3538_v1, %v10189_v20  ;;  %v3714_v24 = vmax.f32 %v3537_v62, 0.0  ;;  %v3716_v33 = vmax.f32 %v3650_v63, 0.0  ;;  %v8402_v20 = vld [vmem:[#allocation13 + $0x268] sm:$0xff]   ;;  %v8426_v62 = vld [vmem:[#allocation13 + $0x350] sm:$0xff]   ;;  %v8427_v63 = vld [vmem:[#allocation13 + $0x398] sm:$0xff]  }
 0xdc9   : > { %v8428_v1 = vld [vmem:[#allocation13 + $0x2e0] sm:$0xff]  }
 0xdca   : > { %7516 = vmatpush3.bf16.msra.mxu1 %v8389_v5  ;;  %4555 = vmatpush1.bf16.msra.mxu0 %v8390_v6  ;;  %v8399_v5 = vld [vmem:[#allocation13 + $0x260] sm:$0xff]   ;;  %v3711_v6 = vmax.f32 %v3535_v34, 0.0  ;;  %v3715_v26 = vmax.f32 %v3539_v7, 0.0  ;;  %v10325_v17 = vpack.c.bf16 %v3714_v24, %v3710_v59  ;;  %v8420_v34 = vld [vmem:[#allocation13 + $0x2d0] sm:$0xff]   ;;  %v8437_v7 = vld [vmem:[#allocation13 + $0x3b8] sm:$0xff]  }
 0xdcb   : > { %7517 = vmatprep.subr.bf16.mxu1 %v8391_v8  ;;  %4556 = vmatprep.subr.bf16.mxu0 %v8943_v22  ;;  %v3713_v8 = vmax.f32 %v3648_v35, 0.0  ;;  %v8421_v35 = vld [vmem:[#allocation13 + $0x388] sm:$0xff]   ;;  %v8424_v59 = vld [vmem:[#allocation13 + $0x390] sm:$0xff]   ;;  %v8442_v24 = vld [vmem:[#allocation13 + $0x318] sm:$0xff]  }
 0xdcc   : > { %v10329_v27 = vpack.c.bf16 %v3715_v26, %v3711_v6  ;;  %v8434_v6 = vld [vmem:[#allocation13 + $0x2f8] sm:$0xff]   ;;  %v8444_v26 = vld [vmem:[#allocation13 + $0x428] sm:$0xff]  }
 0xdcd   : > { %v10331_v19 = vpack.c.bf16 %v3717_v47, %v3713_v8  ;;  %v8435_v8 = vld [vmem:[#allocation13 + $0x3b0] sm:$0xff]   ;;  %v8446_v47 = vld [vmem:[#allocation13 + $0x3e8] sm:$0xff]  }
 0xdce   : > { %7518 = vmatpush3.bf16.msra.mxu1 %v8392_v18  ;;  %4557 = vmatpush1.bf16.msra.mxu0 %v8393_v60  ;;  %v10327_v18 = vpack.c.bf16 %v3716_v33, %v3712_v51  ;;  %v8403_v60 = vld [vmem:[#allocation13 + $0x320] sm:$0xff]   ;;  %v8425_v51 = vld [vmem:[#allocation13 + $0x2d8] sm:$0xff]   ;;  %v8443_v33 = vld [vmem:[#allocation13 + $0x3d0] sm:$0xff]  }
 0xdcf   : > { %4558 = vmatprep.subr.bf16.mxu0 %v8943_v22  ;;  %7525 = vmatprep.subr.bf16.mxu1 %v8394_v30  ;;  %v8405_v30 = vld [vmem:[#allocation13 + $0x368] sm:$0xff]  }
 0xdd1   : > { %4536 = vmatmul.mubr.bf16.vlgmr.msra.gmra.mrb[96].mxu1 %v10222_v4  ;;  %v8400_v4 = vld [vmem:[#allocation13 + $0x2a8] sm:$0xff]  }
 0xdd2   : > { %4559 = vmatpush1.bf16.msra.mxu0 %v8395_v14  ;;  %7526 = vmatpush3.bf16.msra.mxu1 %v8396_v41  ;;  %v8411_v14 = vld [vmem:[#allocation13 + $0x330] sm:$0xff]   ;;  %v8412_v41 = vld [vmem:[#allocation13 + $0x2c0] sm:$0xff]  }
 0xdd3   : > { %4560 = vmatprep.subr.bf16.mxu0 %v8943_v22  ;;  %7527 = vmatprep.subr.bf16.mxu1 %v8397_v45  ;;  %v8416_v45 = vld [vmem:[#allocation13 + $0x2c8] sm:$0xff]  }
 0xdd4   : > { %4826 = vmatprep.mubr.bf16.mxu1 %v10244_v53  ;;  %v8406_v53 = vld [vmem:[#allocation13 + $0x270] sm:$0xff]  }
 0xdd6   : > { %4561 = vmatpush1.bf16.msra.mxu0 %v8398_v3  ;;  %7528 = vmatpush3.bf16.msra.mxu1 %v8399_v5  ;;  %v8430_v3 = vld [vmem:[#allocation13 + $0x2e8] sm:$0xff]   ;;  %v8431_v5 = vld [vmem:[#allocation13 + $0x3a0] sm:$0xff]  }
 0xdd7   : > { %7529 = vmatprep.subr.bf16.mxu1 %v8400_v4  ;;  %7547 = vmatprep.subr.bf16.mxu0 %v8401_v46  ;;  %v8440_v4 = vld [vmem:[#allocation13 + $0x310] sm:$0xff]   ;;  %v8441_v46 = vld [vmem:[#allocation13 + $0x3c8] sm:$0xff]  }
 0xdd9   : > { %4577 = vmatmul.mubr.bf16.vlgmr.msra.gmra.mrb[128].mxu0 %v10224_v12  ;;  %v8414_v12 = vld [vmem:[#allocation13 + $0x280] sm:$0xff]  }
 0xdda   : > { %7530 = vmatpush3.bf16.msra.mxu1 %v8402_v20  ;;  %7548 = vmatpush3.bf16.msra.mxu0 %v8403_v60  ;;  %v8445_v20 = vld [vmem:[#allocation13 + $0x3d8] sm:$0xff]   ;;  %v8447_v60 = vld [vmem:[#allocation13 + $0x430] sm:$0xff]  }
 0xddb   : > { %7531 = vmatprep.subr.bf16.mxu1 %v8404_v29  ;;  %7549 = vmatprep.subr.bf16.mxu0 %v8405_v30  ;;  %v8449_v29 = vld [vmem:[#allocation13 + $0x3f0] sm:$0xff]   ;;  %v8448_v30 = vld [vmem:[#allocation13 + $0x3e0] sm:$0xff]  }
 0xddc   : > { %5117 = vmatprep.mubr.bf16.mxu0 %v10262_v31  ;;  %v8419_v31 = vld [vmem:[#allocation13 + $0x340] sm:$0xff]  }
 0xdde   : > { %7532 = vmatpush3.bf16.msra.mxu1 %v8406_v53  ;;  %7550 = vmatpush3.bf16.msra.mxu0 %v8407_v21  ;;  %v8450_v53 = vld [vmem:[#allocation13 + $0x438] sm:$0xff]   ;;  %v8451_v21 = vld [vmem:[#allocation13 + $0x4f0] sm:$0xff]  }
 0xddf   : > { %7533 = vmatprep.subr.bf16.mxu1 %v8408_v25  ;;  %7551 = vmatprep.subr.bf16.mxu0 %v8409_v50  ;;  %v8452_v25 = vld [vmem:[#allocation13 + $0x3f8] sm:$0xff]   ;;  %v8453_v50 = vld [vmem:[#allocation13 + $0x4b0] sm:$0xff]  }
 0xde2   : > { %7534 = vmatpush3.bf16.msra.mxu1 %v8410_v10  ;;  %7552 = vmatpush3.bf16.msra.mxu0 %v8411_v14  ;;  %v8454_v10 = vld [vmem:[#allocation13 + $0x440] sm:$0xff]   ;;  %v8455_v14 = vld [vmem:[#allocation13 + $0x4f8] sm:$0xff]  }
 0xde3   : > { %7535 = vmatprep.subr.bf16.mxu1 %v8412_v41  ;;  %7553 = vmatprep.subr.bf16.mxu0 %v8413_v16  ;;  %v8458_v41 = vld [vmem:[#allocation13 + $0x448] sm:$0xff]   ;;  %v8459_v16 = vld [vmem:[#allocation13 + $0x500] sm:$0xff]  }
 0xde6   : > { %7536 = vmatpush3.bf16.msra.mxu1 %v8414_v12  ;;  %7554 = vmatpush3.bf16.msra.mxu0 %v8415_v42  ;;  %v8460_v12 = vld [vmem:[#allocation13 + $0x408] sm:$0xff]   ;;  %v8461_v42 = vld [vmem:[#allocation13 + $0x4c0] sm:$0xff]  }
 0xde7   : > { %7537 = vmatprep.subr.bf16.mxu1 %v8416_v45  ;;  %7555 = vmatprep.subr.bf16.mxu0 %v8417_v56  ;;  %v8462_v45 = vld [vmem:[#allocation13 + $0x450] sm:$0xff]   ;;  %v8463_v56 = vld [vmem:[#allocation13 + $0x508] sm:$0xff]  }
 0xdea   : > { %7538 = vmatpush3.bf16.msra.mxu1 %v8418_v49  ;;  %7556 = vmatpush3.bf16.msra.mxu0 %v8419_v31  ;;  %v8465_v49 = vld [vmem:[#allocation13 + $0x4c8] sm:$0xff]   ;;  %v8466_v31 = vld [vmem:[#allocation13 + $0x458] sm:$0xff]  }
 0xdeb   : > { %7539 = vmatprep.subr.bf16.mxu1 %v8420_v34  ;;  %7557 = vmatprep.subr.bf16.mxu0 %v8421_v35  ;;  %v8467_v34 = vld [vmem:[#allocation13 + $0x510] sm:$0xff]   ;;  %v8468_v35 = vld [vmem:[#allocation13 + $0x418] sm:$0xff]  }
 0xdee   : > { %7540 = vmatpush3.bf16.msra.mxu1 %v8422_v37  ;;  %7558 = vmatpush3.bf16.msra.mxu0 %v8423_v58  ;;  %v8470_v37 = vld [vmem:[#allocation13 + $0x460] sm:$0xff]   ;;  %v8471_v58 = vld [vmem:[#allocation13 + $0x518] sm:$0xff]  }
 0xdef   : > { %4835 = vmatprep.subr.bf16.mxu1 %v8943_v22  ;;  %7559 = vmatprep.subr.bf16.mxu0 %v8424_v59  ;;  %v8472_v59 = vld [vmem:[#allocation13 + $0x420] sm:$0xff]  }
 0xdf1   : > { %4827 = vmatmul.mubr.bf16.vlgmr.msra.gmra.mrb[100].mxu1 %v10240_v43  ;;  %v8432_v43 = vld [vmem:[#allocation13 + $0x2f0] sm:$0xff]  }
 0xdf2   : > { %4836 = vmatpush1.bf16.msra.mxu1 %v8425_v51  ;;  %7248 = vmatprep.mubr.msk.bf16.mxu1 %vm2114_vm9, %v10246_v13  ;;  %v8433_v13 = vld [vmem:[#allocation13 + $0x3a8] sm:$0xff]   ;;  %v8473_v51 = vld [vmem:[#allocation13 + $0x4d8] sm:$0xff]  }
 0xdf3   : > { %7560 = vmatpush3.bf16.msra.mxu0 %v8426_v62  ;;  %4837 = vmatprep.subr.bf16.mxu1 %v8943_v22  ;;  %v8474_v62 = vld [vmem:[#allocation13 + $0x520] sm:$0xff]  }
 0xdf4   : > { %7561 = vmatprep.subr.bf16.mxu0 %v8427_v63  ;;  %v8475_v63 = vld [vmem:[#allocation13 + $0x468] sm:$0xff]  }
 0xdf6   : > { %4838 = vmatpush1.bf16.msra.mxu1 %v8428_v1  ;;  %v8476_v1 = vld [vmem:[#allocation13 + $0x4e0] sm:$0xff]  }
 0xdf7   : > { %7562 = vmatpush3.bf16.msra.mxu0 %v8429_v2  ;;  %4839 = vmatprep.subr.bf16.mxu1 %v8943_v22  ;;  %v8477_v2 = vld [vmem:[#allocation13 + $0x528] sm:$0xff]  }
 0xdf8   : > { %5126 = vmatprep.subr.bf16.mxu0 %v8943_v22 }
 0xdfa   : > { %4840 = vmatpush1.bf16.msra.mxu1 %v8430_v3  ;;  %5118 = vmatmul.mubr.bf16.vlgmr.msra.gmra.mrb[132].mxu0 %v10258_v28  ;;  %v8436_v28 = vld [vmem:[#allocation13 + $0x300] sm:$0xff]   ;;  %v8478_v3 = vld [vmem:[#allocation13 + $0x470] sm:$0xff]  }
 0xdfb   : > { %5127 = vmatpush1.bf16.msra.mxu0 %v8431_v5  ;;  %4841 = vmatprep.subr.bf16.mxu1 %v8943_v22  ;;  %v8479_v5 = vld [vmem:[#allocation13 + $0x4e8] sm:$0xff]  }
 0xdfc   : > { %5128 = vmatprep.subr.bf16.mxu0 %v8943_v22  ;;  %7274 = vmatprep.mubr.msk.bf16.mxu0 %vm2114_vm9, %v10264_v39  ;;  %v8439_v39 = vld [vmem:[#allocation13 + $0x3c0] sm:$0xff]  }
 0xdfe   : > { %4842 = vmatpush1.bf16.msra.mxu1 %v8432_v43  ;;  %v8480_v43 = vld [vmem:[#allocation13 + $0x478] sm:$0xff]  }
 0xdff   : > { %5129 = vmatpush1.bf16.msra.mxu0 %v8433_v13  ;;  %4843 = vmatprep.subr.bf16.mxu1 %v8943_v22  ;;  %v8481_v13 = vld [vmem:[#allocation13 + $0x530] sm:$0xff]  }
 0xe00   : > { %5130 = vmatprep.subr.bf16.mxu0 %v8943_v22 }
 0xe02   : > { %4844 = vmatpush1.bf16.msra.mxu1 %v8434_v6  ;;  %v8484_v6 = vld [vmem:[#allocation13 + $0x488] sm:$0xff]  }
 0xe03   : > { %5131 = vmatpush1.bf16.msra.mxu0 %v8435_v8  ;;  %4845 = vmatprep.subr.bf16.mxu1 %v8943_v22  ;;  %v8485_v8 = vld [vmem:[#allocation13 + $0x540] sm:$0xff]  }
 0xe04   : > { %5132 = vmatprep.subr.bf16.mxu0 %v8943_v22 }
 0xe06   : > { %4846 = vmatpush1.bf16.msra.mxu1 %v8436_v28  ;;  %v8487_v28 = vld [vmem:[#allocation13 + $0x548] sm:$0xff]  }
 0xe07   : > { %5133 = vmatpush1.bf16.msra.mxu0 %v8437_v7  ;;  %4847 = vmatprep.subr.bf16.mxu1 %v8943_v22  ;;  %v8488_v7 = vld [vmem:[#allocation13 + $0x498] sm:$0xff]  }
 0xe08   : > { %5134 = vmatprep.subr.bf16.mxu0 %v8943_v22 }
 0xe0a   : > { %4848 = vmatpush1.bf16.msra.mxu1 %v8438_v9  ;;  %v8490_v9 = vld [vmem:[#allocation13 + $0x4a0] sm:$0xff]  }
 0xe0b   : > { %5135 = vmatpush1.bf16.msra.mxu0 %v8439_v39  ;;  %4849 = vmatprep.subr.bf16.mxu1 %v8943_v22  ;;  %v8491_v39 = vld [vmem:[#allocation13 + $0x558] sm:$0xff]  }
 0xe0c   : > { %5136 = vmatprep.subr.bf16.mxu0 %v8943_v22 }
 0xe0e   : > { %4850 = vmatpush1.bf16.msra.mxu1 %v8440_v4  ;;  %v8492_v4 = vld [vmem:[#allocation13 + $0x4a8] sm:$0xff]  }
 0xe0f   : > { %5137 = vmatpush1.bf16.msra.mxu0 %v8441_v46  ;;  %4851 = vmatprep.subr.bf16.mxu1 %v8943_v22  ;;  %v8493_v46 = vld [vmem:[#allocation13 + $0x560] sm:$0xff]  }
 0xe10   : > { %5138 = vmatprep.subr.bf16.mxu0 %v8943_v22 }
 0xe12   : > { %4852 = vmatpush1.bf16.msra.mxu1 %v8442_v24  ;;  %v8494_v24 = vld [vmem:[#allocation13 + $0x5b8] sm:$0xff]  }
 0xe13   : > { %5139 = vmatpush1.bf16.msra.mxu0 %v8443_v33  ;;  %7569 = vmatprep.subr.bf16.mxu1 %v8444_v26  ;;  %v8496_v33 = vld [vmem:[#allocation13 + $0x578] sm:$0xff]   ;;  %v8495_v26 = vld [vmem:[#allocation13 + $0x568] sm:$0xff]  }
 0xe14   : > { %5140 = vmatprep.subr.bf16.mxu0 %v8943_v22 }
 0xe15   : > { %4868 = vmatmul.mubr.bf16.vlgmr.msra.gmra.mrb[104].mxu1 %v10242_v44  ;;  %v8456_v44 = vld [vmem:[#allocation13 + $0x400] sm:$0xff]  }
 0xe16   : > { %7570 = vmatpush3.bf16.msra.mxu1 %v8446_v47  ;;  %5408 = vmatprep.mubr.bf16.mxu1 %v10280_v48  ;;  %v8457_v48 = vld [vmem:[#allocation13 + $0x4b8] sm:$0xff]   ;;  %v8497_v47 = vld [vmem:[#allocation13 + $0x5c0] sm:$0xff]  }
 0xe17   : > { %5141 = vmatpush1.bf16.msra.mxu0 %v8445_v20  ;;  %7571 = vmatprep.subr.bf16.mxu1 %v8447_v60  ;;  %v8499_v20 = vld [vmem:[#allocation13 + $0x580] sm:$0xff]   ;;  %v8498_v60 = vld [vmem:[#allocation13 + $0x570] sm:$0xff]  }
 0xe18   : > { %5142 = vmatprep.subr.bf16.mxu0 %v8943_v22 }
 0xe1a   : > { %7572 = vmatpush3.bf16.msra.mxu1 %v8449_v29  ;;  %v8500_v29 = vld [vmem:[#allocation13 + $0x5c8] sm:$0xff]  }
 0xe1b   : > { %5143 = vmatpush1.bf16.msra.mxu0 %v8448_v30  ;;  %7573 = vmatprep.subr.bf16.mxu1 %v8450_v53  ;;  %v8501_v30 = vld [vmem:[#allocation13 + $0x588] sm:$0xff]   ;;  %v8502_v53 = vld [vmem:[#allocation13 + $0x5d0] sm:$0xff]  }
 0xe1c   : > { %7591 = vmatprep.subr.bf16.mxu0 %v8451_v21 }
 0xe1e   : > { %5159 = vmatmul.mubr.bf16.vlgmr.msra.gmra.mrb[136].mxu0 %v10260_v38  ;;  %7574 = vmatpush3.bf16.msra.mxu1 %v8452_v25  ;;  %v8464_v38 = vld [vmem:[#allocation13 + $0x410] sm:$0xff]  }
 0xe1f   : > { %7592 = vmatpush3.bf16.msra.mxu0 %v8453_v50  ;;  %7575 = vmatprep.subr.bf16.mxu1 %v8454_v10 }
 0xe20   : > { %7593 = vmatprep.subr.bf16.mxu0 %v8455_v14  ;;  %5699 = vmatprep.mubr.bf16.mxu0 %v10299_v15  ;;  %v8469_v15 = vld [vmem:[#allocation13 + $0x4d0] sm:$0xff]  }
 0xe22   : > { %7576 = vmatpush3.bf16.msra.mxu1 %v8456_v44 }
 0xe23   : > { %7594 = vmatpush3.bf16.msra.mxu0 %v8457_v48  ;;  %7577 = vmatprep.subr.bf16.mxu1 %v8458_v41  ;;  %v8505_v41 = vld [vmem:[#allocation13 + $0x598] sm:$0xff]  }
 0xe24   : > { %7595 = vmatprep.subr.bf16.mxu0 %v8459_v16 }
 0xe26   : > { %7578 = vmatpush3.bf16.msra.mxu1 %v8460_v12 }
 0xe27   : > { %7596 = vmatpush3.bf16.msra.mxu0 %v8461_v42  ;;  %7579 = vmatprep.subr.bf16.mxu1 %v8462_v45 }
 0xe28   : > { %7597 = vmatprep.subr.bf16.mxu0 %v8463_v56 }
 0xe2a   : > { %7580 = vmatpush3.bf16.msra.mxu1 %v8464_v38  ;;  %v8507_v38 = vld [vmem:[#allocation13 + $0x5a0] sm:$0xff]  }
 0xe2b   : > { %7598 = vmatpush3.bf16.msra.mxu0 %v8465_v49  ;;  %7581 = vmatprep.subr.bf16.mxu1 %v8466_v31  ;;  %v8508_v49 = vld [vmem:[#allocation13 + $0x5e8] sm:$0xff]  }
 0xe2c   : > { %7599 = vmatprep.subr.bf16.mxu0 %v8467_v34  ;;  %v8509_v31 = vld [vmem:[#allocation13 + $0x5a8] sm:$0xff]   ;;  %v8510_v34 = vld [vmem:[#allocation13 + $0x5f0] sm:$0xff]  }
 0xe2e   : > { %7582 = vmatpush3.bf16.msra.mxu1 %v8468_v35  ;;  %v8511_v35 = vld [vmem:[#allocation13 + $0x5b0] sm:$0xff]  }
 0xe2f   : > { %7600 = vmatpush3.bf16.msra.mxu0 %v8469_v15  ;;  %7583 = vmatprep.subr.bf16.mxu1 %v8470_v37  ;;  %v8512_v15 = vld [vmem:[#allocation13 + $0x5f8] sm:$0xff]   ;;  %v8513_v37 = vld [vmem:[#allocation13 + $0x600] sm:$0xff]  }
 0xe30   : > { %7601 = vmatprep.subr.bf16.mxu0 %v8471_v58  ;;  %v8514_v58 = vld [vmem:[#allocation13 + $0x608] sm:$0xff]  }
 0xe32   : > { %7584 = vmatpush3.bf16.msra.mxu1 %v8472_v59  ;;  %v8515_v59 = vld [vmem:[#allocation13 + $0x610] sm:$0xff]  }
 0xe33   : > { %7602 = vmatpush3.bf16.msra.mxu0 %v8473_v51  ;;  %5417 = vmatprep.subr.bf16.mxu1 %v8943_v22 }
 0xe34   : > { %7603 = vmatprep.subr.bf16.mxu0 %v8474_v62 }
 0xe35   : > { %5409 = vmatmul.mubr.bf16.vlgmr.msra.gmra.mrb[108].mxu1 %v10276_v32  ;;  %v8482_v32 = vld [vmem:[#allocation13 + $0x480] sm:$0xff]  }
 0xe36   : > { %5418 = vmatpush1.bf16.msra.mxu1 %v8475_v63  ;;  %7300 = vmatprep.mubr.msk.bf16.mxu1 %vm2114_vm9, %v10282_v11  ;;  %v8483_v11 = vld [vmem:[#allocation13 + $0x538] sm:$0xff]  }
 0xe37   : > { %7604 = vmatpush3.bf16.msra.mxu0 %v8476_v1  ;;  %5419 = vmatprep.subr.bf16.mxu1 %v8943_v22 }
 0xe38   : > { %7605 = vmatprep.subr.bf16.mxu0 %v8477_v2 }
 0xe3a   : > { %5420 = vmatpush1.bf16.msra.mxu1 %v8478_v3 }
 0xe3b   : > { %7606 = vmatpush3.bf16.msra.mxu0 %v8479_v5  ;;  %5421 = vmatprep.subr.bf16.mxu1 %v8943_v22 }
 0xe3c   : > { %5708 = vmatprep.subr.bf16.mxu0 %v8943_v22 }
 0xe3e   : > { %5422 = vmatpush1.bf16.msra.mxu1 %v8480_v43  ;;  %5700 = vmatmul.mubr.bf16.vlgmr.msra.gmra.mrb[140].mxu0 %v10296_v36  ;;  %v8486_v36 = vld [vmem:[#allocation13 + $0x490] sm:$0xff]  }
 0xe3f   : > { %5709 = vmatpush1.bf16.msra.mxu0 %v8481_v13  ;;  %5423 = vmatprep.subr.bf16.mxu1 %v8943_v22 }
 0xe40   : > { %5710 = vmatprep.subr.bf16.mxu0 %v8943_v22  ;;  %7326 = vmatprep.mubr.msk.bf16.mxu0 %vm2114_vm9, %v10311_v23  ;;  %v8489_v23 = vld [vmem:[#allocation13 + $0x550] sm:$0xff]  }
 0xe42   : > { %5424 = vmatpush1.bf16.msra.mxu1 %v8482_v32 }
 0xe43   : > { %5711 = vmatpush1.bf16.msra.mxu0 %v8483_v11  ;;  %5425 = vmatprep.subr.bf16.mxu1 %v8943_v22 }
 0xe44   : > { %5712 = vmatprep.subr.bf16.mxu0 %v8943_v22 }
 0xe46   : > { %5426 = vmatpush1.bf16.msra.mxu1 %v8484_v6  ;;  %v8517_v6 = vld [vmem:[#allocation13 + $0x620] sm:$0xff]  }
 0xe47   : > { %5713 = vmatpush1.bf16.msra.mxu0 %v8485_v8  ;;  %5427 = vmatprep.subr.bf16.mxu1 %v8943_v22 }
 0xe48   : > { %5714 = vmatprep.subr.bf16.mxu0 %v8943_v22 }
 0xe4a   : > { %5428 = vmatpush1.bf16.msra.mxu1 %v8486_v36 }
 0xe4b   : > { %5715 = vmatpush1.bf16.msra.mxu0 %v8487_v28  ;;  %5429 = vmatprep.subr.bf16.mxu1 %v8943_v22  ;;  %v8518_v28 = vld [vmem:[#allocation13 + $0x628] sm:$0xff]  }
 0xe4c   : > { %5716 = vmatprep.subr.bf16.mxu0 %v8943_v22 }
 0xe4e   : > { %5430 = vmatpush1.bf16.msra.mxu1 %v8488_v7  ;;  %v8519_v7 = vld [vmem:[#allocation13 + $0x630] sm:$0xff]  }
 0xe4f   : > { %5717 = vmatpush1.bf16.msra.mxu0 %v8489_v23  ;;  %5431 = vmatprep.subr.bf16.mxu1 %v8943_v22  ;;  %v8520_v23 = vld [vmem:[#allocation13 + $0x638] sm:$0xff]  }
 0xe50   : > { %5718 = vmatprep.subr.bf16.mxu0 %v8943_v22 }
 0xe52   : > { %5432 = vmatpush1.bf16.msra.mxu1 %v8490_v9 }
 0xe53   : > { %5719 = vmatpush1.bf16.msra.mxu0 %v8491_v39  ;;  %5433 = vmatprep.subr.bf16.mxu1 %v8943_v22 }
 0xe54   : > { %5720 = vmatprep.subr.bf16.mxu0 %v8943_v22 }
 0xe56   : > { %5434 = vmatpush1.bf16.msra.mxu1 %v8492_v4 }
 0xe57   : > { %5721 = vmatpush1.bf16.msra.mxu0 %v8493_v46  ;;  %7613 = vmatprep.subr.bf16.mxu1 %v8494_v24 }
 0xe58   : > { %5722 = vmatprep.subr.bf16.mxu0 %v8943_v22 }
 0xe59   : > { %5450 = vmatmul.mubr.bf16.vlgmr.msra.gmra.mrb[112].mxu1 %v10278_v61  ;;  %v8503_v61 = vld [vmem:[#allocation13 + $0x590] sm:$0xff]  }
 0xe5a   : > { %7614 = vmatpush3.bf16.msra.mxu1 %v8496_v33  ;;  %5990 = vmatprep.mubr.bf16.mxu1 %v10329_v27  ;;  %v8504_v27 = vld [vmem:[#allocation13 + $0x5d8] sm:$0xff]  }
 0xe5b   : > { %5723 = vmatpush1.bf16.msra.mxu0 %v8495_v26  ;;  %7615 = vmatprep.subr.bf16.mxu1 %v8497_v47 }
 0xe5c   : > { %5724 = vmatprep.subr.bf16.mxu0 %v8943_v22 }
 0xe5e   : > { %7616 = vmatpush3.bf16.msra.mxu1 %v8499_v20 }
 0xe5f   : > { %5725 = vmatpush1.bf16.msra.mxu0 %v8498_v60  ;;  %7617 = vmatprep.subr.bf16.mxu1 %v8500_v29 }
 0xe60   : > { %7815 = vmatprep.subr.bf16.mxu0 %v8940_v0 }
 0xe62   : > { %5741 = vmatmul.mubr.bf16.vlgmr.msra.gmra.mrb[144].mxu0 %v10309_v40  ;;  %7618 = vmatpush3.bf16.msra.mxu1 %v8501_v30  ;;  %v8506_v40 = vld [vmem:[#allocation13 + $0x5e0] sm:$0xff]  }
 0xe63   : > { %7619 = vmatprep.subr.bf16.mxu1 %v8502_v53  ;;  %7819 = vmatprep.mubr.msk.bf16.mxu0 %vm8941_vm0, %v8940_v0 }
 0xe64   : > { %v7475_v21 = vpop.f32.mrb[88].mxu1  ;;  %v4054_v25 = vpop.f32.mrb[120].mxu0 }
 0xe65   : > { %v7476_v50 = vpop.f32.mrb[89].mxu1  ;;  %v4056_v10 = vpop.f32.mrb[121].mxu0 }
 0xe66   : > { %v7477_v14 = vadd.f32 %v7476_v50, %v7475_v21  ;;  %7620 = vmatpush3.bf16.msra.mxu1 %v8503_v61  ;;  %v7478_v44 = vpop.f32.mrb[90].mxu1  ;;  %v4057_v48 = vpop.f32.mrb[122].mxu0 }
 0xe67   : > { %v7479_v16 = vpop.f32.mrb[91].mxu1  ;;  %v4059_v12 = vpop.f32.mrb[123].mxu0  ;;  %7621 = vmatprep.subr.bf16.mxu1 %v8504_v27 }
 0xe68   : > { %v4055_v42 = vadd.f32 %v7477_v14, %v4054_v25  ;;  %v7480_v45 = vadd.f32 %v7479_v16, %v7478_v44 }
 0xe6a   : > { %v4058_v56 = vadd.f32 %v7480_v45, %v4057_v48  ;;  %7622 = vmatpush3.bf16.msra.mxu1 %v8505_v41 }
 0xe6b   : > { %7623 = vmatprep.subr.bf16.mxu1 %v8506_v40 }
 0xe6e   : > { %7624 = vmatpush3.bf16.msra.mxu1 %v8507_v38 }
 0xe6f   : > { %7625 = vmatprep.subr.bf16.mxu1 %v8508_v49 }
 0xe72   : > { %7626 = vmatpush3.bf16.msra.mxu1 %v8509_v31 }
 0xe73   : > { %7627 = vmatprep.subr.bf16.mxu1 %v8510_v34 }
 0xe76   : > { %7628 = vmatpush3.bf16.msra.mxu1 %v8511_v35 }
 0xe77   : > { %5999 = vmatprep.subr.bf16.mxu1 %v8943_v22 }
 0xe79   : > { %5991 = vmatmul.mubr.bf16.vlgmr.msra.gmra.mrb[116].mxu1 %v10325_v17  ;;  %v8516_v17 = vld [vmem:[#allocation13 + $0x618] sm:$0xff]  }
 0xe7a   : > { %6000 = vmatpush1.bf16.msra.mxu1 %v8512_v15  ;;  %7352 = vmatprep.mubr.msk.bf16.mxu1 %vm2114_vm9, %v10331_v19 }
 0xe7b   : > { %6001 = vmatprep.subr.bf16.mxu1 %v8943_v22 }
 0xe7e   : > { %6002 = vmatpush1.bf16.msra.mxu1 %v8513_v37 }
 0xe7f   : > { %6003 = vmatprep.subr.bf16.mxu1 %v8943_v22 }
 0xe82   : > { %6004 = vmatpush1.bf16.msra.mxu1 %v8514_v58 }
 0xe83   : > { %6005 = vmatprep.subr.bf16.mxu1 %v8943_v22 }
 0xe84   : > { %v7497_v51 = vpop.f32.mrb[92].mxu1 }
 0xe85   : > { %v7498_v62 = vpop.f32.mrb[93].mxu1 }
 0xe86   : > { %v7499_v63 = vadd.f32 %v7498_v62, %v7497_v51  ;;  %v7500_v1 = vpop.f32.mrb[94].mxu1  ;;  %6006 = vmatpush1.bf16.msra.mxu1 %v8515_v59  ;;  %v8521_v62 = vld [vmem:[#allocation15] ss:$8 sps:$4 sm:$0xff]  }
 0xe87   : > { %v7501_v2 = vpop.f32.mrb[95].mxu1  ;;  %6007 = vmatprep.subr.bf16.mxu1 %v8943_v22  ;;  %7816 = vmatpush3.bf16.msra.mxu0 %v8521_v62 }
 0xe88   : > { %v7502_v19 = vadd.f32 %v7501_v2, %v7500_v1  ;;  %v4249_v3 = vadd.f32 %v7499_v63, %v4055_v42  ;;  %v4289_v5 = vpop.f32.mrb[124].mxu0  ;;  %7817 = vmatprep.subr.bf16.mxu0 %v8940_v0  ;;  %v8522_v1 = vld [vmem:[#allocation15 + $0x10] ss:$0 sps:$4 sm:$0x33]  }
 0xe89   : > { %v4291_v43 = vpop.f32.mrb[125].mxu0 }
 0xe8a   : > { %v4290_v13 = vadd.f32 %v4289_v5, %v4249_v3  ;;  %v4252_v32 = vadd.f32 %v7502_v19, %v4058_v56  ;;  %v4292_v11 = vpop.f32.mrb[126].mxu0  ;;  %6008 = vmatpush1.bf16.msra.mxu1 %v8516_v17  ;;  %v6078_v17 = vsel %vm847_vm2, %v8522_v1, 0 }
 0xe8b   : > { %v4294_v8 = vpop.f32.mrb[127].mxu0  ;;  %6009 = vmatprep.subr.bf16.mxu1 %v8943_v22  ;;  %7818 = vmatpush3.bf16.msra.mxu0 %v6078_v17 }
 0xe8c   : > { %v4293_v36 = vadd.f32 %v4292_v11, %v4252_v32  ;;  %7823 = vmatprep.subr.bf16.mxu0 %v8940_v0 }
 0xe8e   : > { %6010 = vmatpush1.bf16.msra.mxu1 %v8517_v6 }
 0xe8f   : > { %6011 = vmatprep.subr.bf16.mxu1 %v8943_v22 }
 0xe92   : > { %6012 = vmatpush1.bf16.msra.mxu1 %v8518_v28 }
 0xe93   : > { %6013 = vmatprep.subr.bf16.mxu1 %v8943_v22 }
 0xe96   : > { %6014 = vmatpush1.bf16.msra.mxu1 %v8519_v7 }
 0xe97   : > { %6015 = vmatprep.subr.bf16.mxu1 %v8943_v22 }
 0xe9a   : > { %6016 = vmatpush1.bf16.msra.mxu1 %v8520_v23 }
 0xe9b   : > { %7855 = vmatprep.subr.bf16.mxu1 %v8940_v0 }
 0xe9d   : > { %6032 = vmatmul.mubr.bf16.vlgmr.msra.gmra.mrb[120].mxu1 %v10327_v18 }
 0xe9e   : > { %7859 = vmatprep.mubr.msk.bf16.mxu1 %vm8941_vm0, %v8940_v0 }
 0xea4   : > { %v7519_v9 = vpop.f32.mrb[96].mxu1 }
 0xea5   : > { %v7520_v39 = vpop.f32.mrb[97].mxu1 }
 0xea6   : > { %v7521_v4 = vadd.f32 %v7520_v39, %v7519_v9  ;;  %v7522_v46 = vpop.f32.mrb[98].mxu1 }
 0xea7   : > { %v7523_v24 = vpop.f32.mrb[99].mxu1 }
 0xea8   : > { %v7524_v33 = vadd.f32 %v7523_v24, %v7522_v46 }
 0xeac   : > { %v4578_v26 = vpop.f32.mrb[128].mxu0 }
 0xead   : > { %v4579_v47 = vadd.f32 %v7521_v4, %v4578_v26  ;;  %v4580_v20 = vpop.f32.mrb[129].mxu0 }
 0xeae   : > { %v4581_v60 = vpop.f32.mrb[130].mxu0 }
 0xeaf   : > { %v4585_v29 = vadd.f32 %v4579_v47, %v4290_v13  ;;  %v4582_v22 = vadd.f32 %v7524_v33, %v4581_v60  ;;  %v4583_v30 = vpop.f32.mrb[131].mxu0 }
 0xeb1   : > { %v4586_v53 = vadd.f32 %v4582_v22, %v4293_v36 }
 0xec4   : > { %v7541_v61 = vpop.f32.mrb[100].mxu1 }
 0xec5   : > { %v7542_v27 = vpop.f32.mrb[101].mxu1 }
 0xec6   : > { %v7543_v18 = vadd.f32 %v7542_v27, %v7541_v61  ;;  %v7544_v21 = vpop.f32.mrb[102].mxu1 }
 0xec7   : > { %v7545_v25 = vpop.f32.mrb[103].mxu1 }
 0xec8   : > { %v7546_v50 = vadd.f32 %v7545_v25, %v7544_v21 }
 0xecd   : > { %v7563_v10 = vpop.f32.mrb[132].mxu0 }
 0xece   : > { %v7564_v14 = vpop.f32.mrb[133].mxu0 }
 0xecf   : > { %v7565_v44 = vadd.f32 %v7564_v14, %v7563_v10  ;;  %v7566_v48 = vpop.f32.mrb[134].mxu0 }
 0xed0   : > { %v7567_v41 = vpop.f32.mrb[135].mxu0 }
 0xed1   : > { %v7568_v16 = vadd.f32 %v7567_v41, %v7566_v48  ;;  %v7353_v48 = vld [vmem:[#allocation18 + $0x17] ss:$0 sm:$0xff] }
 0xee8   : > { %v4869_v12 = vpop.f32.mrb[104].mxu1 }
 0xee9   : > { %v4870_v40 = vadd.f32 %v7543_v18, %v4869_v12  ;;  %v4871_v42 = vpop.f32.mrb[105].mxu1 }
 0xeea   : > { %v4872_v45 = vpop.f32.mrb[106].mxu1 }
 0xeeb   : > { %v4876_v56 = vadd.f32 %v4870_v40, %v4585_v29  ;;  %v4873_v38 = vadd.f32 %v7546_v50, %v4872_v45  ;;  %v4874_v49 = vpop.f32.mrb[107].mxu1 }
 0xeed   : > { %v4877_v31 = vadd.f32 %v4873_v38, %v4586_v53 }
 0xef1   : > { %v5160_v34 = vpop.f32.mrb[136].mxu0 }
 0xef2   : > { %v5161_v35 = vadd.f32 %v7565_v44, %v5160_v34  ;;  %v5162_v15 = vpop.f32.mrb[137].mxu0 }
 0xef3   : > { %v5163_v37 = vpop.f32.mrb[138].mxu0  ;;  %v8525_v15 = vld [vmem:[#allocation9 + $0x34] ss:$12 sps:$4 sm:$0xff]  }
 0xef4   : > { %v5167_v58 = vadd.f32 %v5161_v35, %v4876_v56  ;;  %v5164_v59 = vadd.f32 %v7568_v16, %v5163_v37  ;;  %v5165_v51 = vpop.f32.mrb[139].mxu0  ;;  %v8524_v35 = vld [vmem:[#allocation9 + $0x1c] ss:$12 sps:$4 sm:$0xff]   ;;  %v8526_v37 = vld [vmem:[#allocation9 + $0x4c] ss:$0 sps:$4 sm:$0x11]  }
 0xef6   : > { %v5168_v63 = vadd.f32 %v5164_v59, %v4877_v31  ;;  %v8523_v31 = vld [vmem:[#allocation9 + $0x4] ss:$12 sps:$4 sm:$0xff]   ;;  %v7354_v59 = vld [vmem:[#allocation18 + $0x18] ss:$0 sm:$0xff] }
 0xf08   : > { %v7585_v2 = vpop.f32.mrb[108].mxu1 }
 0xf09   : > { %v7586_v19 = vpop.f32.mrb[109].mxu1 }
 0xf0a   : > { %v7587_v3 = vadd.f32 %v7586_v19, %v7585_v2  ;;  %v7588_v5 = vpop.f32.mrb[110].mxu1 }
 0xf0b   : > { %v7589_v43 = vpop.f32.mrb[111].mxu1 }
 0xf0c   : > { %v7590_v13 = vadd.f32 %v7589_v43, %v7588_v5  ;;  %v8527_v43 = vld [vmem:[#allocation16] ss:$12 sps:$4 sm:$0xff]  }
 0xf11   : > { %v7607_v32 = vpop.f32.mrb[140].mxu0 }
 0xf12   : > { %v7608_v11 = vpop.f32.mrb[141].mxu0 }
 0xf13   : > { %v7609_v6 = vadd.f32 %v7608_v11, %v7607_v32  ;;  %v7610_v8 = vpop.f32.mrb[142].mxu0  ;;  %v7358_v11 = vld [vmem:[#allocation18 + $0xc] ss:$0 sm:$0xff] }
 0xf14   : > { %v7611_v36 = vpop.f32.mrb[143].mxu0 }
 0xf15   : > { %v7612_v28 = vadd.f32 %v7611_v36, %v7610_v8 }
 0xf2c   : > { %v5451_v7 = vpop.f32.mrb[112].mxu1 }
 0xf2d   : > { %v5452_v23 = vadd.f32 %v7587_v3, %v5451_v7  ;;  %v5453_v9 = vpop.f32.mrb[113].mxu1 }
 0xf2e   : > { %v5454_v39 = vpop.f32.mrb[114].mxu1 }
 0xf2f   : > { %v5458_v4 = vadd.f32 %v5452_v23, %v5167_v58  ;;  %v5455_v46 = vadd.f32 %v7590_v13, %v5454_v39  ;;  %v5456_v24 = vpop.f32.mrb[115].mxu1  ;;  %v6163_v58 = vsel %vm2017_vm10, %v8526_v37, 0  ;;  %v8528_v13 = vld [vmem:[#allocation16 + $0x18] ss:$12 sps:$4 sm:$0x7f]  }
 0xf30   : > { %v6237_v32 = vsel %vm1081_vm5, %v8528_v13, 0  ;;  %v8530_v24 = vld [vmem:[#allocation9 + $0x20] ss:$12 sps:$4 sm:$0xff]  }
 0xf31   : > { %v5459_v33 = vadd.f32 %v5455_v46, %v5168_v63 }
 0xf35   : > { %v5742_v26 = vpop.f32.mrb[144].mxu0 }
 0xf36   : > { %v5743_v47 = vadd.f32 %v7609_v6, %v5742_v26  ;;  %v5744_v20 = vpop.f32.mrb[145].mxu0  ;;  %v8532_v26 = vld [vmem:[#allocation9 + $0x50] ss:$0 sps:$4 sm:$0x11]  }
 0xf37   : > { %v5745_v60 = vpop.f32.mrb[146].mxu0  ;;  %v8533_v20 = vld [vmem:[%s10547_s30] sm:$0xff]  }
 0xf38   : > { %v5749_v29 = vadd.f32 %v5743_v47, %v5458_v4  ;;  %v5746_v22 = vadd.f32 %v7612_v28, %v5745_v60  ;;  %v5747_v30 = vpop.f32.mrb[147].mxu0  ;;  %v8529_v4 = vld [vmem:[#allocation9 + $0x8] ss:$12 sps:$4 sm:$0xff]   ;;  %v6305_v47 = vsel %vm2017_vm10, %v8532_v26, 0  ;;  %7856 = vmatpush3.bf16.msra.mxu1 %v8533_v20  ;;  %v8534_v60 = vld [vmem:[%s10547_s30 + $0x8] sm:$0x1f]  }
 0xf39   : > { %7857 = vmatprep.subr.bf16.mxu1 %v8940_v0 }
 0xf3a   : > { %v5750_v53 = vadd.f32 %v5746_v22, %v5459_v33  ;;  %v8531_v33 = vld [vmem:[#allocation9 + $0x38] ss:$12 sps:$4 sm:$0xff]  }
 0xf4c   : > { %v7629_v61 = vpop.f32.mrb[116].mxu1 }
 0xf4d   : > { %v7630_v27 = vpop.f32.mrb[117].mxu1 }
 0xf4e   : > { %v7631_v18 = vadd.f32 %v7630_v27, %v7629_v61  ;;  %v7632_v21 = vpop.f32.mrb[118].mxu1  ;;  %v7372_v27 = vld [vmem:[#allocation18 + $0x19] ss:$0 sm:$0xff] }
 0xf4f   : > { %v7633_v25 = vpop.f32.mrb[119].mxu1 }
 0xf50   : > { %v7634_v50 = vadd.f32 %v7633_v25, %v7632_v21 }
 0xf70   : > { %v6033_v10 = vpop.f32.mrb[120].mxu1 }
 0xf71   : > { %v6034_v14 = vadd.f32 %v7631_v18, %v6033_v10  ;;  %v6035_v44 = vpop.f32.mrb[121].mxu1 }
 0xf72   : > { %v6036_v41 = vpop.f32.mrb[122].mxu1 }
 0xf73   : > { %v6040_v16 = vadd.f32 %v6034_v14, %v5749_v29  ;;  %v6037_v12 = vadd.f32 %v7634_v50, %v6036_v41  ;;  %v6038_v40 = vpop.f32.mrb[123].mxu1  ;;  %v6387_v29 = vsel %vm6386_vm4, 4294967295, %v8942_v52 }
 0xf74   : > { %v6388_v55 = vsel %vm3415_vm14, %v6387_v29, 0 }
 0xf75   : > { %v6049_v42 = vadd.f32 %v7353_v48, %v6040_v16  ;;  %v6041_v45 = vadd.f32 %v6037_v12, %v5750_v53  ;;  %v6390_v54 = vand.u32 %v8534_v60, %v6388_v55  ;;  %v8535_v16 = vld [vmem:[#allocation16 + $0x4] ss:$12 sps:$4 sm:$0xff]   ;;  %v8536_v12 = vld [vmem:[#allocation16 + $0x1c] ss:$12 sps:$4 sm:$0x7f]  }
 0xf76   : > { %v6462_v40 = vsel %vm1081_vm5, %v8536_v12, 0 }
 0xf77   : > { %v6050_v56 = vadd.f32 %v7353_v48, %v6041_v45  ;;  %v6051_v38 = vmax.f32 %v6049_v42, 0.0  ;;  %7858 = vmatpush3.bf16.msra.mxu1 %v6390_v54  ;;  %v7373_v42 = vld [vmem:[#allocation18 + $0x1a] ss:$0 sm:$0xff] }
 0xf78   : > { %7863 = vmatprep.subr.bf16.mxu1 %v8940_v0 }
 0xf79   : > { %v6052_v49 = vmax.f32 %v6050_v56, 0.0 }
 0xf7b   : > { %v6056_v34 = vpack.c.bf16 %v6052_v49, %v6051_v38 }
 0xf7d   : > { %7820 = vmatmul.mubr.msk.bf16.vlgmr.msra.gmra.mrb[148].mxu0 %vm6073_vm1, %v6056_v34 }
 0xf7e   : > { %7824 = vmatpush3.bf16.msra.mxu0 %v8523_v31  ;;  %7831 = vmatprep.mubr.msk.bf16.mxu0 %vm8941_vm0, %v8940_v0 }
 0xf7f   : > { %7825 = vmatprep.subr.bf16.mxu0 %v8940_v0 }
 0xf82   : > { %7826 = vmatpush3.bf16.msra.mxu0 %v8524_v35 }
 0xf83   : > { %7827 = vmatprep.subr.bf16.mxu0 %v8940_v0 }
 0xf86   : > { %7828 = vmatpush3.bf16.msra.mxu0 %v8525_v15 }
 0xf87   : > { %7829 = vmatprep.subr.bf16.mxu0 %v8940_v0 }
 0xf8a   : > { %7830 = vmatpush3.bf16.msra.mxu0 %v6163_v58  ;;  %v8537_v58 = vld [vmem:[#allocation16 + $0x8] ss:$12 sps:$4 sm:$0xff]  }
 0xf8b   : > { %7835 = vmatprep.subr.bf16.mxu0 %v8940_v0 }
0x1050   : > { %v6114_v51 = vpop.f32.mrb[148].mxu0 }
0x1051   : > { %v6115_v62 = vadd.f32 %v7354_v59, %v6114_v51  ;;  %v7821_v63 = vpop.f32.mrb[149].mxu0 }
0x1052   : > { %v6117_v1 = vpop.f32.mrb[150].mxu0 }
0x1053   : > { %v6118_v17 = vadd.f32 %v7354_v59, %v6117_v1  ;;  %v7822_v2 = vpop.f32.mrb[151].mxu0  ;;  %v6121_v19 = vmax.f32 %v6115_v62, 0.0  ;;  %v8538_v59 = vld [vmem:[#allocation16 + $0x20] ss:$12 sps:$4 sm:$0x7f]  }
0x1054   : > { %v6534_v51 = vsel %vm1081_vm5, %v8538_v59, 0  ;;  %v7377_v62 = vld [vmem:[#allocation18 + $0x1b] ss:$0 sm:$0xff] }
0x1055   : > { %v6122_v3 = vmax.f32 %v6118_v17, 0.0 }
0x1057   : > { %v6130_v5 = vpack.c.bf16 %v6122_v3, %v6121_v19 }
0x1059   : > { %7832 = vmatmul.mubr.msk.bf16.vlgmr.msra.gmra.mrb[152].mxu0 %vm2013_vm11, %v6130_v5 }
0x105a   : > { %7839 = vmatprep.mubr.msk.bf16.mxu0 %vm8941_vm0, %v8940_v0  ;;  %7836 = vmatpush3.bf16.msra.mxu0 %v8527_v43 }
0x105b   : > { %7837 = vmatprep.subr.bf16.mxu0 %v8940_v0 }
0x105e   : > { %7838 = vmatpush3.bf16.msra.mxu0 %v6237_v32  ;;  %v8539_v32 = vld [vmem:[#allocation15 + $0x4] ss:$8 sps:$4 sm:$0xff]  }
0x105f   : > { %7843 = vmatprep.subr.bf16.mxu0 %v8940_v0 }
0x112c   : > { %v6199_v6 = vpop.f32.mrb[152].mxu0 }
0x112d   : > { %v6200_v8 = vadd.f32 %v7358_v11, %v6199_v6  ;;  %v7833_v36 = vpop.f32.mrb[153].mxu0 }
0x112e   : > { %v6202_v28 = vpop.f32.mrb[154].mxu0 }
0x112f   : > { %v6203_v7 = vadd.f32 %v7358_v11, %v6202_v28  ;;  %v7834_v23 = vpop.f32.mrb[155].mxu0  ;;  %v6206_v9 = vmax.f32 %v6200_v8, 0.0  ;;  %v8540_v11 = vld [vmem:[#allocation15 + $0x14] ss:$0 sps:$4 sm:$0x33]  }
0x1130   : > { %v6603_v6 = vsel %vm847_vm2, %v8540_v11, 0  ;;  %v7381_v8 = vld [vmem:[#allocation18 + $0x1c] ss:$0 sm:$0xff] }
0x1131   : > { %v6207_v39 = vmax.f32 %v6203_v7, 0.0 }
0x1133   : > { %v6220_v46 = vpack.c.bf16 %v6207_v39, %v6206_v9 }
0x1135   : > { %7840 = vmatmul.mubr.msk.bf16.vlgmr.msra.gmra.mrb[156].mxu0 %vm6232_vm3, %v6220_v46 }
0x1136   : > { %7844 = vmatpush3.bf16.msra.mxu0 %v8529_v4  ;;  %7851 = vmatprep.mubr.msk.bf16.mxu0 %vm8941_vm0, %v8940_v0 }
0x1137   : > { %7845 = vmatprep.subr.bf16.mxu0 %v8940_v0 }
0x113a   : > { %7846 = vmatpush3.bf16.msra.mxu0 %v8530_v24 }
0x113b   : > { %7847 = vmatprep.subr.bf16.mxu0 %v8940_v0 }
0x113e   : > { %7848 = vmatpush3.bf16.msra.mxu0 %v8531_v33  ;;  %v7385_v33 = vld [vmem:[#allocation18 + $0x1d] ss:$0 sm:$0xff] }
0x113f   : > { %7849 = vmatprep.subr.bf16.mxu0 %v8940_v0 }
0x1142   : > { %7850 = vmatpush3.bf16.msra.mxu0 %v6305_v47 }
0x1143   : > { %7871 = vmatprep.subr.bf16.mxu0 %v8940_v0 }
0x1145   : > { %7852 = vmatmul.mubr.msk.bf16.vlgmr.msra.gmra.mrb[160].mxu0 %vm2013_vm11, %v6219_v57 }
0x1146   : > { %7875 = vmatprep.mubr.msk.bf16.mxu0 %vm8941_vm0, %v8940_v0  ;;  %7872 = vmatpush3.bf16.msra.mxu0 %v8537_v58 }
0x1147   : > { %7873 = vmatprep.subr.bf16.mxu0 %v8940_v0 }
0x114a   : > { %7874 = vmatpush3.bf16.msra.mxu0 %v6534_v51 }
0x1208   : > { %v6273_v57 = vpop.f32.mrb[156].mxu0 }
0x1209   : > { %v7841_v22 = vpop.f32.mrb[157].mxu0 }
0x120a   : > { %v6276_v30 = vpop.f32.mrb[158].mxu0 }
0x120b   : > { %v7842_v53 = vpop.f32.mrb[159].mxu0 }
0x1218   : > { %v6341_v61 = vpop.f32.mrb[160].mxu0 }
0x1219   : > { %v6342_v18 = vadd.f32 %v6341_v61, %v6273_v57  ;;  %v7853_v21 = vpop.f32.mrb[161].mxu0 }
0x121a   : > { %v6344_v25 = vpop.f32.mrb[162].mxu0 }
0x121b   : > { %v6355_v50 = vadd.f32 %v7372_v27, %v6342_v18  ;;  %v6345_v10 = vadd.f32 %v6344_v25, %v6276_v30  ;;  %v7854_v52 = vpop.f32.mrb[163].mxu0 }
0x121d   : > { %v6356_v14 = vadd.f32 %v7372_v27, %v6345_v10  ;;  %v6357_v44 = vmax.f32 %v6355_v50, 0.0 }
0x121f   : > { %v6358_v48 = vmax.f32 %v6356_v14, 0.0 }
0x1221   : > { %v6363_v41 = vpack.c.bf16 %v6358_v48, %v6357_v44 }
0x1223   : > { %7860 = vmatmul.mubr.msk.bf16.vlgmr.msra.gmra.mrb[124].mxu1 %vm6382_vm6, %v6363_v41 }
0x1224   : > { %7867 = vmatprep.mubr.msk.bf16.mxu1 %vm8941_vm0, %v8940_v0  ;;  %7864 = vmatpush3.bf16.msra.mxu1 %v8535_v16 }
0x1225   : > { %7865 = vmatprep.subr.bf16.mxu1 %v8940_v0 }
0x1228   : > { %7866 = vmatpush3.bf16.msra.mxu1 %v6462_v40 }
0x1229   : > { %7879 = vmatprep.subr.bf16.mxu1 %v8940_v0 }
0x12f6   : > { %v6426_v45 = vpop.f32.mrb[124].mxu1 }
0x12f7   : > { %v6427_v56 = vadd.f32 %v7373_v42, %v6426_v45  ;;  %v7861_v38 = vpop.f32.mrb[125].mxu1 }
0x12f8   : > { %v6429_v49 = vpop.f32.mrb[126].mxu1 }
0x12f9   : > { %v6430_v31 = vadd.f32 %v7373_v42, %v6429_v49  ;;  %v7862_v34 = vpop.f32.mrb[127].mxu1  ;;  %v6433_v35 = vmax.f32 %v6427_v56, 0.0 }
0x12fb   : > { %v6434_v15 = vmax.f32 %v6430_v31, 0.0 }
0x12fd   : > { %v6439_v37 = vpack.c.bf16 %v6434_v15, %v6433_v35 }
0x12ff   : > { %7868 = vmatmul.mubr.msk.bf16.vlgmr.msra.gmra.mrb[128].mxu1 %vm6232_vm3, %v6439_v37 }
0x1300   : > { %7883 = vmatprep.mubr.msk.bf16.mxu1 %vm8941_vm0, %v8940_v0  ;;  %7880 = vmatpush3.bf16.msra.mxu1 %v8539_v32  ;;  %vm6666_vm0 = vcmask 7168  }
0x1301   : > { %7881 = vmatprep.subr.bf16.mxu1 %v8940_v0 }
0x1304   : > { %7882 = vmatpush3.bf16.msra.mxu1 %v6603_v6 }
0x13d2   : > { %v6498_v63 = vpop.f32.mrb[128].mxu1 }
0x13d3   : > { %v6499_v1 = vadd.f32 %v7377_v62, %v6498_v63  ;;  %v7869_v17 = vpop.f32.mrb[129].mxu1 }
0x13d4   : > { %v6501_v2 = vpop.f32.mrb[130].mxu1 }
0x13d5   : > { %v6502_v19 = vadd.f32 %v7377_v62, %v6501_v2  ;;  %v7870_v3 = vpop.f32.mrb[131].mxu1  ;;  %v6505_v5 = vmax.f32 %v6499_v1, 0.0 }
0x13d7   : > { %v6506_v43 = vmax.f32 %v6502_v19, 0.0 }
0x13d9   : > { %v6511_v13 = vpack.c.bf16 %v6506_v43, %v6505_v5 }
0x13db   : > { %7876 = vmatmul.mubr.msk.bf16.vlgmr.msra.gmra.mrb[164].mxu0 %vm6232_vm3, %v6511_v13 }
0x14ae   : > { %v6570_v36 = vpop.f32.mrb[164].mxu0 }
0x14af   : > { %v6571_v28 = vadd.f32 %v7381_v8, %v6570_v36  ;;  %v7877_v7 = vpop.f32.mrb[165].mxu0 }
0x14b0   : > { %v6573_v23 = vpop.f32.mrb[166].mxu0 }
0x14b1   : > { %v6574_v9 = vadd.f32 %v7381_v8, %v6573_v23  ;;  %v7878_v39 = vpop.f32.mrb[167].mxu0  ;;  %v6577_v4 = vmax.f32 %v6571_v28, 0.0 }
0x14b3   : > { %v6578_v46 = vmax.f32 %v6574_v9, 0.0 }
0x14b5   : > { %v6582_v24 = vpack.c.bf16 %v6578_v46, %v6577_v4 }
0x14b7   : > { %7884 = vmatmul.mubr.msk.bf16.vlgmr.msra.gmra.mrb[132].mxu1 %vm6073_vm1, %v6582_v24 }
0x158a   : > { %v6639_v26 = vpop.f32.mrb[132].mxu1 }
0x158b   : > { %v6640_v0 = vadd.f32 %v7385_v33, %v6639_v26  ;;  %v7885_v47 = vpop.f32.mrb[133].mxu1 }
0x158c   : > { %v6642_v20 = vpop.f32.mrb[134].mxu1 }
0x158d   : > { %v6646_v60 = vand.u32 2147483647, %v6640_v0  ;;  %v6643_v29 = vadd.f32 %v7385_v33, %v6642_v20  ;;  %v7886_v55 = vpop.f32.mrb[135].mxu1  ;;  %vm6654_vm2 = vcmp.ge.f32.partialorder %v6640_v0, 0.0 }
0x158f   : > { %v6648_v54 = vsub.f32 0.0, %v6646_v60  ;;  %v6647_v57 = vand.u32 2147483647, %v6643_v29  ;;  %vm6655_vm5 = vcmp.ge.f32.partialorder %v6643_v29, 0.0 }
0x1591   : > { %v6650_v22 = vmul.f32 1.442695, %v6648_v54  ;;  %v6649_v30 = vsub.f32 0.0, %v6647_v57 }
0x1593   : > { %8541 = vpow2.f32 %v6650_v22  ;;  %v6652_v53 = vmul.f32 1.442695, %v6649_v30 }
0x1595   : > { %8543 = vpow2.f32 %v6652_v53 }
0x159d   : > { %v8542_v61 = vpop.eup %8541 }
0x159e   : > { %v6656_v27 = vadd.f32 1.0, %v8542_v61 }
0x159f   : > { %v8544_v18 = vpop.eup %8543 }
0x15a0   : > { %8545 = vrcp.f32 %v6656_v27  ;;  %v6657_v21 = vadd.f32 1.0, %v8544_v18 }
0x15a2   : > { %8547 = vrcp.f32 %v6657_v21 }
0x15aa   : > { %v8546_v25 = vpop.eup %8545 }
0x15ab   : > { %v6662_v50 = vmul.f32 %v8546_v25, %v8542_v61 }
0x15ac   : > { %v8548_v10 = vpop.eup %8547 }
0x15ad   : > { %v6664_v52 = vsel %vm6654_vm2, %v8546_v25, %v6662_v50  ;;  %v6663_v14 = vmul.f32 %v8548_v10, %v8544_v18 }
0x15ae   : > { %6667 = vst.msk [vmem:[%s707_s18] sm:$0xff] %vm6666_vm0, %v6664_v52 }
0x15af   : > { %v6665_v44 = vsel %vm6655_vm5, %v8548_v10, %v6663_v14 }
0x15b0   : > { %6668 = vst.msk [vmem:[%s707_s18 + $0x8] sm:$0xff] %vm6666_vm0, %v6665_v44 }
0x15b1 PF: > { %p31_p1 = scmp.ge.s32.totalorder %s9316_s29, 4   ;;  %s10549_s21 = smov %s8911_s22 }
0x15b2   : > { %s10550_s22 = smov %s8915_s23  ;;  %s10551_s23 = smov %s9328_s19 }
0x15b3   : > { %s10552_s24 = smov %s9316_s29  ;;  %33 = sbr.rel (!%p31_p1) target bundleno = 16 (0x10), region = 167 }
0x15ba   :  { %6691 = vsyncpa [#allocation3], 1 }
0x15bb   :  { %6693 = vsyncpa [#allocation3 + $0x1], 1 }
0x15bc   :  { %6694 = vsyncpa [#allocation5], 1 }
0x15bd   :  { %6695 = vsyncpa [#allocation8], 1 }
0x15be   :  { %6696 = vsyncpa [#allocation11], 1 }
0x15bf   :  { %6697 = vsyncpa [#allocation14], 1 }
0x15c0   :  { %6698 = vsyncpa [#allocation17], 1 }

</bundles_post_ra>
